<compile_context>
chip_gen: v7x
topology: tpu7x:2x2x1
jax: 0.10.0
libtpu: 0.0.40
codegen_flags: <defaults>
</compile_context>

<pallas_src>
import functools

import jax
import jax.numpy as jnp
from jax.experimental import pallas as pl
from jax.experimental.pallas import tpu as pltpu


def _vq_kernel(x_ref, e_ref, esq_ref, idx_ref, q_ref, sse_ref, *,
               rows_valid, rows_total, use_bf16_dist):
    """One grid step: a (TN, D) tile of flat_x against the full (K, D) codebook."""
    i = pl.program_id(0)

    x = x_ref[...]                         # (TN, D) f32
    e = e_ref[...]                         # (K,  D) f32
    e_sq = esq_ref[...]                    # (1,  K) f32  (precomputed ||e||^2)
    tn, _ = x.shape
    k = e.shape[0]

    # -2 * x @ e^T on the MXU (contract last dims of both; no transpose materialized).
    if use_bf16_dist:
        xe = jax.lax.dot_general(
            x.astype(jnp.bfloat16), e.astype(jnp.bfloat16),
            dimension_numbers=(((1,), (1,)), ((), ())),
            preferred_element_type=jnp.float32)            # (TN, K)
    else:
        xe = jax.lax.dot_general(
            x, e, dimension_numbers=(((1,), (1,)), ((), ())),
            preferred_element_type=jnp.float32)            # (TN, K)

    # ||x||^2 is constant per row -> argmin-invariant, so omit it.
    dist = e_sq - 2.0 * xe                                  # (TN, K)

    # argmin over the codebook axis (first occurrence wins, matching jnp.argmin).
    min_dist = jnp.min(dist, axis=1, keepdims=True)         # (TN, 1)
    k_iota = jax.lax.broadcasted_iota(jnp.int32, (tn, k), 1)
    idx_col = jnp.min(jnp.where(dist == min_dist, k_iota, k),
                      axis=1, keepdims=True).astype(jnp.int32)  # (TN, 1)

    # Quantize via one-hot matmul (gather-free, MXU).
    one_hot = (k_iota == idx_col).astype(jnp.float32)       # (TN, K)
    q = jnp.dot(one_hot, e, preferred_element_type=jnp.float32)  # (TN, D)
    q_ref[...] = q

    # Lane-dense index store: derive (8, TN) rows of indices via an MXU matvec
    # (k_rows @ one_hot^T). Values are exact small integers -> exact in f32.
    k_rows = jax.lax.broadcasted_iota(jnp.int32, (8, k), 1).astype(jnp.float32)
    idx_rows = jax.lax.dot_general(
        k_rows, one_hot, dimension_numbers=(((1,), (1,)), ((), ())),
        preferred_element_type=jnp.float32)                 # (8, TN)
    idx_ref[...] = idx_rows.astype(jnp.int32)

    # Per-tile partial sum of squared error (padded rows masked out).
    diff = q - x
    if rows_valid != rows_total:
        row_ids = i * tn + jax.lax.broadcasted_iota(jnp.int32, (tn, 1), 0)
        diff = diff * (row_ids < rows_valid).astype(jnp.float32)
    sse = jnp.sum(diff * diff)                              # rank-0 f32
    sse_ref[...] = jnp.full((1, 128), 1.0, jnp.float32) * sse


def vector_quantizer_forward(x, embeddings, beta, *, tile_n=512,
                             use_bf16_dist=False):
    """x: (B, H, W, D) f32; embeddings: (K, D) f32."""
    K, D = embeddings.shape
    assert tile_n % 128 == 0, "tile_n must be a multiple of 128"

    x = x.astype(jnp.float32)
    flat_x = x.reshape(-1, D)
    N = flat_x.shape[0]
    N_pad = ((N + tile_n - 1) // tile_n) * tile_n
    num_tiles = N_pad // tile_n
    if N_pad != N:
        flat_x = jnp.pad(flat_x, ((0, N_pad - N), (0, 0)))

    e = embeddings.astype(jnp.float32)
    e_sq = jnp.sum(e * e, axis=1)[None, :]                  # (1, K), hoisted

    kernel = functools.partial(_vq_kernel,
                               rows_valid=N,
                               rows_total=N_pad,
                               use_bf16_dist=use_bf16_dist)

    flops = 4 * N_pad * K * D + 2 * N_pad * K * 8
    bytes_accessed = 4 * (2 * N_pad * D + K * D + K + 8 * N_pad + num_tiles * 128)

    idx_rows, q_flat, sse = pl.pallas_call(
        kernel,
        out_shape=(
            jax.ShapeDtypeStruct((8, N_pad), jnp.int32),          # indices (rows identical)
            jax.ShapeDtypeStruct((N_pad, D), jnp.float32),        # quantized
            jax.ShapeDtypeStruct((1, num_tiles * 128), jnp.float32),  # per-tile SSE
        ),
        grid_spec=pltpu.PrefetchScalarGridSpec(
            num_scalar_prefetch=0,
            grid=(num_tiles,),
            in_specs=[
                pl.BlockSpec((tile_n, D), lambda i: (i, 0)),      # flat_x tile
                pl.BlockSpec((K, D), lambda i: (0, 0)),           # full codebook, resident
                pl.BlockSpec((1, K), lambda i: (0, 0)),           # hoisted ||e||^2
            ],
            out_specs=[
                pl.BlockSpec((8, tile_n), lambda i: (0, i)),      # lane-dense indices
                pl.BlockSpec((tile_n, D), lambda i: (i, 0)),      # quantized
                pl.BlockSpec((1, 128), lambda i: (0, i)),         # per-tile SSE
            ],
        ),
        compiler_params=pltpu.CompilerParams(
            dimension_semantics=("parallel",),                    # no cross-step state
            vmem_limit_bytes=32 * 1024 * 1024,
        ),
        cost_estimate=pl.CostEstimate(
            flops=flops, transcendentals=0, bytes_accessed=bytes_accessed),
    )(flat_x, e, e_sq)

    encoding_indices = idx_rows[0, :N]
    quantized = q_flat[:N].reshape(x.shape)                       # straight-through fwd value
    sse_total = jnp.sum(sse.reshape(num_tiles, 128)[:, 0])
    loss = (1.0 + beta) * sse_total / float(N * D)
    # TODO(synk): custom VJP for the straight-through estimator / detach semantics
    # (only forward values are produced here).
    return encoding_indices, quantized, loss


def _reference(x, embeddings, beta):
    """Pure-JAX reference mirroring the torch forward (forward values only)."""
    D = embeddings.shape[1]
    flat = x.reshape(-1, D)
    dist = (jnp.sum(flat ** 2, axis=1, keepdims=True)
            + jnp.sum(embeddings ** 2, axis=1)
            - 2.0 * flat @ embeddings.T)
    idx = jnp.argmin(dist, axis=1).astype(jnp.int32)
    q = embeddings[idx].reshape(x.shape)
    loss = (1.0 + beta) * jnp.mean((q - x) ** 2)
    return idx, q, loss


if __name__ == "__main__":
    embedding_dim = 32
    num_embeddings = 128
    beta = 0.25

    key = jax.random.PRNGKey(0)
    kx, ke = jax.random.split(key)
    # Small shapes: B=2, H=24, W=16, D=32 -> N = 768 flat vectors
    # (2 grid tiles of 512 with 256 padded rows -> exercises multi-tile + masking).
    x = jax.random.normal(kx, (2, 24, 16, embedding_dim), dtype=jnp.float32)
    embeddings = jax.random.normal(ke, (num_embeddings, embedding_dim),
                                   dtype=jnp.float32)

    idx, quantized, loss = vector_quantizer_forward(x, embeddings, beta)
    jax.block_until_ready((idx, quantized, loss))

    ref_idx, ref_q, ref_loss = _reference(x, embeddings, beta)
    assert idx.shape == ref_idx.shape, "index shape mismatch"
    assert jnp.array_equal(idx, ref_idx), "indices mismatch"
    assert jnp.allclose(quantized, ref_q, atol=1e-5, rtol=1e-5), "quantized mismatch"
    assert jnp.allclose(loss, ref_loss, atol=1e-5, rtol=1e-4), "loss mismatch"

    print("KERNEL_OK")
</pallas_src>

<mosaic_0001>
module attributes {stable_mosaic.version = 11 : i64} {
  func.func @_vq_kernel(%arg0: i32, %arg1: memref<512x32xf32, #tpu.memory_space<vmem>>, %arg2: memref<128x32xf32, #tpu.memory_space<vmem>>, %arg3: memref<1x128xf32, #tpu.memory_space<vmem>>, %arg4: memref<8x512xi32, #tpu.memory_space<vmem>>, %arg5: memref<512x32xf32, #tpu.memory_space<vmem>>, %arg6: memref<1x128xf32, #tpu.memory_space<vmem>>) attributes {dimension_semantics = [#tpu.dimension_semantics<parallel>], iteration_bounds = array<i64: 2>, scalar_prefetch = 0 : i64, scratch_operands = 0 : i64, tpu.core_type = #tpu.core_type<tc>, window_params = [{transform_indices = @transform_0, window_bounds = array<i64: 512, 32>}, {pipeline_mode = #tpu.pipeline_mode<synchronous>, transform_indices = @transform_1, window_bounds = array<i64: 128, 32>}, {pipeline_mode = #tpu.pipeline_mode<synchronous>, transform_indices = @transform_2, window_bounds = array<i64: 1, 128>}, {transform_indices = @transform_3, window_bounds = array<i64: 8, 512>}, {transform_indices = @transform_4, window_bounds = array<i64: 512, 32>}, {transform_indices = @transform_5, window_bounds = array<i64: 1, 128>}]} {
    %c0 = arith.constant 0 : index
    %c0_0 = arith.constant 0 : index
    %0 = vector.load %arg1[%c0, %c0_0] : memref<512x32xf32, #tpu.memory_space<vmem>>, vector<512x32xf32>
    %c0_1 = arith.constant 0 : index
    %c0_2 = arith.constant 0 : index
    %1 = vector.load %arg2[%c0_1, %c0_2] : memref<128x32xf32, #tpu.memory_space<vmem>>, vector<128x32xf32>
    %c0_3 = arith.constant 0 : index
    %c0_4 = arith.constant 0 : index
    %2 = vector.load %arg3[%c0_3, %c0_4] : memref<1x128xf32, #tpu.memory_space<vmem>>, vector<1x128xf32>
    %cst = arith.constant dense<0.000000e+00> : vector<512x128xf32>
    %3 = tpu.matmul %0, %1, %cst {dimension_numbers = #tpu.dot_dimension_numbers<[1], [1], [0], [0], [0, 0, 1, 0], [], []>} : vector<512x32xf32>, vector<128x32xf32>, vector<512x128xf32> -> vector<512x128xf32>
    %cst_5 = arith.constant 2.000000e+00 : f32
    %4 = vector.broadcast %cst_5 : f32 to vector<512x128xf32>
    %5 = arith.mulf %4, %3 : vector<512x128xf32>
    %6 = vector.broadcast %2 : vector<1x128xf32> to vector<512x128xf32>
    %7 = arith.subf %6, %5 : vector<512x128xf32>
    %cst_6 = arith.constant dense<0x7F800000> : vector<512xf32>
    %8 = vector.multi_reduction <minimumf>, %7, %cst_6 [1] : vector<512x128xf32> to vector<512xf32>
    %9 = vector.shape_cast %8 : vector<512xf32> to vector<512x1xf32>
    %10 = tpu.iota {dimensions = array<i32: 1>} : vector<512x128xi32>
    %11 = vector.broadcast %9 : vector<512x1xf32> to vector<512x128xf32>
    %12 = arith.cmpf oeq, %7, %11 : vector<512x128xf32>
    %c128_i32 = arith.constant 128 : i32
    %13 = vector.broadcast %c128_i32 : i32 to vector<512x128xi32>
    %14 = arith.select %12, %10, %13 : vector<512x128xi1>, vector<512x128xi32>
    %cst_7 = arith.constant dense<2147483647> : vector<512xi32>
    %15 = vector.multi_reduction <minsi>, %14, %cst_7 [1] : vector<512x128xi32> to vector<512xi32>
    %16 = vector.shape_cast %15 : vector<512xi32> to vector<512x1xi32>
    %17 = vector.broadcast %16 : vector<512x1xi32> to vector<512x128xi32>
    %18 = arith.cmpi eq, %10, %17 : vector<512x128xi32>
    %19 = arith.extui %18 : vector<512x128xi1> to vector<512x128xi32>
    %20 = arith.sitofp %19 : vector<512x128xi32> to vector<512x128xf32>
    %cst_8 = arith.constant dense<0.000000e+00> : vector<512x32xf32>
    %21 = tpu.matmul %20, %1, %cst_8 {dimension_numbers = #tpu.dot_dimension_numbers<[1], [0], [0], [1], [0, 0, 1, 1], [], []>} : vector<512x128xf32>, vector<128x32xf32>, vector<512x32xf32> -> vector<512x32xf32>
    %c0_9 = arith.constant 0 : index
    %c0_10 = arith.constant 0 : index
    %22 = vector.load %arg5[%c0_9, %c0_10] : memref<512x32xf32, #tpu.memory_space<vmem>>, vector<512x32xf32>
    tpu.vector_store %arg5[%c0_9, %c0_10], %21 {strides = array<i32>} : memref<512x32xf32, #tpu.memory_space<vmem>>, vector<512x32xf32>,
    %23 = tpu.iota {dimensions = array<i32: 1>} : vector<8x128xi32>
    %24 = arith.sitofp %23 : vector<8x128xi32> to vector<8x128xf32>
    %cst_11 = arith.constant dense<0.000000e+00> : vector<8x512xf32>
    %25 = tpu.matmul %24, %20, %cst_11 {dimension_numbers = #tpu.dot_dimension_numbers<[1], [1], [0], [0], [0, 0, 1, 0], [], []>} : vector<8x128xf32>, vector<512x128xf32>, vector<8x512xf32> -> vector<8x512xf32>
    %26 = arith.fptosi %25 : vector<8x512xf32> to vector<8x512xi32>
    %c0_12 = arith.constant 0 : index
    %c0_13 = arith.constant 0 : index
    %27 = vector.load %arg4[%c0_12, %c0_13] : memref<8x512xi32, #tpu.memory_space<vmem>>, vector<8x512xi32>
    tpu.vector_store %arg4[%c0_12, %c0_13], %26 {strides = array<i32>} : memref<8x512xi32, #tpu.memory_space<vmem>>, vector<8x512xi32>,
    %28 = arith.subf %21, %0 : vector<512x32xf32>
    %c512_i32 = arith.constant 512 : i32
    %29 = arith.muli %arg0, %c512_i32 : i32
    %30 = tpu.iota {dimensions = array<i32: 0>} : vector<512x1xi32>
    %31 = vector.broadcast %29 : i32 to vector<512x1xi32>
    %32 = arith.addi %31, %30 : vector<512x1xi32>
    %c768_i32 = arith.constant 768 : i32
    %33 = vector.broadcast %c768_i32 : i32 to vector<512x1xi32>
    %34 = arith.cmpi slt, %32, %33 : vector<512x1xi32>
    %35 = arith.extui %34 : vector<512x1xi1> to vector<512x1xi32>
    %36 = arith.sitofp %35 : vector<512x1xi32> to vector<512x1xf32>
    %37 = vector.broadcast %36 : vector<512x1xf32> to vector<512x32xf32>
    %38 = arith.mulf %28, %37 : vector<512x32xf32>
    %39 = arith.mulf %38, %38 : vector<512x32xf32>
    %40 = vector.shape_cast %39 : vector<512x32xf32> to vector<1x512x32xf32>
    %cst_14 = arith.constant dense<0.000000e+00> : vector<1xf32>
    %41 = vector.multi_reduction <add>, %40, %cst_14 [1, 2] : vector<1x512x32xf32> to vector<1xf32>
    %42 = vector.shape_cast %41 : vector<1xf32> to vector<1x1x1xf32>
    %43 = vector.extract %42[0, 0, 0] : f32 from vector<1x1x1xf32>
    %cst_15 = arith.constant 1.000000e+00 : f32
    %44 = vector.broadcast %cst_15 : f32 to vector<1x128xf32>
    %45 = vector.broadcast %43 : f32 to vector<1x128xf32>
    %46 = arith.mulf %44, %45 : vector<1x128xf32>
    %c0_16 = arith.constant 0 : index
    %c0_17 = arith.constant 0 : index
    %47 = vector.load %arg6[%c0_16, %c0_17] : memref<1x128xf32, #tpu.memory_space<vmem>>, vector<1x128xf32>
    tpu.vector_store %arg6[%c0_16, %c0_17], %46 {strides = array<i32>} : memref<1x128xf32, #tpu.memory_space<vmem>>, vector<1x128xf32>,
    return
  }
  func.func @transform_0(%arg0: i32) -> (i32, i32) {
    %c0_i32 = arith.constant 0 : i32
    %c0_i32_0 = arith.constant 0 : i32
    return %arg0, %c0_i32 : i32, i32
  }
  func.func @transform_1(%arg0: i32) -> (i32, i32) {
    %c0_i32 = arith.constant 0 : i32
    %c0_i32_0 = arith.constant 0 : i32
    %c0_i32_1 = arith.constant 0 : i32
    return %c0_i32, %c0_i32_0 : i32, i32
  }
  func.func @transform_2(%arg0: i32) -> (i32, i32) {
    %c0_i32 = arith.constant 0 : i32
    %c0_i32_0 = arith.constant 0 : i32
    %c0_i32_1 = arith.constant 0 : i32
    return %c0_i32, %c0_i32_0 : i32, i32
  }
  func.func @transform_3(%arg0: i32) -> (i32, i32) {
    %c0_i32 = arith.constant 0 : i32
    %c0_i32_0 = arith.constant 0 : i32
    return %c0_i32, %arg0 : i32, i32
  }
  func.func @transform_4(%arg0: i32) -> (i32, i32) {
    %c0_i32 = arith.constant 0 : i32
    %c0_i32_0 = arith.constant 0 : i32
    return %arg0, %c0_i32 : i32, i32
  }
  func.func @transform_5(%arg0: i32) -> (i32, i32) {
    %c0_i32 = arith.constant 0 : i32
    %c0_i32_0 = arith.constant 0 : i32
    return %c0_i32, %arg0 : i32, i32
  }
}

</mosaic_0001>

<bundles_post_ra>
// kernel: tpu_custom_call.1
= control target key start
LH: loop header
LB: loop body
LE: loop exit
PB: predicated region body
PF: predicated region fallthrough
CT: control target
= control target key end

     0   :  { %11 = vsyncpa [#allocation3], 0  ;;  %s7693_s0 = inlined_call_operand.vmem [shape: f32[1024,32], index: 0, kind: input, shape index: {}]   ;;  %s7694_s1 = inlined_call_operand.vmem [shape: f32[128,32], index: 1, kind: input, shape index: {}]   ;;  %s7695_s2 = inlined_call_operand.vmem [shape: f32[1,128], index: 2, kind: input, shape index: {}]   ;;  %s7696_s3 = inlined_call_operand.hbm [shape: s32[8,1024], index: 3, kind: output, shape index: {0}]   ;;  %s7697_s4 = inlined_call_operand.vmem [shape: f32[1024,32], index: 4, kind: output, shape index: {1}]   ;;  %s7698_s5 = inlined_call_operand.hbm [shape: f32[1,256], index: 5, kind: output, shape index: {2}]  }
   0x1   :  { %13 = vsyncpa [#allocation3 + $0x1], 0 }
   0x2   :  { %14 = vsyncpa [#allocation5], 0 }
   0x3   :  { %16 = vsyncpa [#allocation5 + $0x1], 0  ;;  %s5076_s18 = smov 0   ;;  %s5078_s19 = smov 0  }
   0x4   :  { %s5080_s20 = smov 0   ;;  %s5082_s21 = smov 0  }
   0x5 LB: > { %s5097_s22 = sadd.s32 4294967295, %s5039_s21   ;;  %s3842_s23 = sadd.s32 4294967294, %s5039_s21   ;;  %s5039_s21 = sphi %s5082_s21, %s8177_s21   ;;  %s5035_s20 = sphi %s5080_s20, %s8176_s20   ;;  %s5031_s19 = sphi %s5078_s19, %s8175_s19   ;;  %s5027_s18 = sphi %s5076_s18, %s8174_s18  }
   0x6   : > { %s5101_s24 = sadd.s32 1, %s5039_s21   ;;  %s97_s25 = sadd.s32 1, %s5035_s20 }
   0x7   : > { %s94_s26 = ssub.s32 %s5039_s21, %s5101_s24  ;;  %p107_p0 = scmp.ne.s32.totalorder %s5035_s20, %s5031_s19 }
   0x8   : > { %p95_p1 = scmp.eq.s32.totalorder %s94_s26, 0  ;;  %p108_p2 = scmp.eq.s32.totalorder %s5097_s22, 1 }
   0x9   : > { %p113_p3 = scmp.ne.s32.totalorder %s5031_s19, %s5027_s18  ;;  %p114_p4 = scmp.eq.s32.totalorder %s3842_s23, 1 }
   0xa   : > { %s5112_s27 = scalar_select %p95_p1, %s5035_s20, %s97_s25  }
   0xb   : > { %p5114_p5 = por %p108_p2, %p107_p0  ;;  %p5118_p6 = por %p114_p4, %p113_p3 }
   0xc   : > { %p3845_p7 = scmp.ge.s32.totalorder %s5039_s21, 1  ;;  %p199_p8 = scmp.lt.s32.totalorder %s5039_s21, 3 }
   0xe   : > { %p200_p9 = pnand %p3845_p7, %p199_p8 }
  0x10   : > { %203 = sbr.rel (%p200_p9) target bundleno = 1317 (0x525), region = 32 }
  0x17   : > { %v313_v0 = vld [vmem:[%s7694_s1] sm:$0xff]  ;;  %v314_v1 = vld [vmem:[%s7694_s1 + $0x8] sm:$0xff]  ;;  %vm7806_vm0 = vcmask 261120   ;;  %v315_v2 = vld [vmem:[%s7694_s1 + $0x10] sm:$0xff]  ;;  %s3847_s11 = sshll.u32 %s5097_s22, 6  ;;  %s4124_s16 = sshll.u32 %s5097_s22, 9 }
  0x18   : > { %v4680_v3 = vpack.c.bf16 %v314_v1, %v313_v0  ;;  %vm5136_vm1 = vmpackc.low %vm7806_vm0, %vm7806_vm0  ;;  %v316_v5 = vld [vmem:[%s7694_s1 + $0x18] sm:$0xff]  ;;  %p237_p10 = scmp.lt.s32.totalorder %s3847_s11, 127  ;;  %v317_v7 = vld [vmem:[%s7694_s1 + $0x20] sm:$0xff]  ;;  %s7625_s8 = scalar_lea.hbm %s7696_s3, %s4124_s16 }
  0x19   : > { %v4686_v6 = vpack.c.bf16 %v316_v5, %v315_v2  ;;  %v318_v8 = vld [vmem:[%s7694_s1 + $0x28] sm:$0xff]  ;;  %v319_v11 = vld [vmem:[%s7694_s1 + $0x30] sm:$0xff]  ;;  %v320_v12 = vld [vmem:[%s7694_s1 + $0x38] sm:$0xff]  ;;  %s5044_s13 = smov [#allocation2]  }
  0x1a   : > { %4682 = vmatprep.subr.msk.bf16.mxu0 %vm5136_vm1, %v4680_v3  ;;  %s8179_s11 = smov (!%p237_p10, %s3847_s11), 127  ;;  %4729 = vmatprep.subr.bf16.mxu1 %v4680_v3  ;;  %v4692_v9 = vpack.c.bf16 %v318_v8, %v317_v7  ;;  %v4698_v13 = vpack.c.bf16 %v320_v12, %v319_v11  ;;  %v321_v14 = vld [vmem:[%s7694_s1 + $0x40] sm:$0xff]  ;;  %v322_v15 = vld [vmem:[%s7694_s1 + $0x48] sm:$0xff]  ;;  %v323_v17 = vld [vmem:[%s7694_s1 + $0x50] sm:$0xff]  ;;  %s4949_s14 = sshll.u32 %s5044_s13, 4  ;;  %s4950_s14 = int_to_ptr.vmem [resolvable:$false] %s4949_s14 }
  0x1b   : > { %4685 = vmatpush3.bf16.xpose.msk.msra.mxu0 %vm5136_vm1, %v4680_v3  ;;  %4731 = vmatpush3.bf16.msra.mxu1 %v4680_v3  ;;  %s3848_s23 = sshll.u32 %s8179_s11, 3  ;;  %v4704_v16 = vpack.c.bf16 %v322_v15, %v321_v14  ;;  %v324_v18 = vld [vmem:[%s7694_s1 + $0x58] sm:$0xff]  ;;  %v325_v20 = vld [vmem:[%s7694_s1 + $0x60] sm:$0xff]  ;;  %v326_v21 = vld [vmem:[%s7694_s1 + $0x68] sm:$0xff]  ;;  %s7617_s11 = sand.u32 1, %s5031_s19  }
  0x1c   : > { %4688 = vmatprep.subr.msk.bf16.mxu0 %vm5136_vm1, %v4686_v6  ;;  %4733 = vmatprep.subr.bf16.mxu1 %v4686_v6  ;;  %s5163_s30 = scalar_lea.vmem %s7693_s0, %s3848_s23  ;;  %v4710_v19 = vpack.c.bf16 %v324_v18, %v323_v17  ;;  %v4716_v22 = vpack.c.bf16 %v326_v21, %v325_v20  ;;  %v327_v23 = vld [vmem:[%s7694_s1 + $0x70] sm:$0xff]  ;;  %v328_v24 = vld [vmem:[%s7694_s1 + $0x78] sm:$0xff]  ;;  %s7017_s26 = scalar_lea.vmem %s7697_s4, %s3848_s23 }
  0x1d   : > { %v249_v10 = vld [vmem:[%s5163_s30] sm:$0xff]  ;;  %v4722_v25 = vpack.c.bf16 %v328_v24, %v327_v23  ;;  %v250_v26 = vld [vmem:[%s5163_s30 + $0x8] sm:$0xff]  ;;  %v251_v27 = vld [vmem:[%s5163_s30 + $0x10] sm:$0xff]  ;;  %s3846_s23 = sshll.u32 %s7617_s11, 5  ;;  %s3690_s10 = scalar_lea.sflag [#allocation3], %s7617_s11 }
  0x1e   : > { %4456 = vmatprep.mubr.msk.f32.mxu0 %vm7806_vm0, %v249_v10  ;;  %v252_v28 = vld [vmem:[%s5163_s30 + $0x18] sm:$0xff]  ;;  %v253_v29 = vld [vmem:[%s5163_s30 + $0x20] sm:$0xff]  ;;  %v254_v30 = vld [vmem:[%s5163_s30 + $0x28] sm:$0xff]  ;;  %s4951_s15 = scalar_lea.vmem %s4950_s14, 1024 }
  0x1f   : > { %4735 = vmatpush3.bf16.msra.mxu1 %v4686_v6  ;;  %v255_v31 = vld [vmem:[%s5163_s30 + $0x30] sm:$0xff]  ;;  %v256_v32 = vld [vmem:[%s5163_s30 + $0x38] sm:$0xff]  ;;  %v257_v33 = vld [vmem:[%s5163_s30 + $0x40] sm:$0xff] }
  0x20   : > { %4737 = vmatprep.subr.bf16.mxu1 %v4692_v9  ;;  %v258_v34 = vld [vmem:[%s5163_s30 + $0x48] sm:$0xff]  ;;  %v259_v35 = vld [vmem:[%s5163_s30 + $0x50] sm:$0xff]  ;;  %v260_v36 = vld [vmem:[%s5163_s30 + $0x58] sm:$0xff] }
  0x21   : > { %v261_v37 = vld [vmem:[%s5163_s30 + $0x60] sm:$0xff]  ;;  %v262_v38 = vld [vmem:[%s5163_s30 + $0x68] sm:$0xff]  ;;  %v263_v39 = vld [vmem:[%s5163_s30 + $0x70] sm:$0xff] }
  0x22   : > { %v264_v40 = vld [vmem:[%s5163_s30 + $0x78] sm:$0xff]  ;;  %v265_v41 = vld [vmem:[%s5163_s30 + $0x80] sm:$0xff]  ;;  %v266_v42 = vld [vmem:[%s5163_s30 + $0x88] sm:$0xff] }
  0x23   : > { %4691 = vmatpush3.bf16.xpose.msk.msra.mxu0 %vm5136_vm1, %v4686_v6  ;;  %4739 = vmatpush3.bf16.msra.mxu1 %v4692_v9  ;;  %v267_v43 = vld [vmem:[%s5163_s30 + $0x90] sm:$0xff]  ;;  %v268_v44 = vld [vmem:[%s5163_s30 + $0x98] sm:$0xff]  ;;  %v269_v45 = vld [vmem:[%s5163_s30 + $0xa0] sm:$0xff] }
  0x24   : > { %4694 = vmatprep.subr.msk.bf16.mxu0 %vm5136_vm1, %v4692_v9  ;;  %4741 = vmatprep.subr.bf16.mxu1 %v4698_v13  ;;  %v270_v46 = vld [vmem:[%s5163_s30 + $0xa8] sm:$0xff]  ;;  %v271_v47 = vld [vmem:[%s5163_s30 + $0xb0] sm:$0xff]  ;;  %v272_v48 = vld [vmem:[%s5163_s30 + $0xb8] sm:$0xff] }
  0x25   : > { %v273_v49 = vld [vmem:[%s5163_s30 + $0xc0] sm:$0xff]  ;;  %v274_v50 = vld [vmem:[%s5163_s30 + $0xc8] sm:$0xff]  ;;  %v275_v51 = vld [vmem:[%s5163_s30 + $0xd0] sm:$0xff] }
  0x26   : > { %v276_v52 = vld [vmem:[%s5163_s30 + $0xd8] sm:$0xff]  ;;  %v277_v53 = vld [vmem:[%s5163_s30 + $0xe0] sm:$0xff]  ;;  %v278_v54 = vld [vmem:[%s5163_s30 + $0xe8] sm:$0xff] }
  0x27   : > { %4743 = vmatpush3.bf16.msra.mxu1 %v4698_v13  ;;  %v279_v55 = vld [vmem:[%s5163_s30 + $0xf0] sm:$0xff]  ;;  %v280_v56 = vld [vmem:[%s5163_s30 + $0xf8] sm:$0xff]  ;;  %v281_v57 = vld [vmem:[%s5163_s30 + $0x100] sm:$0xff] }
  0x28   : > { %4745 = vmatprep.subr.bf16.mxu1 %v4704_v16  ;;  %v282_v58 = vld [vmem:[%s5163_s30 + $0x108] sm:$0xff]  ;;  %v283_v59 = vld [vmem:[%s5163_s30 + $0x110] sm:$0xff]  ;;  %v284_v60 = vld [vmem:[%s5163_s30 + $0x118] sm:$0xff] }
  0x29   : > { %v285_v61 = vld [vmem:[%s5163_s30 + $0x120] sm:$0xff]  ;;  %v286_v62 = vld [vmem:[%s5163_s30 + $0x128] sm:$0xff]  ;;  %v287_v63 = vld [vmem:[%s5163_s30 + $0x130] sm:$0xff] }
  0x2a   : > { %v288_v0 = vld [vmem:[%s5163_s30 + $0x138] sm:$0xff]  ;;  %v289_v1 = vld [vmem:[%s5163_s30 + $0x140] sm:$0xff]  ;;  %v290_v2 = vld [vmem:[%s5163_s30 + $0x148] sm:$0xff] }
  0x2b   : > { %4697 = vmatpush3.bf16.xpose.msk.msra.mxu0 %vm5136_vm1, %v4692_v9  ;;  %4747 = vmatpush3.bf16.msra.mxu1 %v4704_v16  ;;  %v291_v3 = vld [vmem:[%s5163_s30 + $0x150] sm:$0xff]  ;;  %v292_v4 = vld [vmem:[%s5163_s30 + $0x158] sm:$0xff]  ;;  %v293_v5 = vld [vmem:[%s5163_s30 + $0x160] sm:$0xff] }
  0x2c   : > { %4700 = vmatprep.subr.msk.bf16.mxu0 %vm5136_vm1, %v4698_v13  ;;  %4749 = vmatprep.subr.bf16.mxu1 %v4710_v19  ;;  %v294_v6 = vld [vmem:[%s5163_s30 + $0x168] sm:$0xff]  ;;  %v295_v7 = vld [vmem:[%s5163_s30 + $0x170] sm:$0xff]  ;;  %v296_v8 = vld [vmem:[%s5163_s30 + $0x178] sm:$0xff] }
  0x2d   : > { %v297_v9 = vld [vmem:[%s5163_s30 + $0x180] sm:$0xff]  ;;  %v298_v10 = vld [vmem:[%s5163_s30 + $0x188] sm:$0xff]  ;;  %v299_v11 = vld [vmem:[%s5163_s30 + $0x190] sm:$0xff] }
  0x2e   : > { %v300_v12 = vld [vmem:[%s5163_s30 + $0x198] sm:$0xff]  ;;  %v302_v14 = vld [vmem:[%s5163_s30 + $0x1a8] sm:$0xff]  ;;  %v303_v15 = vld [vmem:[%s5163_s30 + $0x1b0] sm:$0xff] }
  0x2f   : > { %4751 = vmatpush3.bf16.msra.mxu1 %v4710_v19  ;;  %v305_v17 = vld [vmem:[%s5163_s30 + $0x1c0] sm:$0xff]  ;;  %v306_v18 = vld [vmem:[%s5163_s30 + $0x1c8] sm:$0xff]  ;;  %v308_v20 = vld [vmem:[%s5163_s30 + $0x1d8] sm:$0xff] }
  0x30   : > { %4753 = vmatprep.subr.bf16.mxu1 %v4716_v22  ;;  %v309_v21 = vld [vmem:[%s5163_s30 + $0x1e0] sm:$0xff]  ;;  %v311_v23 = vld [vmem:[%s5163_s30 + $0x1f0] sm:$0xff]  ;;  %v312_v24 = vld [vmem:[%s5163_s30 + $0x1f8] sm:$0xff] }
  0x33   : > { %4703 = vmatpush3.bf16.xpose.msk.msra.mxu0 %vm5136_vm1, %v4698_v13  ;;  %4755 = vmatpush3.bf16.msra.mxu1 %v4716_v22  ;;  %v301_v13 = vld [vmem:[%s5163_s30 + $0x1a0] sm:$0xff] }
  0x34   : > { %4706 = vmatprep.subr.msk.bf16.mxu0 %vm5136_vm1, %v4704_v16  ;;  %4757 = vmatprep.subr.bf16.mxu1 %v4722_v25 }
  0x37   : > { %4759 = vmatpush3.bf16.msra.mxu1 %v4722_v25 }
  0x3b   : > { %4709 = vmatpush3.bf16.xpose.msk.msra.mxu0 %vm5136_vm1, %v4704_v16  ;;  %v304_v16 = vld [vmem:[%s5163_s30 + $0x1b8] sm:$0xff] }
  0x3c   : > { %4712 = vmatprep.subr.msk.bf16.mxu0 %vm5136_vm1, %v4710_v19 }
  0x43   : > { %4715 = vmatpush3.bf16.xpose.msk.msra.mxu0 %vm5136_vm1, %v4710_v19  ;;  %v307_v19 = vld [vmem:[%s5163_s30 + $0x1d0] sm:$0xff] }
  0x44   : > { %4718 = vmatprep.subr.msk.bf16.mxu0 %vm5136_vm1, %v4716_v22 }
  0x4b   : > { %4721 = vmatpush3.bf16.xpose.msk.msra.mxu0 %vm5136_vm1, %v4716_v22  ;;  %v310_v22 = vld [vmem:[%s5163_s30 + $0x1e8] sm:$0xff] }
  0x4c   : > { %4724 = vmatprep.subr.msk.bf16.mxu0 %vm5136_vm1, %v4722_v25 }
  0x53   : > { %4727 = vmatpush3.bf16.xpose.msk.msra.mxu0 %vm5136_vm1, %v4722_v25 }
  0x5a   : > { %4457 = vmatmul.mubr.msk.f32.vlgmr.msra.gmra.mrb[0].mxu0 %vm7806_vm0, %v250_v26  ;;  %v5352_v26 = vld [vmem:[%s7695_s2] ss:$0 sm:$0xff] }
  0x5b   : > { %4459 = vmatprep.mubr.msk.f32.mxu0 %vm7806_vm0, %v251_v27 }
  0x5e   : > { %4460 = vmatmul.mubr.msk.f32.gmra.mrb[2].mxu0 %vm7806_vm0, %v252_v28 }
  0x5f   : > { %4462 = vmatprep.mubr.msk.f32.mxu0 %vm7806_vm0, %v253_v29 }
  0x62   : > { %4463 = vmatmul.mubr.msk.f32.gmra.mrb[4].mxu0 %vm7806_vm0, %v254_v30 }
  0x63   : > { %4465 = vmatprep.mubr.msk.f32.mxu0 %vm7806_vm0, %v255_v31 }
  0x66   : > { %4466 = vmatmul.mubr.msk.f32.gmra.mrb[6].mxu0 %vm7806_vm0, %v256_v32 }
  0x67   : > { %4468 = vmatprep.mubr.msk.f32.mxu0 %vm7806_vm0, %v257_v33 }
  0x6a   : > { %4469 = vmatmul.mubr.msk.f32.gmra.mrb[8].mxu0 %vm7806_vm0, %v258_v34 }
  0x6b   : > { %4471 = vmatprep.mubr.msk.f32.mxu0 %vm7806_vm0, %v259_v35 }
  0x6e   : > { %4472 = vmatmul.mubr.msk.f32.gmra.mrb[10].mxu0 %vm7806_vm0, %v260_v36 }
  0x6f   : > { %4474 = vmatprep.mubr.msk.f32.mxu0 %vm7806_vm0, %v261_v37 }
  0x72   : > { %4475 = vmatmul.mubr.msk.f32.gmra.mrb[12].mxu0 %vm7806_vm0, %v262_v38 }
  0x73   : > { %4477 = vmatprep.mubr.msk.f32.mxu0 %vm7806_vm0, %v263_v39 }
  0x76   : > { %4478 = vmatmul.mubr.msk.f32.gmra.mrb[14].mxu0 %vm7806_vm0, %v264_v40 }
  0x77   : > { %4480 = vmatprep.mubr.msk.f32.mxu0 %vm7806_vm0, %v265_v41 }
  0x7a   : > { %4481 = vmatmul.mubr.msk.f32.gmra.mrb[16].mxu0 %vm7806_vm0, %v266_v42 }
  0x7b   : > { %4483 = vmatprep.mubr.msk.f32.mxu0 %vm7806_vm0, %v267_v43 }
  0x7e   : > { %4484 = vmatmul.mubr.msk.f32.gmra.mrb[18].mxu0 %vm7806_vm0, %v268_v44 }
  0x7f   : > { %4486 = vmatprep.mubr.msk.f32.mxu0 %vm7806_vm0, %v269_v45 }
  0x82   : > { %4487 = vmatmul.mubr.msk.f32.gmra.mrb[20].mxu0 %vm7806_vm0, %v270_v46 }
  0x83   : > { %4489 = vmatprep.mubr.msk.f32.mxu0 %vm7806_vm0, %v271_v47 }
  0x86   : > { %4490 = vmatmul.mubr.msk.f32.gmra.mrb[22].mxu0 %vm7806_vm0, %v272_v48 }
  0x87   : > { %4492 = vmatprep.mubr.msk.f32.mxu0 %vm7806_vm0, %v273_v49 }
  0x8a   : > { %4493 = vmatmul.mubr.msk.f32.gmra.mrb[24].mxu0 %vm7806_vm0, %v274_v50 }
  0x8b   : > { %4495 = vmatprep.mubr.msk.f32.mxu0 %vm7806_vm0, %v275_v51 }
  0x8e   : > { %4496 = vmatmul.mubr.msk.f32.gmra.mrb[26].mxu0 %vm7806_vm0, %v276_v52 }
  0x8f   : > { %4498 = vmatprep.mubr.msk.f32.mxu0 %vm7806_vm0, %v277_v53 }
  0x92   : > { %4499 = vmatmul.mubr.msk.f32.gmra.mrb[28].mxu0 %vm7806_vm0, %v278_v54 }
  0x93   : > { %4501 = vmatprep.mubr.msk.f32.mxu0 %vm7806_vm0, %v279_v55 }
  0x96   : > { %4502 = vmatmul.mubr.msk.f32.gmra.mrb[30].mxu0 %vm7806_vm0, %v280_v56 }
  0x97   : > { %4504 = vmatprep.mubr.msk.f32.mxu0 %vm7806_vm0, %v281_v57 }
  0x9a   : > { %4505 = vmatmul.mubr.msk.f32.gmra.mrb[32].mxu0 %vm7806_vm0, %v282_v58 }
  0x9b   : > { %4507 = vmatprep.mubr.msk.f32.mxu0 %vm7806_vm0, %v283_v59 }
  0x9e   : > { %4508 = vmatmul.mubr.msk.f32.gmra.mrb[34].mxu0 %vm7806_vm0, %v284_v60 }
  0x9f   : > { %4510 = vmatprep.mubr.msk.f32.mxu0 %vm7806_vm0, %v285_v61 }
  0xa2   : > { %4511 = vmatmul.mubr.msk.f32.gmra.mrb[36].mxu0 %vm7806_vm0, %v286_v62 }
  0xa3   : > { %4513 = vmatprep.mubr.msk.f32.mxu0 %vm7806_vm0, %v287_v63 }
  0xa6   : > { %4514 = vmatmul.mubr.msk.f32.gmra.mrb[38].mxu0 %vm7806_vm0, %v288_v0 }
  0xa7   : > { %4516 = vmatprep.mubr.msk.f32.mxu0 %vm7806_vm0, %v289_v1 }
  0xaa   : > { %4517 = vmatmul.mubr.msk.f32.gmra.mrb[40].mxu0 %vm7806_vm0, %v290_v2 }
  0xab   : > { %4519 = vmatprep.mubr.msk.f32.mxu0 %vm7806_vm0, %v291_v3 }
  0xae   : > { %4520 = vmatmul.mubr.msk.f32.gmra.mrb[42].mxu0 %vm7806_vm0, %v292_v4 }
  0xaf   : > { %4522 = vmatprep.mubr.msk.f32.mxu0 %vm7806_vm0, %v293_v5 }
  0xb2   : > { %4523 = vmatmul.mubr.msk.f32.gmra.mrb[44].mxu0 %vm7806_vm0, %v294_v6 }
  0xb3   : > { %4525 = vmatprep.mubr.msk.f32.mxu0 %vm7806_vm0, %v295_v7 }
  0xb6   : > { %4526 = vmatmul.mubr.msk.f32.gmra.mrb[46].mxu0 %vm7806_vm0, %v296_v8 }
  0xb7   : > { %4528 = vmatprep.mubr.msk.f32.mxu0 %vm7806_vm0, %v297_v9 }
  0xba   : > { %4529 = vmatmul.mubr.msk.f32.gmra.mrb[48].mxu0 %vm7806_vm0, %v298_v10 }
  0xbb   : > { %4531 = vmatprep.mubr.msk.f32.mxu0 %vm7806_vm0, %v299_v11 }
  0xbe   : > { %4532 = vmatmul.mubr.msk.f32.gmra.mrb[50].mxu0 %vm7806_vm0, %v300_v12 }
  0xbf   : > { %4534 = vmatprep.mubr.msk.f32.mxu0 %vm7806_vm0, %v301_v13 }
  0xc2   : > { %4535 = vmatmul.mubr.msk.f32.gmra.mrb[52].mxu0 %vm7806_vm0, %v302_v14 }
  0xc3   : > { %4537 = vmatprep.mubr.msk.f32.mxu0 %vm7806_vm0, %v303_v15 }
  0xc6   : > { %4538 = vmatmul.mubr.msk.f32.gmra.mrb[54].mxu0 %vm7806_vm0, %v304_v16 }
  0xc7   : > { %4540 = vmatprep.mubr.msk.f32.mxu0 %vm7806_vm0, %v305_v17 }
  0xca   : > { %4541 = vmatmul.mubr.msk.f32.gmra.mrb[56].mxu0 %vm7806_vm0, %v306_v18 }
  0xcb   : > { %4543 = vmatprep.mubr.msk.f32.mxu0 %vm7806_vm0, %v307_v19 }
  0xce   : > { %4544 = vmatmul.mubr.msk.f32.gmra.mrb[58].mxu0 %vm7806_vm0, %v308_v20 }
  0xcf   : > { %4546 = vmatprep.mubr.msk.f32.mxu0 %vm7806_vm0, %v309_v21 }
  0xd2   : > { %4547 = vmatmul.mubr.msk.f32.gmra.mrb[60].mxu0 %vm7806_vm0, %v310_v22 }
  0xd3   : > { %4549 = vmatprep.mubr.msk.f32.mxu0 %vm7806_vm0, %v311_v23 }
  0xd6   : > { %4550 = vmatmul.mubr.msk.f32.gmra.mrb[62].mxu0 %vm7806_vm0, %v312_v24 }
 0x12d   : > { %v4458_v25 = vpop.f32.mrb[0].mxu0 }
 0x12e   : > { %v957_v27 = vmul.f32 2.0, %v4458_v25  ;;  %v637_v28 = vpop.f32.mrb[1].mxu0 }
 0x12f   : > { %v956_v29 = vmul.f32 2.0, %v637_v28 }
 0x130   : > { %v5355_v30 = vsub.f32 %v5352_v26, %v957_v27 }
 0x131   : > { %v4461_v31 = vpop.f32.mrb[2].mxu0  ;;  %v5359_v35 = vsub.f32 %v5352_v26, %v956_v29 }
 0x132   : > { %v959_v32 = vmul.f32 2.0, %v4461_v31  ;;  %1092 = vmin.xlane.f32.xlu0 %v5355_v30  ;;  %v647_v33 = vpop.f32.mrb[3].mxu0 }
 0x133   : > { %v958_v34 = vmul.f32 2.0, %v647_v33 }
 0x134   : > { %v5362_v36 = vsub.f32 %v5352_v26, %v959_v32 }
 0x135   : > { %v4464_v37 = vpop.f32.mrb[4].mxu0  ;;  %v5367_v41 = vsub.f32 %v5352_v26, %v958_v34 }
 0x136   : > { %v961_v38 = vmul.f32 2.0, %v4464_v37  ;;  %1090 = vmin.xlane.f32.xlu0 %v5359_v35  ;;  %1096 = vmin.xlane.f32.xlu1 %v5362_v36  ;;  %v657_v39 = vpop.f32.mrb[5].mxu0 }
 0x137   : > { %v960_v40 = vmul.f32 2.0, %v657_v39 }
 0x138   : > { %v5374_v46 = vsub.f32 %v5352_v26, %v961_v38 }
 0x139   : > { %v4467_v42 = vpop.f32.mrb[6].mxu0  ;;  %v5370_v43 = vsub.f32 %v5352_v26, %v960_v40 }
 0x13a   : > { %v963_v44 = vmul.f32 2.0, %v4467_v42  ;;  %1094 = vmin.xlane.f32.xlu1 %v5367_v41  ;;  %v667_v45 = vpop.f32.mrb[7].mxu0 }
 0x13b   : > { %v962_v47 = vmul.f32 2.0, %v667_v45  ;;  %1098 = vmin.xlane.f32.xlu0 %v5370_v43 }
 0x13c   : > { %v5382_v52 = vsub.f32 %v5352_v26, %v963_v44 }
 0x13d   : > { %v4470_v48 = vpop.f32.mrb[8].mxu0  ;;  %v5378_v49 = vsub.f32 %v5352_v26, %v962_v47 }
 0x13e   : > { %v965_v50 = vmul.f32 2.0, %v4470_v48  ;;  %1100 = vmin.xlane.f32.xlu1 %v5374_v46  ;;  %v677_v51 = vpop.f32.mrb[9].mxu0 }
 0x13f   : > { %v964_v53 = vmul.f32 2.0, %v677_v51  ;;  %1102 = vmin.xlane.f32.xlu0 %v5378_v49 }
 0x140   : > { %v5390_v58 = vsub.f32 %v5352_v26, %v965_v50 }
 0x141   : > { %v4473_v54 = vpop.f32.mrb[10].mxu0  ;;  %v5386_v55 = vsub.f32 %v5352_v26, %v964_v53 }
 0x142   : > { %v967_v56 = vmul.f32 2.0, %v4473_v54  ;;  %1104 = vmin.xlane.f32.xlu1 %v5382_v52  ;;  %v687_v57 = vpop.f32.mrb[11].mxu0 }
 0x143   : > { %v966_v59 = vmul.f32 2.0, %v687_v57  ;;  %1106 = vmin.xlane.f32.xlu0 %v5386_v55 }
 0x144   : > { %v5398_v0 = vsub.f32 %v5352_v26, %v967_v56 }
 0x145   : > { %v4476_v60 = vpop.f32.mrb[12].mxu0  ;;  %v5394_v61 = vsub.f32 %v5352_v26, %v966_v59 }
 0x146   : > { %v969_v62 = vmul.f32 2.0, %v4476_v60  ;;  %1108 = vmin.xlane.f32.xlu1 %v5390_v58  ;;  %v697_v63 = vpop.f32.mrb[13].mxu0 }
 0x147   : > { %v968_v1 = vmul.f32 2.0, %v697_v63  ;;  %1110 = vmin.xlane.f32.xlu0 %v5394_v61 }
 0x148   : > { %v5406_v6 = vsub.f32 %v5352_v26, %v969_v62 }
 0x149   : > { %v4479_v2 = vpop.f32.mrb[14].mxu0  ;;  %v5402_v3 = vsub.f32 %v5352_v26, %v968_v1 }
 0x14a   : > { %v971_v4 = vmul.f32 2.0, %v4479_v2  ;;  %1112 = vmin.xlane.f32.xlu1 %v5398_v0  ;;  %v707_v5 = vpop.f32.mrb[15].mxu0 }
 0x14b   : > { %v970_v7 = vmul.f32 2.0, %v707_v5  ;;  %1114 = vmin.xlane.f32.xlu0 %v5402_v3 }
 0x14c   : > { %v5414_v12 = vsub.f32 %v5352_v26, %v971_v4 }
 0x14d   : > { %v4482_v8 = vpop.f32.mrb[16].mxu0  ;;  %v5410_v9 = vsub.f32 %v5352_v26, %v970_v7 }
 0x14e   : > { %v973_v10 = vmul.f32 2.0, %v4482_v8  ;;  %1116 = vmin.xlane.f32.xlu1 %v5406_v6  ;;  %v717_v11 = vpop.f32.mrb[17].mxu0 }
 0x14f   : > { %v972_v13 = vmul.f32 2.0, %v717_v11  ;;  %1118 = vmin.xlane.f32.xlu0 %v5410_v9 }
 0x150   : > { %v5422_v18 = vsub.f32 %v5352_v26, %v973_v10 }
 0x151   : > { %v4485_v14 = vpop.f32.mrb[18].mxu0  ;;  %v5418_v15 = vsub.f32 %v5352_v26, %v972_v13 }
 0x152   : > { %v975_v16 = vmul.f32 2.0, %v4485_v14  ;;  %1120 = vmin.xlane.f32.xlu1 %v5414_v12  ;;  %v727_v17 = vpop.f32.mrb[19].mxu0 }
 0x153   : > { %v974_v19 = vmul.f32 2.0, %v727_v17  ;;  %1122 = vmin.xlane.f32.xlu0 %v5418_v15 }
 0x154   : > { %v5430_v24 = vsub.f32 %v5352_v26, %v975_v16 }
 0x155   : > { %v4488_v20 = vpop.f32.mrb[20].mxu0  ;;  %v5426_v21 = vsub.f32 %v5352_v26, %v974_v19 }
 0x156   : > { %v977_v22 = vmul.f32 2.0, %v4488_v20  ;;  %1124 = vmin.xlane.f32.xlu1 %v5422_v18  ;;  %v737_v23 = vpop.f32.mrb[21].mxu0 }
 0x157   : > { %v976_v25 = vmul.f32 2.0, %v737_v23  ;;  %1126 = vmin.xlane.f32.xlu0 %v5426_v21 }
 0x158   : > { %v5438_v32 = vsub.f32 %v5352_v26, %v977_v22 }
 0x159   : > { %v4491_v27 = vpop.f32.mrb[22].mxu0  ;;  %v5434_v28 = vsub.f32 %v5352_v26, %v976_v25 }
 0x15a   : > { %v979_v29 = vmul.f32 2.0, %v4491_v27  ;;  %1128 = vmin.xlane.f32.xlu1 %v5430_v24  ;;  %v747_v31 = vpop.f32.mrb[23].mxu0 }
 0x15b   : > { %v978_v33 = vmul.f32 2.0, %v747_v31  ;;  %1130 = vmin.xlane.f32.xlu0 %v5434_v28 }
 0x15c   : > { %v5446_v40 = vsub.f32 %v5352_v26, %v979_v29 }
 0x15d   : > { %v4494_v34 = vpop.f32.mrb[24].mxu0  ;;  %v5442_v37 = vsub.f32 %v5352_v26, %v978_v33 }
 0x15e   : > { %v981_v38 = vmul.f32 2.0, %v4494_v34  ;;  %1132 = vmin.xlane.f32.xlu1 %v5438_v32  ;;  %v757_v39 = vpop.f32.mrb[25].mxu0 }
 0x15f   : > { %v980_v42 = vmul.f32 2.0, %v757_v39  ;;  %1134 = vmin.xlane.f32.xlu0 %v5442_v37 }
 0x160   : > { %v5454_v50 = vsub.f32 %v5352_v26, %v981_v38 }
 0x161   : > { %v4497_v44 = vpop.f32.mrb[26].mxu0  ;;  %v5450_v45 = vsub.f32 %v5352_v26, %v980_v42 }
 0x162   : > { %v983_v47 = vmul.f32 2.0, %v4497_v44  ;;  %1136 = vmin.xlane.f32.xlu1 %v5446_v40  ;;  %v767_v48 = vpop.f32.mrb[27].mxu0 }
 0x163   : > { %v982_v51 = vmul.f32 2.0, %v767_v48  ;;  %1138 = vmin.xlane.f32.xlu0 %v5450_v45 }
 0x164   : > { %v5462_v59 = vsub.f32 %v5352_v26, %v983_v47 }
 0x165   : > { %v4500_v53 = vpop.f32.mrb[28].mxu0  ;;  %v5458_v54 = vsub.f32 %v5352_v26, %v982_v51 }
 0x166   : > { %v985_v56 = vmul.f32 2.0, %v4500_v53  ;;  %1140 = vmin.xlane.f32.xlu1 %v5454_v50  ;;  %v777_v57 = vpop.f32.mrb[29].mxu0 }
 0x167   : > { %v984_v60 = vmul.f32 2.0, %v777_v57  ;;  %1142 = vmin.xlane.f32.xlu0 %v5458_v54 }
 0x168   : > { %v5470_v4 = vsub.f32 %v5352_v26, %v985_v56 }
 0x169   : > { %v4503_v62 = vpop.f32.mrb[30].mxu0  ;;  %v5466_v63 = vsub.f32 %v5352_v26, %v984_v60 }
 0x16a   : > { %v987_v1 = vmul.f32 2.0, %v4503_v62  ;;  %1144 = vmin.xlane.f32.xlu1 %v5462_v59  ;;  %v787_v2 = vpop.f32.mrb[31].mxu0 }
 0x16b   : > { %v986_v5 = vmul.f32 2.0, %v787_v2  ;;  %1146 = vmin.xlane.f32.xlu0 %v5466_v63 }
 0x16c   : > { %v5478_v13 = vsub.f32 %v5352_v26, %v987_v1 }
 0x16d   : > { %v4506_v7 = vpop.f32.mrb[32].mxu0  ;;  %v5474_v8 = vsub.f32 %v5352_v26, %v986_v5 }
 0x16e   : > { %v989_v10 = vmul.f32 2.0, %v4506_v7  ;;  %1148 = vmin.xlane.f32.xlu1 %v5470_v4  ;;  %v797_v11 = vpop.f32.mrb[33].mxu0 }
 0x16f   : > { %v988_v14 = vmul.f32 2.0, %v797_v11  ;;  %1150 = vmin.xlane.f32.xlu0 %v5474_v8 }
 0x170   : > { %v5486_v22 = vsub.f32 %v5352_v26, %v989_v10 }
 0x171   : > { %v4509_v16 = vpop.f32.mrb[34].mxu0  ;;  %v5482_v17 = vsub.f32 %v5352_v26, %v988_v14 }
 0x172   : > { %v991_v19 = vmul.f32 2.0, %v4509_v16  ;;  %1152 = vmin.xlane.f32.xlu1 %v5478_v13  ;;  %v807_v20 = vpop.f32.mrb[35].mxu0 }
 0x173   : > { %v990_v23 = vmul.f32 2.0, %v807_v20  ;;  %1154 = vmin.xlane.f32.xlu0 %v5482_v17 }
 0x174   : > { %v5494_v33 = vsub.f32 %v5352_v26, %v991_v19 }
 0x175   : > { %v4512_v25 = vpop.f32.mrb[36].mxu0  ;;  %v5490_v27 = vsub.f32 %v5352_v26, %v990_v23 }
 0x176   : > { %v993_v29 = vmul.f32 2.0, %v4512_v25  ;;  %1156 = vmin.xlane.f32.xlu1 %v5486_v22  ;;  %v817_v31 = vpop.f32.mrb[37].mxu0 }
 0x177   : > { %v992_v34 = vmul.f32 2.0, %v817_v31  ;;  %1158 = vmin.xlane.f32.xlu0 %v5490_v27 }
 0x178   : > { %v5502_v47 = vsub.f32 %v5352_v26, %v993_v29 }
 0x179   : > { %v4515_v38 = vpop.f32.mrb[38].mxu0  ;;  %v5498_v39 = vsub.f32 %v5352_v26, %v992_v34 }
 0x17a   : > { %v995_v42 = vmul.f32 2.0, %v4515_v38  ;;  %1160 = vmin.xlane.f32.xlu1 %v5494_v33  ;;  %v827_v44 = vpop.f32.mrb[39].mxu0 }
 0x17b   : > { %v994_v48 = vmul.f32 2.0, %v827_v44  ;;  %1162 = vmin.xlane.f32.xlu0 %v5498_v39 }
 0x17c   : > { %v5510_v60 = vsub.f32 %v5352_v26, %v995_v42 }
 0x17d   : > { %v4518_v51 = vpop.f32.mrb[40].mxu0  ;;  %v5506_v53 = vsub.f32 %v5352_v26, %v994_v48 }
 0x17e   : > { %v997_v56 = vmul.f32 2.0, %v4518_v51  ;;  %1164 = vmin.xlane.f32.xlu1 %v5502_v47  ;;  %v837_v57 = vpop.f32.mrb[41].mxu0 }
 0x17f   : > { %v996_v62 = vmul.f32 2.0, %v837_v57  ;;  %1166 = vmin.xlane.f32.xlu0 %v5506_v53 }
 0x180   : > { %v5518_v10 = vsub.f32 %v5352_v26, %v997_v56 }
 0x181   : > { %v4521_v1 = vpop.f32.mrb[42].mxu0  ;;  %v5514_v2 = vsub.f32 %v5352_v26, %v996_v62 }
 0x182   : > { %v999_v5 = vmul.f32 2.0, %v4521_v1  ;;  %1168 = vmin.xlane.f32.xlu1 %v5510_v60  ;;  %v847_v7 = vpop.f32.mrb[43].mxu0 }
 0x183   : > { %v998_v11 = vmul.f32 2.0, %v847_v7  ;;  %1170 = vmin.xlane.f32.xlu0 %v5514_v2 }
 0x184   : > { %v5526_v23 = vsub.f32 %v5352_v26, %v999_v5 }
 0x185   : > { %v4524_v14 = vpop.f32.mrb[44].mxu0  ;;  %v5522_v16 = vsub.f32 %v5352_v26, %v998_v11 }
 0x186   : > { %v1001_v19 = vmul.f32 2.0, %v4524_v14  ;;  %1172 = vmin.xlane.f32.xlu1 %v5518_v10  ;;  %v857_v20 = vpop.f32.mrb[45].mxu0 }
 0x187   : > { %v1000_v25 = vmul.f32 2.0, %v857_v20  ;;  %1174 = vmin.xlane.f32.xlu0 %v5522_v16 }
 0x188   : > { %v5534_v42 = vsub.f32 %v5352_v26, %v1001_v19 }
 0x189   : > { %v4527_v29 = vpop.f32.mrb[46].mxu0  ;;  %v5530_v31 = vsub.f32 %v5352_v26, %v1000_v25 }
 0x18a   : > { %v1003_v34 = vmul.f32 2.0, %v4527_v29  ;;  %1176 = vmin.xlane.f32.xlu1 %v5526_v23  ;;  %v867_v38 = vpop.f32.mrb[47].mxu0 }
 0x18b   : > { %v1002_v44 = vmul.f32 2.0, %v867_v38  ;;  %1178 = vmin.xlane.f32.xlu0 %v5530_v31 }
 0x18c   : > { %v5542_v62 = vsub.f32 %v5352_v26, %v1003_v34 }
 0x18d   : > { %v4530_v48 = vpop.f32.mrb[48].mxu0  ;;  %v5538_v51 = vsub.f32 %v5352_v26, %v1002_v44 }
 0x18e   : > { %v1005_v56 = vmul.f32 2.0, %v4530_v48  ;;  %1180 = vmin.xlane.f32.xlu1 %v5534_v42  ;;  %v877_v57 = vpop.f32.mrb[49].mxu0 }
 0x18f   : > { %v1004_v1 = vmul.f32 2.0, %v877_v57  ;;  %1182 = vmin.xlane.f32.xlu0 %v5538_v51 }
 0x190   : > { %v5550_v19 = vsub.f32 %v5352_v26, %v1005_v56 }
 0x191   : > { %v4533_v5 = vpop.f32.mrb[50].mxu0  ;;  %v5546_v7 = vsub.f32 %v5352_v26, %v1004_v1 }
 0x192   : > { %v1007_v11 = vmul.f32 2.0, %v4533_v5  ;;  %1184 = vmin.xlane.f32.xlu1 %v5542_v62  ;;  %v887_v14 = vpop.f32.mrb[51].mxu0 }
 0x193   : > { %v1006_v20 = vmul.f32 2.0, %v887_v14  ;;  %1186 = vmin.xlane.f32.xlu0 %v5546_v7 }
 0x194   : > { %v5558_v44 = vsub.f32 %v5352_v26, %v1007_v11 }
 0x195   : > { %v4536_v25 = vpop.f32.mrb[52].mxu0  ;;  %v5554_v29 = vsub.f32 %v5352_v26, %v1006_v20 }
 0x196   : > { %v1009_v34 = vmul.f32 2.0, %v4536_v25  ;;  %1188 = vmin.xlane.f32.xlu1 %v5550_v19  ;;  %v897_v38 = vpop.f32.mrb[53].mxu0  ;;  %7816 = vst [vmem:[#allocation9_spill] sm:$0xff] %v5558_v44 }
 0x197   : > { %7815 = vst [vmem:[#allocation8_spill] sm:$0xff] %v5554_v29  ;;  %v1008_v48 = vmul.f32 2.0, %v897_v38  ;;  %1190 = vmin.xlane.f32.xlu0 %v5554_v29 }
 0x198   : > { %v5566_v14 = vsub.f32 %v5352_v26, %v1009_v34 }
 0x199   : > { %v4539_v57 = vpop.f32.mrb[54].mxu0  ;;  %v5562_v56 = vsub.f32 %v5352_v26, %v1008_v48 }
 0x19a   : > { %v1011_v1 = vmul.f32 2.0, %v4539_v57  ;;  %1192 = vmin.xlane.f32.xlu1 %v5558_v44  ;;  %v907_v5 = vpop.f32.mrb[55].mxu0  ;;  %7818 = vst [vmem:[#allocation11_spill] sm:$0xff] %v5566_v14 }
 0x19b   : > { %7817 = vst [vmem:[#allocation10_spill] sm:$0xff] %v5562_v56  ;;  %v1010_v20 = vmul.f32 2.0, %v907_v5  ;;  %1194 = vmin.xlane.f32.xlu0 %v5562_v56 }
 0x19c   : > { %v5574_v48 = vsub.f32 %v5352_v26, %v1011_v1 }
 0x19d   : > { %v4542_v25 = vpop.f32.mrb[56].mxu0  ;;  %v5570_v11 = vsub.f32 %v5352_v26, %v1010_v20 }
 0x19e   : > { %v1013_v38 = vmul.f32 2.0, %v4542_v25  ;;  %1196 = vmin.xlane.f32.xlu1 %v5566_v14  ;;  %v917_v29 = vpop.f32.mrb[57].mxu0  ;;  %7820 = vst [vmem:[#allocation13_spill] sm:$0xff] %v5574_v48 }
 0x19f   : > { %7819 = vst [vmem:[#allocation12_spill] sm:$0xff] %v5570_v11  ;;  %v1012_v57 = vmul.f32 2.0, %v917_v29  ;;  %1198 = vmin.xlane.f32.xlu0 %v5570_v11 }
 0x1a0   : > { %v5582_v20 = vsub.f32 %v5352_v26, %v1013_v38 }
 0x1a1   : > { %v4545_v44 = vpop.f32.mrb[58].mxu0  ;;  %v5578_v34 = vsub.f32 %v5352_v26, %v1012_v57 }
 0x1a2   : > { %v1015_v5 = vmul.f32 2.0, %v4545_v44  ;;  %1200 = vmin.xlane.f32.xlu1 %v5574_v48  ;;  %v927_v56 = vpop.f32.mrb[59].mxu0 }
 0x1a3   : > { %7821 = vst [vmem:[#allocation14_spill] sm:$0xff] %v5578_v34  ;;  %v1014_v25 = vmul.f32 2.0, %v927_v56  ;;  %1202 = vmin.xlane.f32.xlu0 %v5578_v34 }
 0x1a4   : > { %v5590_v57 = vsub.f32 %v5352_v26, %v1015_v5 }
 0x1a5   : > { %v4548_v14 = vpop.f32.mrb[60].mxu0  ;;  %v5586_v1 = vsub.f32 %v5352_v26, %v1014_v25 }
 0x1a6   : > { %v1017_v29 = vmul.f32 2.0, %v4548_v14  ;;  %1204 = vmin.xlane.f32.xlu1 %v5582_v20  ;;  %v937_v11 = vpop.f32.mrb[61].mxu0 }
 0x1a7   : > { %v1016_v44 = vmul.f32 2.0, %v937_v11  ;;  %1206 = vmin.xlane.f32.xlu0 %v5586_v1 }
 0x1a8   : > { %v5598_v25 = vsub.f32 %v5352_v26, %v1017_v29 }
 0x1a9   : > { %v4551_v48 = vpop.f32.mrb[62].mxu0  ;;  %v5594_v38 = vsub.f32 %v5352_v26, %v1016_v44 }
 0x1aa   : > { %v1019_v56 = vmul.f32 2.0, %v4551_v48  ;;  %1208 = vmin.xlane.f32.xlu1 %v5590_v57  ;;  %v947_v34 = vpop.f32.mrb[63].mxu0  ;;  %7823 = vst [vmem:[#allocation16_spill] sm:$0xff] %v5598_v25  ;;  %v7708_v48 = vlaneseq }
 0x1ab   : > { %7822 = vst [vmem:[#allocation15_spill] sm:$0xff] %v5594_v38  ;;  %v1018_v14 = vmul.f32 2.0, %v947_v34  ;;  %1210 = vmin.xlane.f32.xlu0 %v5594_v38 }
 0x1ac   : > { %v5606_v11 = vsub.f32 %v5352_v26, %v1019_v56  ;;  %v5611_v44 = vand.u32 127, %v7708_v48 }
 0x1ad   : > { %v5602_v5 = vsub.f32 %v5352_v26, %v1018_v14 }
 0x1ae   : > { %1212 = vmin.xlane.f32.xlu1 %v5598_v25  ;;  %7824 = vst [vmem:[#allocation17_spill] sm:$0xff] %v5611_v44 }
 0x1af   : > { %1214 = vmin.xlane.f32.xlu0 %v5602_v5 }
 0x1b2   : > { %1216 = vmin.xlane.f32.xlu1 %v5606_v11 }
 0x1bf   : > { %v1093_v29 = vpop.xlane.xlu0 %1092 }
 0x1c0   : > { %vm1221_vm2 = vcmp.eq.f32.partialorder %v5355_v30, %v1093_v29 }
 0x1c1   : > { %v5615_v34 = vsel %vm1221_vm2, %v5611_v44, 128 }
 0x1c2   : > { %7825 = vst [vmem:[#allocation18_spill] sm:$0xff] %v5615_v34  ;;  %v1363_v14 = vshra.s32 %v5615_v34, 16 }
 0x1c3   : > { %v1091_v25 = vpop.xlane.xlu0 %1090  ;;  %v1097_v38 = vpop.xlane.xlu1 %1096 }
 0x1c4   : > { %vm1220_vm3 = vcmp.eq.f32.partialorder %v5359_v35, %v1091_v25  ;;  %vm1223_vm4 = vcmp.eq.f32.partialorder %v5362_v36, %v1097_v38  ;;  %v5620_v26 = vcvt.s32.f32 %v1363_v14 }
 0x1c5   : > { %v5623_v56 = vsel %vm1220_vm3, %v5611_v44, 128  ;;  %v5626_v48 = vsel %vm1223_vm4, %v5611_v44, 128 }
 0x1c6   : > { %7826 = vst [vmem:[#allocation19_spill] sm:$0xff] %v5620_v26  ;;  %7827 = vst [vmem:[#allocation20_spill] sm:$0xff] %v5626_v48  ;;  %1366 = vmin.xlane.f32.xlu1 %v5620_v26  ;;  %v1391_v30 = vshra.s32 %v5626_v48, 16  ;;  %v1349_v29 = vshra.s32 %v5623_v56, 16 }
 0x1c7   : > { %v1095_v34 = vpop.xlane.xlu1 %1094 }
 0x1c8   : > { %vm1222_vm5 = vcmp.eq.f32.partialorder %v5367_v41, %v1095_v34  ;;  %v1099_v35 = vpop.xlane.xlu0 %1098  ;;  %v5632_v25 = vcvt.s32.f32 %v1391_v30  ;;  %v5634_v36 = vcvt.s32.f32 %v1349_v29 }
 0x1c9   : > { %v5637_v38 = vsel %vm1222_vm5, %v5611_v44, 128  ;;  %vm1224_vm6 = vcmp.eq.f32.partialorder %v5370_v43, %v1099_v35 }
 0x1ca   : > { %7828 = vst [vmem:[#allocation21_spill] sm:$0xff] %v5632_v25  ;;  %7829 = vst [vmem:[#allocation22_spill] sm:$0xff] %v5634_v36  ;;  %v5641_v14 = vsel %vm1224_vm6, %v5611_v44, 128  ;;  %1394 = vmin.xlane.f32.xlu1 %v5632_v25  ;;  %1352 = vmin.xlane.f32.xlu0 %v5634_v36  ;;  %v1377_v26 = vshra.s32 %v5637_v38, 16 }
 0x1cb   : > { %7830 = vst [vmem:[#allocation23_spill] sm:$0xff] %v5641_v14  ;;  %v1101_v41 = vpop.xlane.xlu1 %1100  ;;  %v1405_v29 = vshra.s32 %v5641_v14, 16 }
 0x1cc   : > { %vm1225_vm7 = vcmp.eq.f32.partialorder %v5374_v46, %v1101_v41  ;;  %v1103_v34 = vpop.xlane.xlu0 %1102  ;;  %v5647_v30 = vcvt.s32.f32 %v1377_v26 }
 0x1cd   : > { %v5651_v48 = vsel %vm1225_vm7, %v5611_v44, 128  ;;  %vm1226_vm8 = vcmp.eq.f32.partialorder %v5378_v49, %v1103_v34  ;;  %v5662_v41 = vcvt.s32.f32 %v1405_v29 }
 0x1ce   : > { %v5655_v43 = vsel %vm1226_vm8, %v5611_v44, 128  ;;  %1380 = vmin.xlane.f32.xlu0 %v5647_v30  ;;  %v1419_v35 = vshra.s32 %v5651_v48, 16 }
 0x1cf   : > { %7831 = vst [vmem:[#allocation24_spill] sm:$0xff] %v5655_v43  ;;  %v1105_v36 = vpop.xlane.xlu1 %1104  ;;  %7832 = vst [vmem:[#allocation25_spill] sm:$0xff] %v5662_v41  ;;  %v1433_v14 = vshra.s32 %v5655_v43, 16 }
 0x1d0   : > { %vm1227_vm9 = vcmp.eq.f32.partialorder %v5382_v52, %v1105_v36  ;;  %v1107_v46 = vpop.xlane.xlu0 %1106  ;;  %v5660_v26 = vcvt.s32.f32 %v1419_v35 }
 0x1d1   : > { %v5666_v25 = vsel %vm1227_vm9, %v5611_v44, 128  ;;  %vm1228_vm10 = vcmp.eq.f32.partialorder %v5386_v55, %v1107_v46  ;;  %v5678_v35 = vcvt.s32.f32 %v1433_v14 }
 0x1d2   : > { %v5670_v49 = vsel %vm1228_vm10, %v5611_v44, 128  ;;  %1422 = vmin.xlane.f32.xlu1 %v5660_v26  ;;  %1408 = vmin.xlane.f32.xlu0 %v5662_v41  ;;  %v1447_v52 = vshra.s32 %v5666_v25, 16 }
 0x1d3   : > { %7833 = vst [vmem:[#allocation26_spill] sm:$0xff] %v5670_v49  ;;  %v1109_v36 = vpop.xlane.xlu1 %1108  ;;  %7834 = vst [vmem:[#allocation27_spill] sm:$0xff] %v5678_v35  ;;  %v1461_v43 = vshra.s32 %v5670_v49, 16 }
 0x1d4   : > { %vm1229_vm11 = vcmp.eq.f32.partialorder %v5390_v58, %v1109_v36  ;;  %v1111_v34 = vpop.xlane.xlu0 %1110  ;;  %v5676_v29 = vcvt.s32.f32 %v1447_v52 }
 0x1d5   : > { %v5682_v55 = vsel %vm1229_vm11, %v5611_v44, 128  ;;  %vm1230_vm12 = vcmp.eq.f32.partialorder %v5394_v61, %v1111_v34  ;;  %v5694_v49 = vcvt.s32.f32 %v1461_v43 }
 0x1d6   : > { %v5686_v46 = vsel %vm1230_vm12, %v5611_v44, 128  ;;  %1450 = vmin.xlane.f32.xlu1 %v5676_v29  ;;  %1436 = vmin.xlane.f32.xlu0 %v5678_v35  ;;  %v1475_v58 = vshra.s32 %v5682_v55, 16 }
 0x1d7   : > { %7835 = vst [vmem:[#allocation28_spill] sm:$0xff] %v5686_v46  ;;  %v1113_v52 = vpop.xlane.xlu1 %1112  ;;  %7836 = vst [vmem:[#allocation29_spill] sm:$0xff] %v5694_v49  ;;  %v1489_v41 = vshra.s32 %v5686_v46, 16 }
 0x1d8   : > { %vm1231_vm13 = vcmp.eq.f32.partialorder %v5398_v0, %v1113_v52  ;;  %v1115_v14 = vpop.xlane.xlu0 %1114  ;;  %v5692_v36 = vcvt.s32.f32 %v1475_v58 }
 0x1d9   : > { %v5698_v61 = vsel %vm1231_vm13, %v5611_v44, 128  ;;  %vm1232_vm14 = vcmp.eq.f32.partialorder %v5402_v3, %v1115_v14  ;;  %v5710_v46 = vcvt.s32.f32 %v1489_v41 }
 0x1da   : > { %v5702_v34 = vsel %vm1232_vm14, %v5611_v44, 128  ;;  %1478 = vmin.xlane.f32.xlu1 %v5692_v36  ;;  %1464 = vmin.xlane.f32.xlu0 %v5694_v49  ;;  %v1503_v0 = vshra.s32 %v5698_v61, 16 }
 0x1db   : > { %7837 = vst [vmem:[#allocation30_spill] sm:$0xff] %v5702_v34  ;;  %v1117_v58 = vpop.xlane.xlu1 %1116  ;;  %7838 = vst [vmem:[#allocation31_spill] sm:$0xff] %v5710_v46  ;;  %v1517_v35 = vshra.s32 %v5702_v34, 16 }
 0x1dc   : > { %vm1233_vm15 = vcmp.eq.f32.partialorder %v5406_v6, %v1117_v58  ;;  %v1119_v43 = vpop.xlane.xlu0 %1118  ;;  %v5708_v52 = vcvt.s32.f32 %v1503_v0 }
 0x1dd   : > { %v5714_v3 = vsel %vm1233_vm15, %v5611_v44, 128  ;;  %vm1234_vm1 = vcmp.eq.f32.partialorder %v5410_v9, %v1119_v43  ;;  %v5726_v34 = vcvt.s32.f32 %v1517_v35 }
 0x1de   : > { %v5718_v14 = vsel %vm1234_vm1, %v5611_v44, 128  ;;  %1506 = vmin.xlane.f32.xlu1 %v5708_v52  ;;  %1492 = vmin.xlane.f32.xlu0 %v5710_v46  ;;  %v1531_v6 = vshra.s32 %v5714_v3, 16 }
 0x1df   : > { %7839 = vst [vmem:[#allocation32_spill] sm:$0xff] %v5718_v14  ;;  %v1121_v0 = vpop.xlane.xlu1 %1120  ;;  %7840 = vst [vmem:[#allocation33_spill] sm:$0xff] %v5726_v34  ;;  %v1545_v49 = vshra.s32 %v5718_v14, 16 }
 0x1e0   : > { %vm1235_vm2 = vcmp.eq.f32.partialorder %v5414_v12, %v1121_v0  ;;  %v1123_v41 = vpop.xlane.xlu0 %1122  ;;  %v5724_v58 = vcvt.s32.f32 %v1531_v6 }
 0x1e1   : > { %v5730_v9 = vsel %vm1235_vm2, %v5611_v44, 128  ;;  %vm1236_vm3 = vcmp.eq.f32.partialorder %v5418_v15, %v1123_v41  ;;  %v5742_v14 = vcvt.s32.f32 %v1545_v49 }
 0x1e2   : > { %v5734_v43 = vsel %vm1236_vm3, %v5611_v44, 128  ;;  %1534 = vmin.xlane.f32.xlu1 %v5724_v58  ;;  %1520 = vmin.xlane.f32.xlu0 %v5726_v34  ;;  %v1559_v12 = vshra.s32 %v5730_v9, 16 }
 0x1e3   : > { %7841 = vst [vmem:[#allocation34_spill] sm:$0xff] %v5734_v43  ;;  %v1125_v6 = vpop.xlane.xlu1 %1124  ;;  %7842 = vst [vmem:[#allocation35_spill] sm:$0xff] %v5742_v14  ;;  %v1573_v46 = vshra.s32 %v5734_v43, 16 }
 0x1e4   : > { %vm1237_vm4 = vcmp.eq.f32.partialorder %v5422_v18, %v1125_v6  ;;  %v1127_v35 = vpop.xlane.xlu0 %1126  ;;  %v5740_v0 = vcvt.s32.f32 %v1559_v12 }
 0x1e5   : > { %v5746_v15 = vsel %vm1237_vm4, %v5611_v44, 128  ;;  %vm1238_vm5 = vcmp.eq.f32.partialorder %v5426_v21, %v1127_v35  ;;  %v5758_v43 = vcvt.s32.f32 %v1573_v46 }
 0x1e6   : > { %v5750_v41 = vsel %vm1238_vm5, %v5611_v44, 128  ;;  %1562 = vmin.xlane.f32.xlu1 %v5740_v0  ;;  %1548 = vmin.xlane.f32.xlu0 %v5742_v14  ;;  %v1587_v18 = vshra.s32 %v5746_v15, 16 }
 0x1e7   : > { %7843 = vst [vmem:[#allocation36_spill] sm:$0xff] %v5750_v41  ;;  %v1129_v12 = vpop.xlane.xlu1 %1128  ;;  %7844 = vst [vmem:[#allocation37_spill] sm:$0xff] %v5758_v43  ;;  %v1601_v34 = vshra.s32 %v5750_v41, 16 }
 0x1e8   : > { %vm1239_vm6 = vcmp.eq.f32.partialorder %v5430_v24, %v1129_v12  ;;  %v1131_v49 = vpop.xlane.xlu0 %1130  ;;  %v5756_v6 = vcvt.s32.f32 %v1587_v18 }
 0x1e9   : > { %v5762_v21 = vsel %vm1239_vm6, %v5611_v44, 128  ;;  %vm1240_vm7 = vcmp.eq.f32.partialorder %v5434_v28, %v1131_v49  ;;  %v5774_v41 = vcvt.s32.f32 %v1601_v34 }
 0x1ea   : > { %v5766_v35 = vsel %vm1240_vm7, %v5611_v44, 128  ;;  %1590 = vmin.xlane.f32.xlu1 %v5756_v6  ;;  %1576 = vmin.xlane.f32.xlu0 %v5758_v43  ;;  %v1615_v24 = vshra.s32 %v5762_v21, 16 }
 0x1eb   : > { %7845 = vst [vmem:[#allocation38_spill] sm:$0xff] %v5766_v35  ;;  %v1133_v18 = vpop.xlane.xlu1 %1132  ;;  %7846 = vst [vmem:[#allocation39_spill] sm:$0xff] %v5774_v41  ;;  %v1629_v14 = vshra.s32 %v5766_v35, 16 }
 0x1ec   : > { %vm1241_vm8 = vcmp.eq.f32.partialorder %v5438_v32, %v1133_v18  ;;  %v1135_v46 = vpop.xlane.xlu0 %1134  ;;  %v5772_v12 = vcvt.s32.f32 %v1615_v24 }
 0x1ed   : > { %v5778_v28 = vsel %vm1241_vm8, %v5611_v44, 128  ;;  %vm1242_vm9 = vcmp.eq.f32.partialorder %v5442_v37, %v1135_v46  ;;  %v5790_v35 = vcvt.s32.f32 %v1629_v14 }
 0x1ee   : > { %v5782_v49 = vsel %vm1242_vm9, %v5611_v44, 128  ;;  %1618 = vmin.xlane.f32.xlu1 %v5772_v12  ;;  %1604 = vmin.xlane.f32.xlu0 %v5774_v41  ;;  %v1643_v32 = vshra.s32 %v5778_v28, 16 }
 0x1ef   : > { %7847 = vst [vmem:[#allocation40_spill] sm:$0xff] %v5782_v49  ;;  %v1137_v24 = vpop.xlane.xlu1 %1136  ;;  %7848 = vst [vmem:[#allocation41_spill] sm:$0xff] %v5790_v35  ;;  %v1657_v43 = vshra.s32 %v5782_v49, 16 }
 0x1f0   : > { %vm1243_vm10 = vcmp.eq.f32.partialorder %v5446_v40, %v1137_v24  ;;  %v1139_v34 = vpop.xlane.xlu0 %1138  ;;  %v5788_v18 = vcvt.s32.f32 %v1643_v32 }
 0x1f1   : > { %v5794_v37 = vsel %vm1243_vm10, %v5611_v44, 128  ;;  %vm1244_vm11 = vcmp.eq.f32.partialorder %v5450_v45, %v1139_v34  ;;  %v5806_v49 = vcvt.s32.f32 %v1657_v43 }
 0x1f2   : > { %v5798_v46 = vsel %vm1244_vm11, %v5611_v44, 128  ;;  %1646 = vmin.xlane.f32.xlu1 %v5788_v18  ;;  %1632 = vmin.xlane.f32.xlu0 %v5790_v35  ;;  %v1671_v40 = vshra.s32 %v5794_v37, 16 }
 0x1f3   : > { %7849 = vst [vmem:[#allocation42_spill] sm:$0xff] %v5798_v46  ;;  %v1141_v32 = vpop.xlane.xlu1 %1140  ;;  %7850 = vst [vmem:[#allocation43_spill] sm:$0xff] %v5806_v49  ;;  %v1685_v41 = vshra.s32 %v5798_v46, 16 }
 0x1f4   : > { %vm1245_vm12 = vcmp.eq.f32.partialorder %v5454_v50, %v1141_v32  ;;  %v1143_v14 = vpop.xlane.xlu0 %1142  ;;  %v5804_v24 = vcvt.s32.f32 %v1671_v40 }
 0x1f5   : > { %v5810_v45 = vsel %vm1245_vm12, %v5611_v44, 128  ;;  %vm1246_vm13 = vcmp.eq.f32.partialorder %v5458_v54, %v1143_v14  ;;  %v5822_v46 = vcvt.s32.f32 %v1685_v41 }
 0x1f6   : > { %v5814_v34 = vsel %vm1246_vm13, %v5611_v44, 128  ;;  %1674 = vmin.xlane.f32.xlu1 %v5804_v24  ;;  %1660 = vmin.xlane.f32.xlu0 %v5806_v49  ;;  %v1699_v50 = vshra.s32 %v5810_v45, 16 }
 0x1f7   : > { %7851 = vst [vmem:[#allocation44_spill] sm:$0xff] %v5814_v34  ;;  %v1145_v40 = vpop.xlane.xlu1 %1144  ;;  %7852 = vst [vmem:[#allocation45_spill] sm:$0xff] %v5822_v46  ;;  %v1713_v35 = vshra.s32 %v5814_v34, 16 }
 0x1f8   : > { %vm1247_vm14 = vcmp.eq.f32.partialorder %v5462_v59, %v1145_v40  ;;  %v1147_v43 = vpop.xlane.xlu0 %1146  ;;  %v5820_v32 = vcvt.s32.f32 %v1699_v50 }
 0x1f9   : > { %v5826_v54 = vsel %vm1247_vm14, %v5611_v44, 128  ;;  %vm1248_vm15 = vcmp.eq.f32.partialorder %v5466_v63, %v1147_v43  ;;  %v5838_v34 = vcvt.s32.f32 %v1713_v35 }
 0x1fa   : > { %v5830_v14 = vsel %vm1248_vm15, %v5611_v44, 128  ;;  %1702 = vmin.xlane.f32.xlu1 %v5820_v32  ;;  %1688 = vmin.xlane.f32.xlu0 %v5822_v46  ;;  %v1727_v59 = vshra.s32 %v5826_v54, 16 }
 0x1fb   : > { %7853 = vst [vmem:[#allocation46_spill] sm:$0xff] %v5830_v14  ;;  %v1149_v50 = vpop.xlane.xlu1 %1148  ;;  %7854 = vst [vmem:[#allocation47_spill] sm:$0xff] %v5838_v34  ;;  %v1741_v49 = vshra.s32 %v5830_v14, 16 }
 0x1fc   : > { %vm1249_vm1 = vcmp.eq.f32.partialorder %v5470_v4, %v1149_v50  ;;  %v1151_v41 = vpop.xlane.xlu0 %1150  ;;  %v5836_v40 = vcvt.s32.f32 %v1727_v59 }
 0x1fd   : > { %v5842_v63 = vsel %vm1249_vm1, %v5611_v44, 128  ;;  %vm1250_vm2 = vcmp.eq.f32.partialorder %v5474_v8, %v1151_v41  ;;  %v5854_v14 = vcvt.s32.f32 %v1741_v49 }
 0x1fe   : > { %v5846_v43 = vsel %vm1250_vm2, %v5611_v44, 128  ;;  %1730 = vmin.xlane.f32.xlu1 %v5836_v40  ;;  %1716 = vmin.xlane.f32.xlu0 %v5838_v34  ;;  %v1755_v4 = vshra.s32 %v5842_v63, 16 }
 0x1ff   : > { %7855 = vst [vmem:[#allocation48_spill] sm:$0xff] %v5846_v43  ;;  %v1153_v59 = vpop.xlane.xlu1 %1152  ;;  %7856 = vst [vmem:[#allocation49_spill] sm:$0xff] %v5854_v14  ;;  %v1769_v46 = vshra.s32 %v5846_v43, 16 }
 0x200   : > { %vm1251_vm3 = vcmp.eq.f32.partialorder %v5478_v13, %v1153_v59  ;;  %v1155_v35 = vpop.xlane.xlu0 %1154  ;;  %v5852_v50 = vcvt.s32.f32 %v1755_v4 }
 0x201   : > { %v5858_v8 = vsel %vm1251_vm3, %v5611_v44, 128  ;;  %vm1252_vm4 = vcmp.eq.f32.partialorder %v5482_v17, %v1155_v35  ;;  %v5870_v43 = vcvt.s32.f32 %v1769_v46 }
 0x202   : > { %v5862_v41 = vsel %vm1252_vm4, %v5611_v44, 128  ;;  %1758 = vmin.xlane.f32.xlu1 %v5852_v50  ;;  %1744 = vmin.xlane.f32.xlu0 %v5854_v14  ;;  %v1783_v13 = vshra.s32 %v5858_v8, 16 }
 0x203   : > { %7857 = vst [vmem:[#allocation50_spill] sm:$0xff] %v5862_v41  ;;  %v1157_v4 = vpop.xlane.xlu1 %1156  ;;  %7858 = vst [vmem:[#allocation51_spill] sm:$0xff] %v5870_v43  ;;  %v1797_v34 = vshra.s32 %v5862_v41, 16 }
 0x204   : > { %vm1253_vm5 = vcmp.eq.f32.partialorder %v5486_v22, %v1157_v4  ;;  %v1159_v49 = vpop.xlane.xlu0 %1158  ;;  %v5868_v59 = vcvt.s32.f32 %v1783_v13 }
 0x205   : > { %v5874_v17 = vsel %vm1253_vm5, %v5611_v44, 128  ;;  %vm1254_vm6 = vcmp.eq.f32.partialorder %v5490_v27, %v1159_v49  ;;  %v5887_v14 = vcvt.s32.f32 %v1797_v34 }
 0x206   : > { %v5878_v35 = vsel %vm1254_vm6, %v5611_v44, 128  ;;  %1786 = vmin.xlane.f32.xlu1 %v5868_v59  ;;  %1772 = vmin.xlane.f32.xlu0 %v5870_v43  ;;  %v1811_v22 = vshra.s32 %v5874_v17, 16 }
 0x207   : > { %7859 = vst [vmem:[#allocation52_spill] sm:$0xff] %v5878_v35  ;;  %v1161_v13 = vpop.xlane.xlu1 %1160  ;;  %v1825_v46 = vshra.s32 %v5878_v35, 16 }
 0x208   : > { %vm1255_vm7 = vcmp.eq.f32.partialorder %v5494_v33, %v1161_v13  ;;  %v1163_v4 = vpop.xlane.xlu0 %1162  ;;  %v5885_v41 = vcvt.s32.f32 %v1811_v22 }
 0x209   : > { %v5890_v27 = vsel %vm1255_vm7, %v5611_v44, 128  ;;  %vm1256_vm8 = vcmp.eq.f32.partialorder %v5498_v39, %v1163_v4  ;;  %v5903_v35 = vcvt.s32.f32 %v1825_v46 }
 0x20a   : > { %7860 = vst [vmem:[#allocation53_spill] sm:$0xff] %v5885_v41  ;;  %v1839_v49 = vshra.s32 %v5890_v27, 16  ;;  %v5895_v43 = vsel %vm1256_vm8, %v5611_v44, 128  ;;  %1814 = vmin.xlane.f32.xlu1 %v5885_v41  ;;  %1800 = vmin.xlane.f32.xlu0 %v5887_v14 }
 0x20b   : > { %7861 = vst [vmem:[#allocation54_spill] sm:$0xff] %v5895_v43  ;;  %v1165_v33 = vpop.xlane.xlu1 %1164  ;;  %v1853_v22 = vshra.s32 %v5895_v43, 16 }
 0x20c   : > { %vm1257_vm9 = vcmp.eq.f32.partialorder %v5502_v47, %v1165_v33  ;;  %v1167_v34 = vpop.xlane.xlu0 %1166  ;;  %v5901_v13 = vcvt.s32.f32 %v1839_v49 }
 0x20d   : > { %v5906_v39 = vsel %vm1257_vm9, %v5611_v44, 128  ;;  %vm1258_vm10 = vcmp.eq.f32.partialorder %v5506_v53, %v1167_v34  ;;  %v5919_v43 = vcvt.s32.f32 %v1853_v22 }
 0x20e   : > { %7862 = vst [vmem:[#allocation55_spill] sm:$0xff] %v5901_v13  ;;  %v1867_v4 = vshra.s32 %v5906_v39, 16  ;;  %v5911_v41 = vsel %vm1258_vm10, %v5611_v44, 128  ;;  %1842 = vmin.xlane.f32.xlu1 %v5901_v13  ;;  %1828 = vmin.xlane.f32.xlu0 %v5903_v35 }
 0x20f   : > { %7863 = vst [vmem:[#allocation56_spill] sm:$0xff] %v5911_v41  ;;  %v1169_v47 = vpop.xlane.xlu1 %1168  ;;  %v1881_v49 = vshra.s32 %v5911_v41, 16 }
 0x210   : > { %vm1259_vm11 = vcmp.eq.f32.partialorder %v5510_v60, %v1169_v47  ;;  %v1171_v46 = vpop.xlane.xlu0 %1170  ;;  %v5917_v33 = vcvt.s32.f32 %v1867_v4 }
 0x211   : > { %v5922_v53 = vsel %vm1259_vm11, %v5611_v44, 128  ;;  %vm1260_vm12 = vcmp.eq.f32.partialorder %v5514_v2, %v1171_v46  ;;  %v5935_v41 = vcvt.s32.f32 %v1881_v49 }
 0x212   : > { %7864 = vst [vmem:[#allocation57_spill] sm:$0xff] %v5917_v33  ;;  %v1895_v34 = vshra.s32 %v5922_v53, 16  ;;  %v5927_v13 = vsel %vm1260_vm12, %v5611_v44, 128  ;;  %1870 = vmin.xlane.f32.xlu1 %v5917_v33  ;;  %1856 = vmin.xlane.f32.xlu0 %v5919_v43 }
 0x213   : > { %7865 = vst [vmem:[#allocation58_spill] sm:$0xff] %v5927_v13  ;;  %v1173_v60 = vpop.xlane.xlu1 %1172  ;;  %v1909_v4 = vshra.s32 %v5927_v13, 16 }
 0x214   : > { %vm1261_vm13 = vcmp.eq.f32.partialorder %v5518_v10, %v1173_v60  ;;  %v1175_v22 = vpop.xlane.xlu0 %1174  ;;  %v5933_v47 = vcvt.s32.f32 %v1895_v34 }
 0x215   : > { %v5938_v2 = vsel %vm1261_vm13, %v5611_v44, 128  ;;  %vm1262_vm14 = vcmp.eq.f32.partialorder %v5522_v16, %v1175_v22  ;;  %v5951_v13 = vcvt.s32.f32 %v1909_v4 }
 0x216   : > { %7866 = vst [vmem:[#allocation59_spill] sm:$0xff] %v5933_v47  ;;  %v1923_v46 = vshra.s32 %v5938_v2, 16  ;;  %v5943_v33 = vsel %vm1262_vm14, %v5611_v44, 128  ;;  %1898 = vmin.xlane.f32.xlu1 %v5933_v47  ;;  %1884 = vmin.xlane.f32.xlu0 %v5935_v41 }
 0x217   : > { %7867 = vst [vmem:[#allocation60_spill] sm:$0xff] %v5943_v33  ;;  %v1177_v10 = vpop.xlane.xlu1 %1176  ;;  %v1937_v34 = vshra.s32 %v5943_v33, 16 }
 0x218   : > { %vm1263_vm15 = vcmp.eq.f32.partialorder %v5526_v23, %v1177_v10  ;;  %v1179_v49 = vpop.xlane.xlu0 %1178  ;;  %v5949_v60 = vcvt.s32.f32 %v1923_v46 }
 0x219   : > { %v5954_v16 = vsel %vm1263_vm15, %v5611_v44, 128  ;;  %vm1264_vm1 = vcmp.eq.f32.partialorder %v5530_v31, %v1179_v49  ;;  %v5967_v33 = vcvt.s32.f32 %v1937_v34 }
 0x21a   : > { %7868 = vst [vmem:[#allocation61_spill] sm:$0xff] %v5949_v60  ;;  %v1951_v22 = vshra.s32 %v5954_v16, 16  ;;  %v5959_v47 = vsel %vm1264_vm1, %v5611_v44, 128  ;;  %1926 = vmin.xlane.f32.xlu1 %v5949_v60  ;;  %1912 = vmin.xlane.f32.xlu0 %v5951_v13 }
 0x21b   : > { %7869 = vst [vmem:[#allocation62_spill] sm:$0xff] %v5959_v47  ;;  %v1181_v23 = vpop.xlane.xlu1 %1180  ;;  %v1965_v46 = vshra.s32 %v5959_v47, 16 }
 0x21c   : > { %vm1265_vm2 = vcmp.eq.f32.partialorder %v5534_v42, %v1181_v23  ;;  %v1183_v4 = vpop.xlane.xlu0 %1182  ;;  %v5965_v10 = vcvt.s32.f32 %v1951_v22 }
 0x21d   : > { %v5970_v31 = vsel %vm1265_vm2, %v5611_v44, 128  ;;  %vm1266_vm3 = vcmp.eq.f32.partialorder %v5538_v51, %v1183_v4  ;;  %v5983_v47 = vcvt.s32.f32 %v1965_v46 }
 0x21e   : > { %7870 = vst [vmem:[#allocation63_spill] sm:$0xff] %v5965_v10  ;;  %v1979_v49 = vshra.s32 %v5970_v31, 16  ;;  %v5975_v60 = vsel %vm1266_vm3, %v5611_v44, 128  ;;  %1954 = vmin.xlane.f32.xlu1 %v5965_v10  ;;  %1940 = vmin.xlane.f32.xlu0 %v5967_v33 }
 0x21f   : > { %7871 = vst [vmem:[#allocation64_spill] sm:$0xff] %v5975_v60  ;;  %v1185_v42 = vpop.xlane.xlu1 %1184  ;;  %v1993_v22 = vshra.s32 %v5975_v60, 16  ;;  %7873 = vst [vmem:[#allocation66_spill] sm:$0xff] %v5983_v47 }
 0x220   : > { %vm1267_vm4 = vcmp.eq.f32.partialorder %v5542_v62, %v1185_v42  ;;  %v1187_v34 = vpop.xlane.xlu0 %1186  ;;  %v5981_v23 = vcvt.s32.f32 %v1979_v49 }
 0x221   : > { %v5986_v51 = vsel %vm1267_vm4, %v5611_v44, 128  ;;  %vm1268_vm5 = vcmp.eq.f32.partialorder %v5546_v7, %v1187_v34  ;;  %v5999_v60 = vcvt.s32.f32 %v1993_v22  ;;  %v7879_v34 = vld [vmem:[#allocation8_spill] sm:$0xff] }
 0x222   : > { %7872 = vst [vmem:[#allocation65_spill] sm:$0xff] %v5981_v23  ;;  %7874 = vst [vmem:[#allocation67_spill] sm:$0xff] %v5986_v51  ;;  %v2007_v4 = vshra.s32 %v5986_v51, 16  ;;  %v5991_v10 = vsel %vm1268_vm5, %v5611_v44, 128  ;;  %1982 = vmin.xlane.f32.xlu1 %v5981_v23  ;;  %1968 = vmin.xlane.f32.xlu0 %v5983_v47 }
 0x223   : > { %7875 = vst [vmem:[#allocation68_spill] sm:$0xff] %v5991_v10  ;;  %v1189_v62 = vpop.xlane.xlu1 %1188  ;;  %v2021_v49 = vshra.s32 %v5991_v10, 16  ;;  %7877 = vst [vmem:[#allocation70_spill] sm:$0xff] %v5999_v60 }
 0x224   : > { %vm1269_vm6 = vcmp.eq.f32.partialorder %v5550_v19, %v1189_v62  ;;  %v1191_v46 = vpop.xlane.xlu0 %1190  ;;  %v5997_v42 = vcvt.s32.f32 %v2007_v4  ;;  %v7881_v62 = vld [vmem:[#allocation9_spill] sm:$0xff] }
 0x225   : > { %v6002_v7 = vsel %vm1269_vm6, %v5611_v44, 128  ;;  %vm1270_vm7 = vcmp.eq.f32.partialorder %v7879_v34, %v1191_v46  ;;  %v6015_v47 = vcvt.s32.f32 %v2021_v49  ;;  %v7885_v34 = vld [vmem:[#allocation10_spill] sm:$0xff] }
 0x226   : > { %7876 = vst [vmem:[#allocation69_spill] sm:$0xff] %v5997_v42  ;;  %7878 = vst [vmem:[#allocation71_spill] sm:$0xff] %v6002_v7  ;;  %v2035_v51 = vshra.s32 %v6002_v7, 16  ;;  %v6007_v23 = vsel %vm1270_vm7, %v5611_v44, 128  ;;  %2010 = vmin.xlane.f32.xlu1 %v5997_v42  ;;  %1996 = vmin.xlane.f32.xlu0 %v5999_v60 }
 0x227   : > { %7880 = vst [vmem:[#allocation8_spill] sm:$0xff] %v6007_v23  ;;  %v1193_v19 = vpop.xlane.xlu1 %1192  ;;  %v2049_v4 = vshra.s32 %v6007_v23, 16  ;;  %7883 = vst [vmem:[#allocation72_spill] sm:$0xff] %v6015_v47 }
 0x228   : > { %vm1271_vm8 = vcmp.eq.f32.partialorder %v7881_v62, %v1193_v19  ;;  %v1195_v22 = vpop.xlane.xlu0 %1194  ;;  %v6013_v10 = vcvt.s32.f32 %v2035_v51  ;;  %v7887_v62 = vld [vmem:[#allocation11_spill] sm:$0xff] }
 0x229   : > { %v6018_v46 = vsel %vm1271_vm8, %v5611_v44, 128  ;;  %vm1272_vm9 = vcmp.eq.f32.partialorder %v7885_v34, %v1195_v22  ;;  %v6031_v60 = vcvt.s32.f32 %v2049_v4  ;;  %v7890_v34 = vld [vmem:[#allocation12_spill] sm:$0xff] }
 0x22a   : > { %7882 = vst [vmem:[#allocation9_spill] sm:$0xff] %v6013_v10  ;;  %7884 = vst [vmem:[#allocation73_spill] sm:$0xff] %v6018_v46  ;;  %v2063_v7 = vshra.s32 %v6018_v46, 16  ;;  %v6023_v42 = vsel %vm1272_vm9, %v5611_v44, 128  ;;  %2038 = vmin.xlane.f32.xlu1 %v6013_v10  ;;  %2024 = vmin.xlane.f32.xlu0 %v6015_v47 }
 0x22b   : > { %7886 = vst [vmem:[#allocation10_spill] sm:$0xff] %v6023_v42  ;;  %v1197_v19 = vpop.xlane.xlu1 %1196  ;;  %v2077_v51 = vshra.s32 %v6023_v42, 16 }
 0x22c   : > { %vm1273_vm10 = vcmp.eq.f32.partialorder %v7887_v62, %v1197_v19  ;;  %v1199_v49 = vpop.xlane.xlu0 %1198  ;;  %v6029_v23 = vcvt.s32.f32 %v2063_v7  ;;  %v7892_v62 = vld [vmem:[#allocation13_spill] sm:$0xff] }
 0x22d   : > { %v6034_v22 = vsel %vm1273_vm10, %v5611_v44, 128  ;;  %vm1274_vm11 = vcmp.eq.f32.partialorder %v7890_v34, %v1199_v49  ;;  %v6047_v47 = vcvt.s32.f32 %v2077_v51  ;;  %v7894_v34 = vld [vmem:[#allocation14_spill] sm:$0xff] }
 0x22e   : > { %7888 = vst [vmem:[#allocation11_spill] sm:$0xff] %v6029_v23  ;;  %7889 = vst [vmem:[#allocation74_spill] sm:$0xff] %v6034_v22  ;;  %v2091_v46 = vshra.s32 %v6034_v22, 16  ;;  %v6039_v10 = vsel %vm1274_vm11, %v5611_v44, 128  ;;  %2066 = vmin.xlane.f32.xlu1 %v6029_v23  ;;  %2052 = vmin.xlane.f32.xlu0 %v6031_v60 }
 0x22f   : > { %7891 = vst [vmem:[#allocation12_spill] sm:$0xff] %v6039_v10  ;;  %v1201_v19 = vpop.xlane.xlu1 %1200  ;;  %v2105_v7 = vshra.s32 %v6039_v10, 16 }
 0x230   : > { %vm1275_vm12 = vcmp.eq.f32.partialorder %v7892_v62, %v1201_v19  ;;  %v1203_v4 = vpop.xlane.xlu0 %1202  ;;  %v6045_v42 = vcvt.s32.f32 %v2091_v46 }
 0x231   : > { %v6050_v49 = vsel %vm1275_vm12, %v5611_v44, 128  ;;  %vm1276_vm13 = vcmp.eq.f32.partialorder %v7894_v34, %v1203_v4  ;;  %v6063_v10 = vcvt.s32.f32 %v2105_v7 }
 0x232   : > { %7893 = vst [vmem:[#allocation13_spill] sm:$0xff] %v6045_v42  ;;  %v2119_v22 = vshra.s32 %v6050_v49, 16  ;;  %v6055_v23 = vsel %vm1276_vm13, %v5611_v44, 128  ;;  %2094 = vmin.xlane.f32.xlu1 %v6045_v42  ;;  %2080 = vmin.xlane.f32.xlu0 %v6047_v47 }
 0x233   : > { %7895 = vst [vmem:[#allocation14_spill] sm:$0xff] %v6055_v23  ;;  %v1205_v19 = vpop.xlane.xlu1 %1204  ;;  %v2133_v46 = vshra.s32 %v6055_v23, 16  ;;  %7897 = vst [vmem:[#allocation76_spill] sm:$0xff] %v6063_v10 }
 0x234   : > { %vm1277_vm14 = vcmp.eq.f32.partialorder %v5582_v20, %v1205_v19  ;;  %v1207_v51 = vpop.xlane.xlu0 %1206  ;;  %v6061_v62 = vcvt.s32.f32 %v2119_v22 }
 0x235   : > { %v6066_v4 = vsel %vm1277_vm14, %v5611_v44, 128  ;;  %vm1278_vm15 = vcmp.eq.f32.partialorder %v5586_v1, %v1207_v51  ;;  %v6079_v23 = vcvt.s32.f32 %v2133_v46  ;;  %v7901_v51 = vld [vmem:[#allocation15_spill] sm:$0xff] }
 0x236   : > { %7896 = vst [vmem:[#allocation75_spill] sm:$0xff] %v6061_v62  ;;  %7898 = vst [vmem:[#allocation77_spill] sm:$0xff] %v6066_v4  ;;  %v2147_v34 = vshra.s32 %v6066_v4, 16  ;;  %v6071_v42 = vsel %vm1278_vm15, %v5611_v44, 128  ;;  %2122 = vmin.xlane.f32.xlu1 %v6061_v62  ;;  %2108 = vmin.xlane.f32.xlu0 %v6063_v10 }
 0x237   : > { %7899 = vst [vmem:[#allocation78_spill] sm:$0xff] %v6071_v42  ;;  %v1209_v20 = vpop.xlane.xlu1 %1208  ;;  %v2161_v22 = vshra.s32 %v6071_v42, 16 }
 0x238   : > { %vm1279_vm1 = vcmp.eq.f32.partialorder %v5590_v57, %v1209_v20  ;;  %v1211_v7 = vpop.xlane.xlu0 %1210  ;;  %v6077_v19 = vcvt.s32.f32 %v2147_v34  ;;  %v7902_v20 = vld [vmem:[#allocation16_spill] sm:$0xff] }
 0x239   : > { %v6082_v1 = vsel %vm1279_vm1, %v5611_v44, 128  ;;  %vm1280_vm2 = vcmp.eq.f32.partialorder %v7901_v51, %v1211_v7  ;;  %v6095_v10 = vcvt.s32.f32 %v2161_v22 }
 0x23a   : > { %7900 = vst [vmem:[#allocation79_spill] sm:$0xff] %v6077_v19  ;;  %v2175_v4 = vshra.s32 %v6082_v1, 16  ;;  %v6087_v62 = vsel %vm1280_vm2, %v5611_v44, 128  ;;  %2150 = vmin.xlane.f32.xlu1 %v6077_v19  ;;  %2136 = vmin.xlane.f32.xlu0 %v6079_v23 }
 0x23b   : > { %v1213_v57 = vpop.xlane.xlu1 %1212  ;;  %v2189_v34 = vshra.s32 %v6087_v62, 16  ;;  %7904 = vst [vmem:[#allocation16_spill] sm:$0xff] %v6095_v10 }
 0x23c   : > { %vm1281_vm3 = vcmp.eq.f32.partialorder %v7902_v20, %v1213_v57  ;;  %v1215_v46 = vpop.xlane.xlu0 %1214  ;;  %v6093_v42 = vcvt.s32.f32 %v2175_v4 }
 0x23d   : > { %v6098_v7 = vsel %vm1281_vm3, %v5611_v44, 128  ;;  %vm1282_vm4 = vcmp.eq.f32.partialorder %v5602_v5, %v1215_v46  ;;  %v6111_v20 = vcvt.s32.f32 %v2189_v34 }
 0x23e   : > { %7903 = vst [vmem:[#allocation15_spill] sm:$0xff] %v6093_v42  ;;  %7905 = vst [vmem:[#allocation80_spill] sm:$0xff] %v6098_v7  ;;  %v2203_v51 = vshra.s32 %v6098_v7, 16  ;;  %v6103_v19 = vsel %vm1282_vm4, %v5611_v44, 128  ;;  %2178 = vmin.xlane.f32.xlu1 %v6093_v42  ;;  %2164 = vmin.xlane.f32.xlu0 %v6095_v10 }
 0x23f   : > { %7906 = vst [vmem:[#allocation81_spill] sm:$0xff] %v6103_v19  ;;  %v1217_v57 = vpop.xlane.xlu1 %1216  ;;  %v2217_v4 = vshra.s32 %v6103_v19, 16  ;;  %7908 = vst [vmem:[#allocation83_spill] sm:$0xff] %v6111_v20 }
 0x240   : > { %vm1283_vm5 = vcmp.eq.f32.partialorder %v5606_v11, %v1217_v57  ;;  %v6109_v22 = vcvt.s32.f32 %v2203_v51  ;;  %v7912_v11 = vld [vmem:[#allocation18_spill] sm:$0xff]  ;;  %v1348_v51 = vand.u32 65535, %v5623_v56  ;;  %v7913_v57 = vld [vmem:[#allocation20_spill] sm:$0xff]  ;;  %v7916_v56 = vld [vmem:[#allocation21_spill] sm:$0xff] }
 0x241   : > { %v6114_v5 = vsel %vm1283_vm5, %v5611_v44, 128  ;;  %v6121_v10 = vcvt.s32.f32 %v2217_v4  ;;  %v1362_v34 = vand.u32 65535, %v7912_v11  ;;  %v1390_v44 = vand.u32 65535, %v7913_v57  ;;  %v7917_v57 = vld [vmem:[#allocation22_spill] sm:$0xff] }
 0x242   : > { %7907 = vst [vmem:[#allocation82_spill] sm:$0xff] %v6109_v22  ;;  %7909 = vst [vmem:[#allocation84_spill] sm:$0xff] %v6114_v5  ;;  %v2231_v46 = vshra.s32 %v6114_v5, 16  ;;  %2206 = vmin.xlane.f32.xlu1 %v6109_v22  ;;  %2192 = vmin.xlane.f32.xlu0 %v6111_v20  ;;  %v7915_v22 = vld [vmem:[#allocation19_spill] sm:$0xff]  ;;  %v1376_v4 = vand.u32 65535, %v5637_v38  ;;  %v1350_v11 = vcvt.s32.f32 %v1348_v51  ;;  %v1418_v38 = vand.u32 65535, %v5651_v48 }
 0x243   : > { %7911 = vst [vmem:[#allocation86_spill] sm:$0xff] %v6121_v10  ;;  %v1364_v5 = vcvt.s32.f32 %v1362_v34  ;;  %v7919_v51 = vld [vmem:[#allocation24_spill] sm:$0xff]  ;;  %v7920_v48 = vld [vmem:[#allocation25_spill] sm:$0xff] }
 0x244   : > { %v6119_v42 = vcvt.s32.f32 %v2231_v46 }
 0x246   : > { %7910 = vst [vmem:[#allocation85_spill] sm:$0xff] %v6119_v42  ;;  %2234 = vmin.xlane.f32.xlu1 %v6119_v42  ;;  %2220 = vmin.xlane.f32.xlu0 %v6121_v10  ;;  %v1392_v10 = vcvt.s32.f32 %v1390_v44 }
 0x253   : > { %v6128_v19 = vpop.xlane.xlu1 %1366 }
 0x254   : > { %7914 = vst [vmem:[#allocation18_spill] sm:$0xff] %v6128_v19  ;;  %vm1368_vm6 = vcmp.eq.f32.partialorder %v7915_v22, %v6128_v19  ;;  %v7918_v22 = vld [vmem:[#allocation23_spill] sm:$0xff]  ;;  %v1378_v19 = vcvt.s32.f32 %v1376_v4 }
 0x255   : > { %v1369_v46 = vsel %vm1368_vm6, %v1364_v5, inf  ;;  %v1404_v5 = vand.u32 65535, %v7918_v22 }
 0x256   : > { %1370 = vmin.xlane.f32.xlu1 %v1369_v46 }
 0x257   : > { %v6133_v20 = vpop.xlane.xlu1 %1394  ;;  %v6135_v42 = vpop.xlane.xlu0 %1352 }
 0x258   : > { %vm1396_vm7 = vcmp.eq.f32.partialorder %v7916_v56, %v6133_v20  ;;  %vm1354_vm8 = vcmp.eq.f32.partialorder %v7917_v57, %v6135_v42  ;;  %v1432_v56 = vand.u32 65535, %v7919_v51  ;;  %v1446_v57 = vand.u32 65535, %v5666_v25 }
 0x259   : > { %v1397_v34 = vsel %vm1396_vm7, %v1392_v10, inf  ;;  %v1355_v7 = vsel %vm1354_vm8, %v1350_v11, inf  ;;  %v1474_v25 = vand.u32 65535, %v5682_v55  ;;  %v1502_v55 = vand.u32 65535, %v5698_v61 }
 0x25a   : > { %1398 = vmin.xlane.f32.xlu1 %v1397_v34  ;;  %1356 = vmin.xlane.f32.xlu0 %v1355_v7  ;;  %v1420_v7 = vcvt.s32.f32 %v1418_v38  ;;  %v1406_v34 = vcvt.s32.f32 %v1404_v5  ;;  %v1448_v38 = vcvt.s32.f32 %v1446_v57  ;;  %v1434_v5 = vcvt.s32.f32 %v1432_v56 }
 0x25b   : > { %v6143_v46 = vpop.xlane.xlu0 %1380  ;;  %v1476_v57 = vcvt.s32.f32 %v1474_v25  ;;  %v1530_v61 = vand.u32 65535, %v5714_v3  ;;  %v1504_v25 = vcvt.s32.f32 %v1502_v55  ;;  %v1558_v3 = vand.u32 65535, %v5730_v9 }
 0x25c   : > { %vm1382_vm9 = vcmp.eq.f32.partialorder %v5647_v30, %v6143_v46  ;;  %v1586_v9 = vand.u32 65535, %v5746_v15  ;;  %v1614_v15 = vand.u32 65535, %v5762_v21  ;;  %v1642_v21 = vand.u32 65535, %v5778_v28 }
 0x25d   : > { %v1383_v44 = vsel %vm1382_vm9, %v1378_v19, inf  ;;  %v7921_v19 = vld [vmem:[#allocation26_spill] sm:$0xff]  ;;  %v1532_v55 = vcvt.s32.f32 %v1530_v61  ;;  %v1560_v61 = vcvt.s32.f32 %v1558_v3  ;;  %v1670_v28 = vand.u32 65535, %v5794_v37 }
 0x25e   : > { %1384 = vmin.xlane.f32.xlu0 %v1383_v44  ;;  %v1460_v22 = vand.u32 65535, %v7921_v19  ;;  %v1588_v3 = vcvt.s32.f32 %v1586_v9  ;;  %v1616_v9 = vcvt.s32.f32 %v1614_v15  ;;  %v1644_v15 = vcvt.s32.f32 %v1642_v21 }
 0x25f   : > { %v6149_v10 = vpop.xlane.xlu1 %1422  ;;  %v6151_v11 = vpop.xlane.xlu0 %1408  ;;  %v1698_v37 = vand.u32 65535, %v5810_v45  ;;  %v1672_v21 = vcvt.s32.f32 %v1670_v28  ;;  %v1726_v45 = vand.u32 65535, %v5826_v54  ;;  %v1754_v54 = vand.u32 65535, %v5842_v63 }
 0x260   : > { %vm1424_vm10 = vcmp.eq.f32.partialorder %v5660_v26, %v6149_v10  ;;  %vm1410_vm11 = vcmp.eq.f32.partialorder %v7920_v48, %v6151_v11  ;;  %v7922_v26 = vld [vmem:[#allocation27_spill] sm:$0xff]  ;;  %v7923_v48 = vld [vmem:[#allocation28_spill] sm:$0xff]  ;;  %v1462_v56 = vcvt.s32.f32 %v1460_v22  ;;  %v1782_v63 = vand.u32 65535, %v5858_v8 }
 0x261   : > { %v1425_v4 = vsel %vm1424_vm10, %v1420_v7, inf  ;;  %v1411_v30 = vsel %vm1410_vm11, %v1406_v34, inf  ;;  %v1700_v28 = vcvt.s32.f32 %v1698_v37  ;;  %v1728_v37 = vcvt.s32.f32 %v1726_v45 }
 0x262   : > { %1426 = vmin.xlane.f32.xlu1 %v1425_v4  ;;  %1412 = vmin.xlane.f32.xlu0 %v1411_v30  ;;  %v1488_v4 = vand.u32 65535, %v7923_v48  ;;  %v1756_v45 = vcvt.s32.f32 %v1754_v54  ;;  %v1810_v8 = vand.u32 65535, %v5874_v17  ;;  %v1784_v54 = vcvt.s32.f32 %v1782_v63 }
 0x263   : > { %v6159_v44 = vpop.xlane.xlu1 %1450  ;;  %v6161_v51 = vpop.xlane.xlu0 %1436  ;;  %v1838_v17 = vand.u32 65535, %v5890_v27  ;;  %v1866_v27 = vand.u32 65535, %v5906_v39  ;;  %v1894_v39 = vand.u32 65535, %v5922_v53  ;;  %v1922_v53 = vand.u32 65535, %v5938_v2 }
 0x264   : > { %vm1452_vm12 = vcmp.eq.f32.partialorder %v5676_v29, %v6159_v44  ;;  %vm1438_vm13 = vcmp.eq.f32.partialorder %v7922_v26, %v6161_v51  ;;  %v7924_v29 = vld [vmem:[#allocation29_spill] sm:$0xff]  ;;  %v7925_v26 = vld [vmem:[#allocation30_spill] sm:$0xff]  ;;  %v1490_v22 = vcvt.s32.f32 %v1488_v4  ;;  %v1812_v63 = vcvt.s32.f32 %v1810_v8 }
 0x265   : > { %v1453_v7 = vsel %vm1452_vm12, %v1448_v38, inf  ;;  %v1439_v34 = vsel %vm1438_vm13, %v1434_v5, inf  ;;  %v1840_v8 = vcvt.s32.f32 %v1838_v17  ;;  %v1868_v17 = vcvt.s32.f32 %v1866_v27 }
 0x266   : > { %1454 = vmin.xlane.f32.xlu1 %v1453_v7  ;;  %1440 = vmin.xlane.f32.xlu0 %v1439_v34  ;;  %v1516_v7 = vand.u32 65535, %v7925_v26  ;;  %v1896_v27 = vcvt.s32.f32 %v1894_v39  ;;  %v1950_v2 = vand.u32 65535, %v5954_v16  ;;  %v1924_v39 = vcvt.s32.f32 %v1922_v53 }
 0x267   : > { %v6169_v30 = vpop.xlane.xlu1 %1478  ;;  %v6171_v19 = vpop.xlane.xlu0 %1464  ;;  %v1978_v16 = vand.u32 65535, %v5970_v31 }
 0x268   : > { %vm1480_vm14 = vcmp.eq.f32.partialorder %v5692_v36, %v6169_v30  ;;  %vm1466_vm15 = vcmp.eq.f32.partialorder %v7924_v29, %v6171_v19  ;;  %v7926_v36 = vld [vmem:[#allocation31_spill] sm:$0xff]  ;;  %v7927_v29 = vld [vmem:[#allocation32_spill] sm:$0xff]  ;;  %v1518_v4 = vcvt.s32.f32 %v1516_v7  ;;  %v1952_v53 = vcvt.s32.f32 %v1950_v2 }
 0x269   : > { %v1481_v38 = vsel %vm1480_vm14, %v1476_v57, inf  ;;  %v1467_v5 = vsel %vm1466_vm15, %v1462_v56, inf  ;;  %v1980_v2 = vcvt.s32.f32 %v1978_v16 }
 0x26a   : > { %1482 = vmin.xlane.f32.xlu1 %v1481_v38  ;;  %1468 = vmin.xlane.f32.xlu0 %v1467_v5  ;;  %v1544_v38 = vand.u32 65535, %v7927_v29 }
 0x26b   : > { %v6179_v34 = vpop.xlane.xlu1 %1506  ;;  %v6181_v48 = vpop.xlane.xlu0 %1492 }
 0x26c   : > { %vm1508_vm1 = vcmp.eq.f32.partialorder %v5708_v52, %v6179_v34  ;;  %vm1494_vm2 = vcmp.eq.f32.partialorder %v7926_v36, %v6181_v48  ;;  %v7928_v52 = vld [vmem:[#allocation33_spill] sm:$0xff]  ;;  %v7929_v36 = vld [vmem:[#allocation34_spill] sm:$0xff]  ;;  %v1546_v7 = vcvt.s32.f32 %v1544_v38 }
 0x26d   : > { %v1509_v57 = vsel %vm1508_vm1, %v1504_v25, inf  ;;  %v1495_v56 = vsel %vm1494_vm2, %v1490_v22, inf }
 0x26e   : > { %1510 = vmin.xlane.f32.xlu1 %v1509_v57  ;;  %1496 = vmin.xlane.f32.xlu0 %v1495_v56  ;;  %v1572_v57 = vand.u32 65535, %v7929_v36 }
 0x26f   : > { %v6189_v5 = vpop.xlane.xlu1 %1534  ;;  %v6191_v26 = vpop.xlane.xlu0 %1520 }
 0x270   : > { %vm1536_vm3 = vcmp.eq.f32.partialorder %v5724_v58, %v6189_v5  ;;  %vm1522_vm4 = vcmp.eq.f32.partialorder %v7928_v52, %v6191_v26  ;;  %v7930_v58 = vld [vmem:[#allocation35_spill] sm:$0xff]  ;;  %v7931_v52 = vld [vmem:[#allocation36_spill] sm:$0xff]  ;;  %v1574_v38 = vcvt.s32.f32 %v1572_v57 }
 0x271   : > { %v1537_v25 = vsel %vm1536_vm3, %v1532_v55, inf  ;;  %v1523_v22 = vsel %vm1522_vm4, %v1518_v4, inf }
 0x272   : > { %1538 = vmin.xlane.f32.xlu1 %v1537_v25  ;;  %1524 = vmin.xlane.f32.xlu0 %v1523_v22  ;;  %v1600_v25 = vand.u32 65535, %v7931_v52 }
 0x273   : > { %v6199_v56 = vpop.xlane.xlu1 %1562  ;;  %v6201_v29 = vpop.xlane.xlu0 %1548 }
 0x274   : > { %vm1564_vm5 = vcmp.eq.f32.partialorder %v5740_v0, %v6199_v56  ;;  %vm1550_vm6 = vcmp.eq.f32.partialorder %v7930_v58, %v6201_v29  ;;  %v7932_v0 = vld [vmem:[#allocation37_spill] sm:$0xff]  ;;  %v7933_v58 = vld [vmem:[#allocation38_spill] sm:$0xff]  ;;  %v1602_v57 = vcvt.s32.f32 %v1600_v25 }
 0x275   : > { %v1565_v55 = vsel %vm1564_vm5, %v1560_v61, inf  ;;  %v1551_v4 = vsel %vm1550_vm6, %v1546_v7, inf }
 0x276   : > { %1566 = vmin.xlane.f32.xlu1 %v1565_v55  ;;  %1552 = vmin.xlane.f32.xlu0 %v1551_v4  ;;  %v1628_v55 = vand.u32 65535, %v7933_v58 }
 0x277   : > { %v6209_v22 = vpop.xlane.xlu1 %1590  ;;  %v6211_v36 = vpop.xlane.xlu0 %1576 }
 0x278   : > { %vm1592_vm7 = vcmp.eq.f32.partialorder %v5756_v6, %v6209_v22  ;;  %vm1578_vm8 = vcmp.eq.f32.partialorder %v7932_v0, %v6211_v36  ;;  %v7934_v6 = vld [vmem:[#allocation39_spill] sm:$0xff]  ;;  %v7935_v0 = vld [vmem:[#allocation40_spill] sm:$0xff]  ;;  %v1630_v25 = vcvt.s32.f32 %v1628_v55 }
 0x279   : > { %v1593_v61 = vsel %vm1592_vm7, %v1588_v3, inf  ;;  %v1579_v7 = vsel %vm1578_vm8, %v1574_v38, inf }
 0x27a   : > { %1594 = vmin.xlane.f32.xlu1 %v1593_v61  ;;  %1580 = vmin.xlane.f32.xlu0 %v1579_v7  ;;  %v1656_v61 = vand.u32 65535, %v7935_v0 }
 0x27b   : > { %v6219_v4 = vpop.xlane.xlu1 %1618  ;;  %v6221_v52 = vpop.xlane.xlu0 %1604 }
 0x27c   : > { %vm1620_vm9 = vcmp.eq.f32.partialorder %v5772_v12, %v6219_v4  ;;  %vm1606_vm10 = vcmp.eq.f32.partialorder %v7934_v6, %v6221_v52  ;;  %v7936_v12 = vld [vmem:[#allocation41_spill] sm:$0xff]  ;;  %v7937_v6 = vld [vmem:[#allocation42_spill] sm:$0xff]  ;;  %v1658_v55 = vcvt.s32.f32 %v1656_v61 }
 0x27d   : > { %v1621_v3 = vsel %vm1620_vm9, %v1616_v9, inf  ;;  %v1607_v38 = vsel %vm1606_vm10, %v1602_v57, inf }
 0x27e   : > { %1622 = vmin.xlane.f32.xlu1 %v1621_v3  ;;  %1608 = vmin.xlane.f32.xlu0 %v1607_v38  ;;  %v1684_v3 = vand.u32 65535, %v7937_v6 }
 0x27f   : > { %v6229_v7 = vpop.xlane.xlu1 %1646  ;;  %v6231_v58 = vpop.xlane.xlu0 %1632 }
 0x280   : > { %vm1648_vm11 = vcmp.eq.f32.partialorder %v5788_v18, %v6229_v7  ;;  %vm1634_vm12 = vcmp.eq.f32.partialorder %v7936_v12, %v6231_v58  ;;  %v7938_v18 = vld [vmem:[#allocation43_spill] sm:$0xff]  ;;  %v7939_v12 = vld [vmem:[#allocation44_spill] sm:$0xff]  ;;  %v1686_v61 = vcvt.s32.f32 %v1684_v3 }
 0x281   : > { %v1649_v9 = vsel %vm1648_vm11, %v1644_v15, inf  ;;  %v1635_v57 = vsel %vm1634_vm12, %v1630_v25, inf }
 0x282   : > { %1650 = vmin.xlane.f32.xlu1 %v1649_v9  ;;  %1636 = vmin.xlane.f32.xlu0 %v1635_v57  ;;  %v1712_v9 = vand.u32 65535, %v7939_v12 }
 0x283   : > { %v6239_v38 = vpop.xlane.xlu1 %1674  ;;  %v6241_v0 = vpop.xlane.xlu0 %1660 }
 0x284   : > { %vm1676_vm13 = vcmp.eq.f32.partialorder %v5804_v24, %v6239_v38  ;;  %vm1662_vm14 = vcmp.eq.f32.partialorder %v7938_v18, %v6241_v0  ;;  %v7940_v24 = vld [vmem:[#allocation45_spill] sm:$0xff]  ;;  %v7941_v18 = vld [vmem:[#allocation46_spill] sm:$0xff]  ;;  %v1714_v3 = vcvt.s32.f32 %v1712_v9 }
 0x285   : > { %v1677_v15 = vsel %vm1676_vm13, %v1672_v21, inf  ;;  %v1663_v25 = vsel %vm1662_vm14, %v1658_v55, inf }
 0x286   : > { %1678 = vmin.xlane.f32.xlu1 %v1677_v15  ;;  %1664 = vmin.xlane.f32.xlu0 %v1663_v25  ;;  %v1740_v15 = vand.u32 65535, %v7941_v18 }
 0x287   : > { %v6249_v57 = vpop.xlane.xlu1 %1702  ;;  %v6251_v6 = vpop.xlane.xlu0 %1688 }
 0x288   : > { %vm1704_vm15 = vcmp.eq.f32.partialorder %v5820_v32, %v6249_v57  ;;  %vm1690_vm1 = vcmp.eq.f32.partialorder %v7940_v24, %v6251_v6  ;;  %v7942_v32 = vld [vmem:[#allocation47_spill] sm:$0xff]  ;;  %v7943_v24 = vld [vmem:[#allocation48_spill] sm:$0xff]  ;;  %v1742_v9 = vcvt.s32.f32 %v1740_v15 }
 0x289   : > { %v1705_v21 = vsel %vm1704_vm15, %v1700_v28, inf  ;;  %v1691_v55 = vsel %vm1690_vm1, %v1686_v61, inf }
 0x28a   : > { %1706 = vmin.xlane.f32.xlu1 %v1705_v21  ;;  %1692 = vmin.xlane.f32.xlu0 %v1691_v55  ;;  %v1768_v21 = vand.u32 65535, %v7943_v24 }
 0x28b   : > { %v6259_v25 = vpop.xlane.xlu1 %1730  ;;  %v6261_v12 = vpop.xlane.xlu0 %1716 }
 0x28c   : > { %vm1732_vm2 = vcmp.eq.f32.partialorder %v5836_v40, %v6259_v25  ;;  %vm1718_vm3 = vcmp.eq.f32.partialorder %v7942_v32, %v6261_v12  ;;  %v7945_v40 = vld [vmem:[#allocation49_spill] sm:$0xff]  ;;  %v7946_v32 = vld [vmem:[#allocation50_spill] sm:$0xff]  ;;  %v1770_v15 = vcvt.s32.f32 %v1768_v21 }
 0x28d   : > { %v1733_v28 = vsel %vm1732_vm2, %v1728_v37, inf  ;;  %v1719_v61 = vsel %vm1718_vm3, %v1714_v3, inf }
 0x28e   : > { %1734 = vmin.xlane.f32.xlu1 %v1733_v28  ;;  %1720 = vmin.xlane.f32.xlu0 %v1719_v61  ;;  %v1796_v28 = vand.u32 65535, %v7946_v32 }
 0x28f   : > { %v6269_v55 = vpop.xlane.xlu1 %1758  ;;  %v6271_v18 = vpop.xlane.xlu0 %1744 }
 0x290   : > { %7944 = vst [vmem:[#allocation20_spill] sm:$0xff] %v6271_v18  ;;  %vm1760_vm4 = vcmp.eq.f32.partialorder %v5852_v50, %v6269_v55  ;;  %vm1746_vm5 = vcmp.eq.f32.partialorder %v7945_v40, %v6271_v18  ;;  %v7947_v50 = vld [vmem:[#allocation51_spill] sm:$0xff]  ;;  %v7948_v40 = vld [vmem:[#allocation52_spill] sm:$0xff]  ;;  %v1798_v21 = vcvt.s32.f32 %v1796_v28  ;;  %v7949_v18 = vld [vmem:[#allocation53_spill] sm:$0xff] }
 0x291   : > { %v1761_v37 = vsel %vm1760_vm4, %v1756_v45, inf  ;;  %v1747_v3 = vsel %vm1746_vm5, %v1742_v9, inf }
 0x292   : > { %1762 = vmin.xlane.f32.xlu1 %v1761_v37  ;;  %1748 = vmin.xlane.f32.xlu0 %v1747_v3  ;;  %v1824_v37 = vand.u32 65535, %v7948_v40  ;;  %v7951_v40 = vld [vmem:[#allocation55_spill] sm:$0xff] }
 0x293   : > { %v6279_v61 = vpop.xlane.xlu1 %1786  ;;  %v6281_v24 = vpop.xlane.xlu0 %1772 }
 0x294   : > { %vm1788_vm6 = vcmp.eq.f32.partialorder %v5868_v59, %v6279_v61  ;;  %vm1774_vm7 = vcmp.eq.f32.partialorder %v7947_v50, %v6281_v24  ;;  %v1826_v28 = vcvt.s32.f32 %v1824_v37 }
 0x295   : > { %v1789_v45 = vsel %vm1788_vm6, %v1784_v54, inf  ;;  %v1775_v9 = vsel %vm1774_vm7, %v1770_v15, inf  ;;  %v7950_v15 = vld [vmem:[#allocation54_spill] sm:$0xff] }
 0x296   : > { %1790 = vmin.xlane.f32.xlu1 %v1789_v45  ;;  %1776 = vmin.xlane.f32.xlu0 %v1775_v9  ;;  %v1852_v50 = vand.u32 65535, %v7950_v15  ;;  %v7953_v15 = vld [vmem:[#allocation57_spill] sm:$0xff] }
 0x297   : > { %v6289_v3 = vpop.xlane.xlu1 %1814  ;;  %v6291_v32 = vpop.xlane.xlu0 %1800 }
 0x298   : > { %vm1816_vm8 = vcmp.eq.f32.partialorder %v7949_v18, %v6289_v3  ;;  %vm1802_vm9 = vcmp.eq.f32.partialorder %v5887_v14, %v6291_v32  ;;  %v1854_v37 = vcvt.s32.f32 %v1852_v50 }
 0x299   : > { %v1817_v59 = vsel %vm1816_vm8, %v1812_v63, inf  ;;  %v1803_v54 = vsel %vm1802_vm9, %v1798_v21, inf  ;;  %v7952_v63 = vld [vmem:[#allocation56_spill] sm:$0xff] }
 0x29a   : > { %1818 = vmin.xlane.f32.xlu1 %v1817_v59  ;;  %1804 = vmin.xlane.f32.xlu0 %v1803_v54  ;;  %v1880_v21 = vand.u32 65535, %v7952_v63  ;;  %v7955_v63 = vld [vmem:[#allocation59_spill] sm:$0xff] }
 0x29b   : > { %v6299_v45 = vpop.xlane.xlu1 %1842  ;;  %v6301_v9 = vpop.xlane.xlu0 %1828 }
 0x29c   : > { %vm1844_vm10 = vcmp.eq.f32.partialorder %v7951_v40, %v6299_v45  ;;  %vm1830_vm11 = vcmp.eq.f32.partialorder %v5903_v35, %v6301_v9  ;;  %v1882_v50 = vcvt.s32.f32 %v1880_v21 }
 0x29d   : > { %v1845_v14 = vsel %vm1844_vm10, %v1840_v8, inf  ;;  %v1831_v18 = vsel %vm1830_vm11, %v1826_v28, inf  ;;  %v7954_v28 = vld [vmem:[#allocation58_spill] sm:$0xff] }
 0x29e   : > { %1846 = vmin.xlane.f32.xlu1 %v1845_v14  ;;  %1832 = vmin.xlane.f32.xlu0 %v1831_v18  ;;  %v1908_v40 = vand.u32 65535, %v7954_v28  ;;  %v7958_v28 = vld [vmem:[#allocation61_spill] sm:$0xff] }
 0x29f   : > { %v6309_v59 = vpop.xlane.xlu1 %1870  ;;  %v6311_v54 = vpop.xlane.xlu0 %1856 }
 0x2a0   : > { %vm1872_vm12 = vcmp.eq.f32.partialorder %v7953_v15, %v6309_v59  ;;  %vm1858_vm13 = vcmp.eq.f32.partialorder %v5919_v43, %v6311_v54  ;;  %v1910_v21 = vcvt.s32.f32 %v1908_v40 }
 0x2a1   : > { %v1873_v35 = vsel %vm1872_vm12, %v1868_v17, inf  ;;  %v1859_v8 = vsel %vm1858_vm13, %v1854_v37, inf  ;;  %v7956_v37 = vld [vmem:[#allocation60_spill] sm:$0xff] }
 0x2a2   : > { %1874 = vmin.xlane.f32.xlu1 %v1873_v35  ;;  %1860 = vmin.xlane.f32.xlu0 %v1859_v8  ;;  %v1936_v15 = vand.u32 65535, %v7956_v37  ;;  %v7962_v37 = vld [vmem:[#allocation63_spill] sm:$0xff] }
 0x2a3   : > { %v6319_v14 = vpop.xlane.xlu1 %1898  ;;  %v6321_v18 = vpop.xlane.xlu0 %1884 }
 0x2a4   : > { %vm1900_vm14 = vcmp.eq.f32.partialorder %v7955_v63, %v6319_v14  ;;  %vm1886_vm15 = vcmp.eq.f32.partialorder %v5935_v41, %v6321_v18  ;;  %v1938_v40 = vcvt.s32.f32 %v1936_v15 }
 0x2a5   : > { %v1901_v43 = vsel %vm1900_vm14, %v1896_v27, inf  ;;  %v1887_v17 = vsel %vm1886_vm15, %v1882_v50, inf  ;;  %v7959_v50 = vld [vmem:[#allocation62_spill] sm:$0xff] }
 0x2a6   : > { %1902 = vmin.xlane.f32.xlu1 %v1901_v43  ;;  %1888 = vmin.xlane.f32.xlu0 %v1887_v17  ;;  %v1964_v63 = vand.u32 65535, %v7959_v50 }
 0x2a7   : > { %v6329_v35 = vpop.xlane.xlu1 %1926  ;;  %v6331_v8 = vpop.xlane.xlu0 %1912 }
 0x2a8   : > { %7957 = vst [vmem:[#allocation19_spill] sm:$0xff] %v6331_v8  ;;  %vm1928_vm1 = vcmp.eq.f32.partialorder %v7958_v28, %v6329_v35  ;;  %vm1914_vm2 = vcmp.eq.f32.partialorder %v5951_v13, %v6331_v8  ;;  %v1966_v15 = vcvt.s32.f32 %v1964_v63  ;;  %v7967_v8 = vld [vmem:[#allocation65_spill] sm:$0xff] }
 0x2a9   : > { %v1929_v41 = vsel %vm1928_vm1, %v1924_v39, inf  ;;  %v1915_v27 = vsel %vm1914_vm2, %v1910_v21, inf  ;;  %v7963_v21 = vld [vmem:[#allocation64_spill] sm:$0xff] }
 0x2aa   : > { %1930 = vmin.xlane.f32.xlu1 %v1929_v41  ;;  %1916 = vmin.xlane.f32.xlu0 %v1915_v27  ;;  %v1992_v28 = vand.u32 65535, %v7963_v21  ;;  %v7964_v41 = vld [vmem:[#allocation67_spill] sm:$0xff] }
 0x2ab   : > { %v6339_v43 = vpop.xlane.xlu1 %1954  ;;  %v6341_v17 = vpop.xlane.xlu0 %1940  ;;  %v2006_v31 = vand.u32 65535, %v7964_v41 }
 0x2ac   : > { %7960 = vst [vmem:[#allocation21_spill] sm:$0xff] %v6339_v43  ;;  %7961 = vst [vmem:[#allocation22_spill] sm:$0xff] %v6341_v17  ;;  %vm1956_vm3 = vcmp.eq.f32.partialorder %v7962_v37, %v6339_v43  ;;  %vm1942_vm4 = vcmp.eq.f32.partialorder %v5967_v33, %v6341_v17  ;;  %v7968_v37 = vld [vmem:[#allocation66_spill] sm:$0xff]  ;;  %v1994_v63 = vcvt.s32.f32 %v1992_v28  ;;  %v7973_v43 = vld [vmem:[#allocation69_spill] sm:$0xff] }
 0x2ad   : > { %v1957_v13 = vsel %vm1956_vm3, %v1952_v53, inf  ;;  %v1943_v39 = vsel %vm1942_vm4, %v1938_v40, inf  ;;  %v7969_v40 = vld [vmem:[#allocation68_spill] sm:$0xff]  ;;  %v2008_v16 = vcvt.s32.f32 %v2006_v31 }
 0x2ae   : > { %1958 = vmin.xlane.f32.xlu1 %v1957_v13  ;;  %1944 = vmin.xlane.f32.xlu0 %v1943_v39  ;;  %v2020_v13 = vand.u32 65535, %v7969_v40  ;;  %v7970_v39 = vld [vmem:[#allocation71_spill] sm:$0xff] }
 0x2af   : > { %v6349_v27 = vpop.xlane.xlu1 %1982  ;;  %v6351_v50 = vpop.xlane.xlu0 %1968  ;;  %v2034_v21 = vand.u32 65535, %v7970_v39 }
 0x2b0   : > { %7965 = vst [vmem:[#allocation23_spill] sm:$0xff] %v6349_v27  ;;  %7966 = vst [vmem:[#allocation24_spill] sm:$0xff] %v6351_v50  ;;  %vm1984_vm5 = vcmp.eq.f32.partialorder %v7967_v8, %v6349_v27  ;;  %vm1970_vm6 = vcmp.eq.f32.partialorder %v7968_v37, %v6351_v50  ;;  %v7974_v8 = vld [vmem:[#allocation70_spill] sm:$0xff]  ;;  %v7975_v37 = vld [vmem:[#allocation8_spill] sm:$0xff]  ;;  %v2022_v28 = vcvt.s32.f32 %v2020_v13 }
 0x2b1   : > { %v1985_v33 = vsel %vm1984_vm5, %v1980_v2, inf  ;;  %v1971_v53 = vsel %vm1970_vm6, %v1966_v15, inf  ;;  %v2036_v31 = vcvt.s32.f32 %v2034_v21  ;;  %v7977_v27 = vld [vmem:[#allocation9_spill] sm:$0xff] }
 0x2b2   : > { %1986 = vmin.xlane.f32.xlu1 %v1985_v33  ;;  %1972 = vmin.xlane.f32.xlu0 %v1971_v53  ;;  %v2048_v33 = vand.u32 65535, %v7975_v37  ;;  %v7976_v53 = vld [vmem:[#allocation73_spill] sm:$0xff] }
 0x2b3   : > { %v6359_v41 = vpop.xlane.xlu1 %2010  ;;  %v6361_v17 = vpop.xlane.xlu0 %1996  ;;  %v2062_v40 = vand.u32 65535, %v7976_v53 }
 0x2b4   : > { %7971 = vst [vmem:[#allocation25_spill] sm:$0xff] %v6359_v41  ;;  %7972 = vst [vmem:[#allocation26_spill] sm:$0xff] %v6361_v17  ;;  %vm2012_vm7 = vcmp.eq.f32.partialorder %v7973_v43, %v6359_v41  ;;  %vm1998_vm8 = vcmp.eq.f32.partialorder %v7974_v8, %v6361_v17  ;;  %v7978_v43 = vld [vmem:[#allocation72_spill] sm:$0xff]  ;;  %v7979_v8 = vld [vmem:[#allocation10_spill] sm:$0xff]  ;;  %v2050_v13 = vcvt.s32.f32 %v2048_v33 }
 0x2b5   : > { %v2013_v2 = vsel %vm2012_vm7, %v2008_v16, inf  ;;  %v1999_v15 = vsel %vm1998_vm8, %v1994_v63, inf  ;;  %v2064_v21 = vcvt.s32.f32 %v2062_v40  ;;  %v7982_v41 = vld [vmem:[#allocation11_spill] sm:$0xff] }
 0x2b6   : > { %2014 = vmin.xlane.f32.xlu1 %v2013_v2  ;;  %2000 = vmin.xlane.f32.xlu0 %v1999_v15  ;;  %v2076_v2 = vand.u32 65535, %v7979_v8  ;;  %v7980_v15 = vld [vmem:[#allocation74_spill] sm:$0xff] }
 0x2b7   : > { %v6369_v39 = vpop.xlane.xlu1 %2038  ;;  %v6371_v50 = vpop.xlane.xlu0 %2024  ;;  %v2090_v37 = vand.u32 65535, %v7980_v15  ;;  %v7985_v15 = vld [vmem:[#allocation13_spill] sm:$0xff] }
 0x2b8   : > { %vm2040_vm9 = vcmp.eq.f32.partialorder %v7977_v27, %v6369_v39  ;;  %vm2026_vm10 = vcmp.eq.f32.partialorder %v7978_v43, %v6371_v50  ;;  %v2078_v33 = vcvt.s32.f32 %v2076_v2 }
 0x2b9   : > { %v2041_v16 = vsel %vm2040_vm9, %v2036_v31, inf  ;;  %v2027_v63 = vsel %vm2026_vm10, %v2022_v28, inf  ;;  %v7983_v28 = vld [vmem:[#allocation12_spill] sm:$0xff]  ;;  %v2092_v40 = vcvt.s32.f32 %v2090_v37 }
 0x2ba   : > { %2042 = vmin.xlane.f32.xlu1 %v2041_v16  ;;  %2028 = vmin.xlane.f32.xlu0 %v2027_v63  ;;  %v2104_v43 = vand.u32 65535, %v7983_v28  ;;  %v2118_v16 = vand.u32 65535, %v6050_v49 }
 0x2bb   : > { %v6379_v53 = vpop.xlane.xlu1 %2066  ;;  %v6381_v17 = vpop.xlane.xlu0 %2052 }
 0x2bc   : > { %7981 = vst [vmem:[#allocation27_spill] sm:$0xff] %v6381_v17  ;;  %vm2068_vm11 = vcmp.eq.f32.partialorder %v7982_v41, %v6379_v53  ;;  %vm2054_vm12 = vcmp.eq.f32.partialorder %v6031_v60, %v6381_v17  ;;  %v2120_v37 = vcvt.s32.f32 %v2118_v16  ;;  %v2106_v2 = vcvt.s32.f32 %v2104_v43  ;;  %v7988_v17 = vld [vmem:[#allocation75_spill] sm:$0xff] }
 0x2bd   : > { %v2069_v27 = vsel %vm2068_vm11, %v2064_v21, inf  ;;  %v2055_v31 = vsel %vm2054_vm12, %v2050_v13, inf  ;;  %v7986_v21 = vld [vmem:[#allocation14_spill] sm:$0xff] }
 0x2be   : > { %2070 = vmin.xlane.f32.xlu1 %v2069_v27  ;;  %2056 = vmin.xlane.f32.xlu0 %v2055_v31  ;;  %v2132_v13 = vand.u32 65535, %v7986_v21  ;;  %v7987_v27 = vld [vmem:[#allocation77_spill] sm:$0xff] }
 0x2bf   : > { %v6389_v63 = vpop.xlane.xlu1 %2094  ;;  %v6391_v8 = vpop.xlane.xlu0 %2080  ;;  %v2146_v49 = vand.u32 65535, %v7987_v27 }
 0x2c0   : > { %7984 = vst [vmem:[#allocation28_spill] sm:$0xff] %v6391_v8  ;;  %vm2096_vm13 = vcmp.eq.f32.partialorder %v7985_v15, %v6389_v63  ;;  %vm2082_vm14 = vcmp.eq.f32.partialorder %v6047_v47, %v6391_v8  ;;  %v7989_v15 = vld [vmem:[#allocation76_spill] sm:$0xff]  ;;  %v2134_v43 = vcvt.s32.f32 %v2132_v13  ;;  %v7993_v8 = vld [vmem:[#allocation79_spill] sm:$0xff] }
 0x2c1   : > { %v2097_v60 = vsel %vm2096_vm13, %v2092_v40, inf  ;;  %v2083_v41 = vsel %vm2082_vm14, %v2078_v33, inf  ;;  %v7990_v33 = vld [vmem:[#allocation78_spill] sm:$0xff]  ;;  %v2148_v16 = vcvt.s32.f32 %v2146_v49 }
 0x2c2   : > { %2098 = vmin.xlane.f32.xlu1 %v2097_v60  ;;  %2084 = vmin.xlane.f32.xlu0 %v2083_v41  ;;  %v2160_v60 = vand.u32 65535, %v7990_v33  ;;  %v2174_v41 = vand.u32 65535, %v6082_v1  ;;  %v7996_v33 = vld [vmem:[#allocation15_spill] sm:$0xff] }
 0x2c3   : > { %v6399_v31 = vpop.xlane.xlu1 %2122  ;;  %v6401_v28 = vpop.xlane.xlu0 %2108 }
 0x2c4   : > { %vm2124_vm15 = vcmp.eq.f32.partialorder %v7988_v17, %v6399_v31  ;;  %vm2110_vm1 = vcmp.eq.f32.partialorder %v7989_v15, %v6401_v28  ;;  %v7994_v15 = vld [vmem:[#allocation80_spill] sm:$0xff]  ;;  %v2176_v49 = vcvt.s32.f32 %v2174_v41  ;;  %v2162_v13 = vcvt.s32.f32 %v2160_v60 }
 0x2c5   : > { %v2125_v47 = vsel %vm2124_vm15, %v2120_v37, inf  ;;  %v2111_v40 = vsel %vm2110_vm1, %v2106_v2, inf  ;;  %v2188_v2 = vand.u32 65535, %v6087_v62  ;;  %v2202_v1 = vand.u32 65535, %v7994_v15 }
 0x2c6   : > { %2126 = vmin.xlane.f32.xlu1 %v2125_v47  ;;  %2112 = vmin.xlane.f32.xlu0 %v2111_v40 }
 0x2c7   : > { %v6409_v21 = vpop.xlane.xlu1 %2150  ;;  %v6411_v27 = vpop.xlane.xlu0 %2136  ;;  %v2204_v41 = vcvt.s32.f32 %v2202_v1  ;;  %v2190_v60 = vcvt.s32.f32 %v2188_v2  ;;  %v8006_v2 = vld [vmem:[#allocation86_spill] sm:$0xff] }
 0x2c8   : > { %7991 = vst [vmem:[#allocation29_spill] sm:$0xff] %v6409_v21  ;;  %7992 = vst [vmem:[#allocation30_spill] sm:$0xff] %v6411_v27  ;;  %vm2152_vm2 = vcmp.eq.f32.partialorder %v7993_v8, %v6409_v21  ;;  %vm2138_vm3 = vcmp.eq.f32.partialorder %v6079_v23, %v6411_v27  ;;  %v7997_v8 = vld [vmem:[#allocation16_spill] sm:$0xff]  ;;  %v8002_v21 = vld [vmem:[#allocation82_spill] sm:$0xff] }
 0x2c9   : > { %v2153_v17 = vsel %vm2152_vm2, %v2148_v16, inf  ;;  %v2139_v37 = vsel %vm2138_vm3, %v2134_v43, inf  ;;  %v7998_v43 = vld [vmem:[#allocation81_spill] sm:$0xff] }
 0x2ca   : > { %2154 = vmin.xlane.f32.xlu1 %v2153_v17  ;;  %2140 = vmin.xlane.f32.xlu0 %v2139_v37  ;;  %v2216_v62 = vand.u32 65535, %v7998_v43  ;;  %v7999_v17 = vld [vmem:[#allocation84_spill] sm:$0xff] }
 0x2cb   : > { %v6419_v47 = vpop.xlane.xlu1 %2178  ;;  %v6421_v40 = vpop.xlane.xlu0 %2164  ;;  %v2230_v37 = vand.u32 65535, %v7999_v17  ;;  %v8005_v17 = vld [vmem:[#allocation85_spill] sm:$0xff] }
 0x2cc   : > { %7995 = vst [vmem:[#allocation31_spill] sm:$0xff] %v6421_v40  ;;  %vm2180_vm4 = vcmp.eq.f32.partialorder %v7996_v33, %v6419_v47  ;;  %vm2166_vm5 = vcmp.eq.f32.partialorder %v7997_v8, %v6421_v40  ;;  %v8003_v33 = vld [vmem:[#allocation83_spill] sm:$0xff]  ;;  %v2218_v43 = vcvt.s32.f32 %v2216_v62 }
 0x2cd   : > { %v2181_v23 = vsel %vm2180_vm4, %v2176_v49, inf  ;;  %v2167_v16 = vsel %vm2166_vm5, %v2162_v13, inf }
 0x2ce   : > { %2182 = vmin.xlane.f32.xlu1 %v2181_v23  ;;  %2168 = vmin.xlane.f32.xlu0 %v2167_v16  ;;  %v2232_v16 = vcvt.s32.f32 %v2230_v37  ;;  %v1401_v37 = vcvt.f32.s32 %v6133_v20  ;;  %v8008_v20 = vld [vmem:[#allocation17_spill] sm:$0xff] }
 0x2cf   : > { %v6429_v15 = vpop.xlane.xlu1 %2206  ;;  %v6431_v27 = vpop.xlane.xlu0 %2192 }
 0x2d0   : > { %8000 = vst [vmem:[#allocation32_spill] sm:$0xff] %v6429_v15  ;;  %8001 = vst [vmem:[#allocation33_spill] sm:$0xff] %v6431_v27  ;;  %vm2208_vm6 = vcmp.eq.f32.partialorder %v8002_v21, %v6429_v15  ;;  %vm2194_vm7 = vcmp.eq.f32.partialorder %v8003_v33, %v6431_v27 }
 0x2d1   : > { %v2209_v49 = vsel %vm2208_vm6, %v2204_v41, inf  ;;  %v2195_v13 = vsel %vm2194_vm7, %v2190_v60, inf  ;;  %v8007_v41 = vld [vmem:[#allocation18_spill] sm:$0xff] }
 0x2d2   : > { %2210 = vmin.xlane.f32.xlu1 %v2209_v49  ;;  %2196 = vmin.xlane.f32.xlu0 %v2195_v13  ;;  %v1373_v60 = vcvt.f32.s32 %v8007_v41  ;;  %v1359_v49 = vcvt.f32.s32 %v6135_v42 }
 0x2d3   : > { %v6437_v8 = vpop.xlane.xlu1 %2234  ;;  %v6439_v23 = vpop.xlane.xlu0 %2220 }
 0x2d4   : > { %8004 = vst [vmem:[#allocation34_spill] sm:$0xff] %v6437_v8  ;;  %vm2236_vm8 = vcmp.eq.f32.partialorder %v8005_v17, %v6437_v8  ;;  %vm2222_vm9 = vcmp.eq.f32.partialorder %v8006_v2, %v6439_v23  ;;  %v1374_v27 = vshll.u32 %v1373_v60, 16  ;;  %v1360_v40 = vshll.u32 %v1359_v49, 16 }
 0x2d5   : > { %v2237_v21 = vsel %vm2236_vm8, %v2232_v16, inf  ;;  %v2223_v1 = vsel %vm2222_vm9, %v2218_v43, inf  ;;  %v1387_v17 = vcvt.f32.s32 %v6143_v46  ;;  %v1415_v60 = vcvt.f32.s32 %v6151_v11 }
 0x2d6   : > { %2238 = vmin.xlane.f32.xlu1 %v2237_v21  ;;  %2224 = vmin.xlane.f32.xlu0 %v2223_v1  ;;  %v1402_v21 = vshll.u32 %v1401_v37, 16  ;;  %v1429_v1 = vcvt.f32.s32 %v6149_v10  ;;  %v5041_v46 = vmov 1.0  }
 0x2d7   : > { %v1388_v42 = vshll.u32 %v1387_v17, 16 }
 0x2d8   : > { %v1430_v11 = vshll.u32 %v1429_v1, 16  ;;  %v1471_v1 = vcvt.f32.s32 %v6171_v19 }
 0x2e3   : > { %v1371_v33 = vpop.xlane.xlu1 %1370 }
 0x2e4   : > { %v1372_v13 = vcvt.f32.s32 %v1371_v33 }
 0x2e6   : > { %v6449_v2 = vadd.s32 %v1374_v27, %v1372_v13  ;;  %v1457_v27 = vcvt.f32.s32 %v6159_v44  ;;  %v1416_v13 = vshll.u32 %v1415_v60, 16 }
 0x2e7   : > { %v1399_v62 = vpop.xlane.xlu1 %1398  ;;  %v1357_v15 = vpop.xlane.xlu0 %1356 }
 0x2e8   : > { %v1358_v8 = vcvt.f32.s32 %v1357_v15  ;;  %v1400_v16 = vcvt.f32.s32 %v1399_v62  ;;  %vm2245_vm11 = vcmp.eq.s32.totalorder %v8008_v20, %v6449_v2 }
 0x2ea   : > { %v6451_v43 = vadd.s32 %v1360_v40, %v1358_v8  ;;  %v6457_v49 = vadd.s32 %v1402_v21, %v1400_v16  ;;  %v1443_v40 = vcvt.f32.s32 %v6161_v51  ;;  %v1458_v51 = vshll.u32 %v1457_v27, 16 }
 0x2eb   : > { %v1385_v41 = vpop.xlane.xlu0 %1384  ;;  %v1485_v21 = vcvt.f32.s32 %v6169_v30  ;;  %v1472_v27 = vshll.u32 %v1471_v1, 16  ;;  %v1527_v1 = vcvt.f32.s32 %v6191_v26 }
 0x2ec   : > { %v1386_v33 = vcvt.f32.s32 %v1385_v41  ;;  %vm2244_vm10 = vcmp.eq.s32.totalorder %v8008_v20, %v6451_v43  ;;  %vm2247_vm13 = vcmp.eq.s32.totalorder %v8008_v20, %v6457_v49  ;;  %v1444_v16 = vshll.u32 %v1443_v40, 16 }
 0x2ed   : > { %4584 = vmatprep.mubr.msk.f32.mxu1 %vm2244_vm10, %v5041_v46  ;;  %v1486_v19 = vshll.u32 %v1485_v21, 16  ;;  %v1513_v40 = vcvt.f32.s32 %v6179_v34  ;;  %v1541_v21 = vcvt.f32.s32 %v6189_v5 }
 0x2ee   : > { %v6465_v10 = vadd.s32 %v1388_v42, %v1386_v33  ;;  %4585 = vmatmul.mubr.msk.f32.vlgmr.msra.gmra.mrb[0].mxu1 %vm2245_vm11, %v5041_v46 }
 0x2ef   : > { %v1427_v15 = vpop.xlane.xlu1 %1426  ;;  %v1413_v8 = vpop.xlane.xlu0 %1412  ;;  %v1542_v26 = vshll.u32 %v1541_v21, 16  ;;  %v1597_v21 = vcvt.f32.s32 %v6209_v22 }
 0x2f0   : > { %v1428_v37 = vcvt.f32.s32 %v1427_v15  ;;  %v1414_v62 = vcvt.f32.s32 %v1413_v8  ;;  %vm2246_vm12 = vcmp.eq.s32.totalorder %v8008_v20, %v6465_v10  ;;  %v1499_v15 = vcvt.f32.s32 %v6181_v48 }
 0x2f1   : > { %4587 = vmatprep.mubr.msk.f32.mxu1 %vm2246_vm12, %v5041_v46  ;;  %v1514_v48 = vshll.u32 %v1513_v40, 16  ;;  %v1569_v40 = vcvt.f32.s32 %v6199_v56 }
 0x2f2   : > { %v6481_v17 = vadd.s32 %v1430_v11, %v1428_v37  ;;  %v6483_v44 = vadd.s32 %v1416_v13, %v1414_v62  ;;  %4588 = vmatmul.mubr.msk.f32.gmra.mrb[2].mxu1 %vm2247_vm13, %v5041_v46 }
 0x2f3   : > { %v1455_v41 = vpop.xlane.xlu1 %1454  ;;  %v1441_v42 = vpop.xlane.xlu0 %1440 }
 0x2f4   : > { %v1456_v60 = vcvt.f32.s32 %v1455_v41  ;;  %v1442_v33 = vcvt.f32.s32 %v1441_v42  ;;  %vm2248_vm14 = vcmp.eq.s32.totalorder %v8008_v20, %v6483_v44  ;;  %vm2249_vm15 = vcmp.eq.s32.totalorder %v8008_v20, %v6481_v17 }
 0x2f5   : > { %4590 = vmatprep.mubr.msk.f32.mxu1 %vm2248_vm14, %v5041_v46 }
 0x2f6   : > { %v6499_v11 = vadd.s32 %v1458_v51, %v1456_v60  ;;  %v6501_v30 = vadd.s32 %v1444_v16, %v1442_v33  ;;  %4591 = vmatmul.mubr.msk.f32.gmra.mrb[4].mxu1 %vm2249_vm15, %v5041_v46  ;;  %v1500_v16 = vshll.u32 %v1499_v15, 16  ;;  %v1555_v15 = vcvt.f32.s32 %v6201_v29 }
 0x2f7   : > { %v1483_v8 = vpop.xlane.xlu1 %1482  ;;  %v1469_v13 = vpop.xlane.xlu0 %1468  ;;  %v1570_v29 = vshll.u32 %v1569_v40, 16 }
 0x2f8   : > { %v1484_v37 = vcvt.f32.s32 %v1483_v8  ;;  %v1470_v62 = vcvt.f32.s32 %v1469_v13  ;;  %vm2250_vm1 = vcmp.eq.s32.totalorder %v8008_v20, %v6501_v30  ;;  %vm2251_vm2 = vcmp.eq.s32.totalorder %v8008_v20, %v6499_v11 }
 0x2f9   : > { %4593 = vmatprep.mubr.msk.f32.mxu1 %vm2250_vm1, %v5041_v46 }
 0x2fa   : > { %v6517_v51 = vadd.s32 %v1486_v19, %v1484_v37  ;;  %v6519_v34 = vadd.s32 %v1472_v27, %v1470_v62  ;;  %4594 = vmatmul.mubr.msk.f32.gmra.mrb[6].mxu1 %vm2251_vm2, %v5041_v46  ;;  %v1528_v27 = vshll.u32 %v1527_v1, 16  ;;  %v1583_v1 = vcvt.f32.s32 %v6211_v36 }
 0x2fb   : > { %v1511_v41 = vpop.xlane.xlu1 %1510  ;;  %v1497_v42 = vpop.xlane.xlu0 %1496 }
 0x2fc   : > { %v1512_v60 = vcvt.f32.s32 %v1511_v41  ;;  %v1498_v33 = vcvt.f32.s32 %v1497_v42  ;;  %vm2252_vm3 = vcmp.eq.s32.totalorder %v8008_v20, %v6519_v34  ;;  %vm2253_vm4 = vcmp.eq.s32.totalorder %v8008_v20, %v6517_v51 }
 0x2fd   : > { %4596 = vmatprep.mubr.msk.f32.mxu1 %vm2252_vm3, %v5041_v46  ;;  %v1584_v40 = vshll.u32 %v1583_v1, 16  ;;  %v1639_v1 = vcvt.f32.s32 %v6231_v58 }
 0x2fe   : > { %v6535_v19 = vadd.s32 %v1514_v48, %v1512_v60  ;;  %v6537_v5 = vadd.s32 %v1500_v16, %v1498_v33  ;;  %4597 = vmatmul.mubr.msk.f32.gmra.mrb[8].mxu1 %vm2253_vm4, %v5041_v46  ;;  %v1556_v16 = vshll.u32 %v1555_v15, 16  ;;  %v1611_v15 = vcvt.f32.s32 %v6221_v52 }
 0x2ff   : > { %v1539_v8 = vpop.xlane.xlu1 %1538  ;;  %v1525_v13 = vpop.xlane.xlu0 %1524 }
 0x300   : > { %v1540_v37 = vcvt.f32.s32 %v1539_v8  ;;  %v1526_v62 = vcvt.f32.s32 %v1525_v13  ;;  %vm2254_vm5 = vcmp.eq.s32.totalorder %v8008_v20, %v6537_v5  ;;  %vm2255_vm6 = vcmp.eq.s32.totalorder %v8008_v20, %v6535_v19 }
 0x301   : > { %4599 = vmatprep.mubr.msk.f32.mxu1 %vm2254_vm5, %v5041_v46  ;;  %v1612_v52 = vshll.u32 %v1611_v15, 16  ;;  %v1681_v15 = vcvt.f32.s32 %v6239_v38 }
 0x302   : > { %v6553_v48 = vadd.s32 %v1542_v26, %v1540_v37  ;;  %v6555_v56 = vadd.s32 %v1528_v27, %v1526_v62  ;;  %4600 = vmatmul.mubr.msk.f32.gmra.mrb[10].mxu1 %vm2255_vm6, %v5041_v46  ;;  %v1625_v26 = vcvt.f32.s32 %v6219_v4  ;;  %v1598_v27 = vshll.u32 %v1597_v21, 16 }
 0x303   : > { %v1567_v41 = vpop.xlane.xlu1 %1566  ;;  %v1553_v42 = vpop.xlane.xlu0 %1552  ;;  %v1653_v21 = vcvt.f32.s32 %v6229_v7  ;;  %v1682_v38 = vshll.u32 %v1681_v15, 16 }
 0x304   : > { %v1568_v60 = vcvt.f32.s32 %v1567_v41  ;;  %v1554_v33 = vcvt.f32.s32 %v1553_v42  ;;  %vm7809_vm7 = vcmp.eq.s32.totalorder %v8008_v20, %v6555_v56  ;;  %vm7807_vm8 = vcmp.eq.s32.totalorder %v8008_v20, %v6553_v48 }
 0x305   : > { %4602 = vmatprep.mubr.msk.f32.mxu1 %vm7809_vm7, %v5041_v46  ;;  %v1626_v4 = vshll.u32 %v1625_v26, 16  ;;  %v5042_v26 = vmov 1.0|1.0  }
 0x306   : > { %v6572_v22 = vadd.s32 %v1570_v29, %v1568_v60  ;;  %v6574_v36 = vadd.s32 %v1556_v16, %v1554_v33  ;;  %4603 = vmatmul.mubr.msk.f32.gmra.mrb[12].mxu1 %vm7807_vm8, %v5041_v46 }
 0x307   : > { %v1595_v8 = vpop.xlane.xlu1 %1594  ;;  %v1581_v13 = vpop.xlane.xlu0 %1580 }
 0x308   : > { %v1596_v37 = vcvt.f32.s32 %v1595_v8  ;;  %v1582_v62 = vcvt.f32.s32 %v1581_v13  ;;  %vm7808_vm9 = vcmp.eq.s32.totalorder %v8008_v20, %v6574_v36  ;;  %vm7810_vm0 = vcmp.eq.s32.totalorder %v8008_v20, %v6572_v22 }
 0x309   : > { %4605 = vmatprep.mubr.msk.f32.mxu1 %vm7808_vm9, %v5041_v46  ;;  %v1667_v8 = vcvt.f32.s32 %v6241_v0 }
 0x30a   : > { %v1599_v29 = vadd.s32 %v1598_v27, %v1596_v37  ;;  %v1585_v16 = vadd.s32 %v1584_v40, %v1582_v62  ;;  %4606 = vmatmul.mubr.msk.f32.gmra.mrb[14].mxu1 %vm7810_vm0, %v5041_v46  ;;  %vm4762_vm0 = vmpackc.low %vm2245_vm11, %vm2244_vm10  ;;  %v1654_v27 = vshll.u32 %v1653_v21, 16  ;;  %v1640_v40 = vshll.u32 %v1639_v1, 16 }
 0x30b   : > { %v1623_v41 = vpop.xlane.xlu1 %1622  ;;  %v1609_v42 = vpop.xlane.xlu0 %1608  ;;  %v1668_v0 = vshll.u32 %v1667_v8, 16  ;;  %v1765_v8 = vcvt.f32.s32 %v6269_v55 }
 0x30c   : > { %v1624_v60 = vcvt.f32.s32 %v1623_v41  ;;  %v1610_v33 = vcvt.f32.s32 %v1609_v42  ;;  %vm2260_vm8 = vcmp.eq.s32.totalorder %v8008_v20, %v1585_v16  ;;  %vm2261_vm9 = vcmp.eq.s32.totalorder %v8008_v20, %v1599_v29 }
 0x30d   : > { %4608 = vmatprep.mubr.msk.f32.mxu1 %vm2260_vm8, %v5041_v46  ;;  %vm4760_vm7 = vmpackc.low %vm2261_vm9, %vm2260_vm8  ;;  %v1709_v29 = vcvt.f32.s32 %v6249_v57  ;;  %v1695_v16 = vcvt.f32.s32 %v6251_v6 }
 0x30e   : > { %v1627_v7 = vadd.s32 %v1626_v4, %v1624_v60  ;;  %v1613_v58 = vadd.s32 %v1612_v52, %v1610_v33  ;;  %4609 = vmatmul.mubr.msk.f32.gmra.mrb[16].mxu1 %vm2261_vm9, %v5041_v46  ;;  %4761 = vmatprep.subr.msk.bf16.mxu1 %vm4760_vm7, %v5042_v26  ;;  %vm4766_vm9 = vmpackc.low %vm2247_vm13, %vm2246_vm12  ;;  %v1737_v33 = vcvt.f32.s32 %v6259_v25 }
 0x30f   : > { %v1651_v13 = vpop.xlane.xlu1 %1650  ;;  %4763 = vmatpush3.bf16.xpose.msk.msra.mxu1 %vm4762_vm0, %v5042_v26  ;;  %v1637_v43 = vpop.xlane.xlu0 %1636  ;;  %v1710_v6 = vshll.u32 %v1709_v29, 16  ;;  %v1696_v60 = vshll.u32 %v1695_v16, 16  ;;  %v1793_v16 = vcvt.f32.s32 %v6279_v61 }
 0x310   : > { %v1652_v37 = vcvt.f32.s32 %v1651_v13  ;;  %v1638_v2 = vcvt.f32.s32 %v1637_v43  ;;  %vm2262_vm10 = vcmp.eq.s32.totalorder %v8008_v20, %v1613_v58  ;;  %vm2263_vm11 = vcmp.eq.s32.totalorder %v8008_v20, %v1627_v7  ;;  %v8009_v13 = vld [vmem:[#allocation20_spill] sm:$0xff] }
 0x311   : > { %4611 = vmatprep.mubr.msk.f32.mxu1 %vm2262_vm10, %v5041_v46  ;;  %vm4764_vm8 = vmpackc.low %vm2263_vm11, %vm2262_vm10  ;;  %v1723_v7 = vcvt.f32.s32 %v6261_v12  ;;  %v1738_v12 = vshll.u32 %v1737_v33, 16  ;;  %v1751_v43 = vcvt.f32.s32 %v8009_v13  ;;  %v1877_v13 = vcvt.f32.s32 %v6309_v59 }
 0x312   : > { %v1655_v62 = vadd.s32 %v1654_v27, %v1652_v37  ;;  %v1641_v4 = vadd.s32 %v1640_v40, %v1638_v2  ;;  %4612 = vmatmul.mubr.msk.f32.gmra.mrb[18].mxu1 %vm2263_vm11, %v5041_v46  ;;  %4765 = vmatprep.subr.msk.bf16.mxu1 %vm4764_vm8, %v5042_v26 }
 0x313   : > { %v1679_v52 = vpop.xlane.xlu1 %1678  ;;  %v1665_v21 = vpop.xlane.xlu0 %1664  ;;  %v1724_v15 = vshll.u32 %v1723_v7, 16  ;;  %v1752_v29 = vshll.u32 %v1751_v43, 16  ;;  %v1863_v43 = vcvt.f32.s32 %v6311_v54 }
 0x314   : > { %v1680_v1 = vcvt.f32.s32 %v1679_v52  ;;  %v1666_v41 = vcvt.f32.s32 %v1665_v21  ;;  %vm2264_vm0 = vcmp.eq.s32.totalorder %v8008_v20, %v1641_v4  ;;  %vm2265_vm7 = vcmp.eq.s32.totalorder %v8008_v20, %v1655_v62 }
 0x315   : > { %4614 = vmatprep.mubr.msk.f32.mxu1 %vm2264_vm0, %v5041_v46  ;;  %vm4768_vm10 = vmpackc.low %vm2265_vm7, %vm2264_vm0  ;;  %v1779_v52 = vcvt.f32.s32 %v6281_v24 }
 0x316   : > { %v1683_v57 = vadd.s32 %v1682_v38, %v1680_v1  ;;  %v1669_v42 = vadd.s32 %v1668_v0, %v1666_v41  ;;  %4615 = vmatmul.mubr.msk.f32.gmra.mrb[20].mxu1 %vm2265_vm7, %v5041_v46  ;;  %vm4770_vm0 = vmpackc.low %vm2249_vm15, %vm2248_vm14  ;;  %v1766_v0 = vshll.u32 %v1765_v8, 16  ;;  %v1794_v41 = vshll.u32 %v1793_v16, 16 }
 0x317   : > { %v1707_v58 = vpop.xlane.xlu1 %1706  ;;  %4767 = vmatpush3.bf16.xpose.msk.msra.mxu1 %vm4766_vm9, %v5042_v26  ;;  %v1693_v27 = vpop.xlane.xlu0 %1692  ;;  %v1864_v16 = vshll.u32 %v1863_v43, 16 }
 0x318   : > { %v1708_v10 = vcvt.f32.s32 %v1707_v58  ;;  %v1694_v40 = vcvt.f32.s32 %v1693_v27  ;;  %4769 = vmatprep.subr.msk.bf16.mxu1 %vm4768_vm10, %v5042_v26  ;;  %vm2266_vm12 = vcmp.eq.s32.totalorder %v8008_v20, %v1669_v42  ;;  %vm2267_vm13 = vcmp.eq.s32.totalorder %v8008_v20, %v1683_v57 }
 0x319   : > { %4617 = vmatprep.mubr.msk.f32.mxu1 %vm2266_vm12, %v5041_v46  ;;  %vm4772_vm14 = vmpackc.low %vm2267_vm13, %vm2266_vm12  ;;  %v1780_v57 = vshll.u32 %v1779_v52, 16  ;;  %v1821_v42 = vcvt.f32.s32 %v6289_v3  ;;  %v1905_v52 = vcvt.f32.s32 %v6319_v14 }
 0x31a   : > { %v1711_v25 = vadd.s32 %v1710_v6, %v1708_v10  ;;  %v1697_v49 = vadd.s32 %v1696_v60, %v1694_v40  ;;  %4618 = vmatmul.mubr.msk.f32.gmra.mrb[22].mxu1 %vm2267_vm13, %v5041_v46  ;;  %v1807_v6 = vcvt.f32.s32 %v6291_v32  ;;  %vm4774_vm12 = vmpackc.low %vm2251_vm2, %vm2250_vm1  ;;  %v1849_v40 = vcvt.f32.s32 %v6299_v45 }
 0x31b   : > { %v1735_v37 = vpop.xlane.xlu1 %1734  ;;  %v1721_v2 = vpop.xlane.xlu0 %1720  ;;  %v1822_v27 = vshll.u32 %v1821_v42, 16 }
 0x31c   : > { %v1736_v62 = vcvt.f32.s32 %v1735_v37  ;;  %v1722_v4 = vcvt.f32.s32 %v1721_v2  ;;  %vm2268_vm11 = vcmp.eq.s32.totalorder %v8008_v20, %v1697_v49  ;;  %vm2269_vm8 = vcmp.eq.s32.totalorder %v8008_v20, %v1711_v25 }
 0x31d   : > { %4620 = vmatprep.mubr.msk.f32.mxu1 %vm2268_vm11, %v5041_v46  ;;  %v1808_v10 = vshll.u32 %v1807_v6, 16  ;;  %vm4776_vm1 = vmpackc.low %vm2269_vm8, %vm2268_vm11  ;;  %v1850_v25 = vshll.u32 %v1849_v40, 16 }
 0x31e   : > { %v6651_v55 = vadd.s32 %v1738_v12, %v1736_v62  ;;  %v6653_v38 = vadd.s32 %v1724_v15, %v1722_v4  ;;  %4621 = vmatmul.mubr.msk.f32.gmra.mrb[24].mxu1 %vm2269_vm8, %v5041_v46  ;;  %v1835_v12 = vcvt.f32.s32 %v6301_v9 }
 0x31f   : > { %v1763_v21 = vpop.xlane.xlu1 %1762  ;;  %4771 = vmatpush3.bf16.xpose.msk.msra.mxu1 %vm4770_vm0, %v5042_v26  ;;  %v1749_v44 = vpop.xlane.xlu0 %1748 }
 0x320   : > { %v1764_v17 = vcvt.f32.s32 %v1763_v21  ;;  %v1750_v1 = vcvt.f32.s32 %v1749_v44  ;;  %4773 = vmatprep.subr.msk.bf16.mxu1 %vm4772_vm14, %v5042_v26  ;;  %vm2270_vm15 = vcmp.eq.s32.totalorder %v8008_v20, %v6653_v38  ;;  %vm2271_vm7 = vcmp.eq.s32.totalorder %v8008_v20, %v6651_v55  ;;  %vm4778_vm14 = vmpackc.low %vm2253_vm4, %vm2252_vm3 }
 0x321   : > { %4623 = vmatprep.mubr.msk.f32.mxu1 %vm2270_vm15, %v5041_v46  ;;  %v1836_v49 = vshll.u32 %v1835_v12, 16  ;;  %v1891_v21 = vcvt.f32.s32 %v6321_v18  ;;  %vm4780_vm3 = vmpackc.low %vm2271_vm7, %vm2270_vm15  ;;  %v1906_v55 = vshll.u32 %v1905_v52, 16  ;;  %v8017_v12 = vld [vmem:[#allocation21_spill] sm:$0xff] }
 0x322   : > { %v6674_v61 = vadd.s32 %v1766_v0, %v1764_v17  ;;  %v6676_v24 = vadd.s32 %v1752_v29, %v1750_v1  ;;  %4624 = vmatmul.mubr.msk.f32.gmra.mrb[26].mxu1 %vm2271_vm7, %v5041_v46  ;;  %v1878_v29 = vshll.u32 %v1877_v13, 16  ;;  %v8021_v13 = vld [vmem:[#allocation23_spill] sm:$0xff]  ;;  %v8039_v0 = vld [vmem:[#allocation29_spill] sm:$0xff] }
 0x323   : > { %v1791_v60 = vpop.xlane.xlu1 %1790  ;;  %v1777_v33 = vpop.xlane.xlu0 %1776  ;;  %v1892_v1 = vshll.u32 %v1891_v21, 16  ;;  %v1989_v43 = vcvt.f32.s32 %v8021_v13 }
 0x324   : > { %v1792_v7 = vcvt.f32.s32 %v1791_v60  ;;  %v1778_v58 = vcvt.f32.s32 %v1777_v33  ;;  %vm2272_vm9 = vcmp.eq.s32.totalorder %v8008_v20, %v6676_v24  ;;  %vm2273_vm10 = vcmp.eq.s32.totalorder %v8008_v20, %v6674_v61 }
 0x325   : > { %4626 = vmatprep.mubr.msk.f32.mxu1 %vm2272_vm9, %v5041_v46  ;;  %v1990_v21 = vshll.u32 %v1989_v43, 16 }
 0x326   : > { %v6698_v3 = vadd.s32 %v1794_v41, %v1792_v7  ;;  %v6700_v32 = vadd.s32 %v1780_v57, %v1778_v58  ;;  %4627 = vmatmul.mubr.msk.f32.gmra.mrb[28].mxu1 %vm2273_vm10, %v5041_v46  ;;  %v1933_v41 = vcvt.f32.s32 %v6329_v35  ;;  %v8014_v57 = vld [vmem:[#allocation19_spill] sm:$0xff] }
 0x327   : > { %v1819_v30 = vpop.xlane.xlu1 %1818  ;;  %4775 = vmatpush3.bf16.xpose.msk.msra.mxu1 %vm4774_vm12, %v5042_v26  ;;  %v1805_v11 = vpop.xlane.xlu0 %1804  ;;  %v1919_v42 = vcvt.f32.s32 %v8014_v57 }
 0x328   : > { %v1820_v15 = vcvt.f32.s32 %v1819_v30  ;;  %v1806_v8 = vcvt.f32.s32 %v1805_v11  ;;  %4777 = vmatprep.subr.msk.bf16.mxu1 %vm4776_vm1, %v5042_v26  ;;  %vm2274_vm2 = vcmp.eq.s32.totalorder %v8008_v20, %v6700_v32  ;;  %vm2275_vm13 = vcmp.eq.s32.totalorder %v8008_v20, %v6698_v3  ;;  %v8018_v11 = vld [vmem:[#allocation22_spill] sm:$0xff] }
 0x329   : > { %4629 = vmatprep.mubr.msk.f32.mxu1 %vm2274_vm2, %v5041_v46  ;;  %v1920_v40 = vshll.u32 %v1919_v42, 16  ;;  %v1961_v30 = vcvt.f32.s32 %v8017_v12  ;;  %v2045_v42 = vcvt.f32.s32 %v6369_v39  ;;  %v2073_v12 = vcvt.f32.s32 %v6379_v53 }
 0x32a   : > { %v1823_v45 = vadd.s32 %v1822_v27, %v1820_v15  ;;  %v1809_v9 = vadd.s32 %v1808_v10, %v1806_v8  ;;  %4630 = vmatmul.mubr.msk.f32.gmra.mrb[30].mxu1 %vm2275_vm13, %v5041_v46  ;;  %v1934_v10 = vshll.u32 %v1933_v41, 16  ;;  %v1947_v15 = vcvt.f32.s32 %v8018_v11 }
 0x32b   : > { %v1847_v37 = vpop.xlane.xlu1 %1846  ;;  %v1833_v2 = vpop.xlane.xlu0 %1832  ;;  %v1962_v61 = vshll.u32 %v1961_v30, 16  ;;  %v8035_v30 = vld [vmem:[#allocation27_spill] sm:$0xff] }
 0x32c   : > { %v1848_v62 = vcvt.f32.s32 %v1847_v37  ;;  %v1834_v4 = vcvt.f32.s32 %v1833_v2  ;;  %vm2276_vm11 = vcmp.eq.s32.totalorder %v8008_v20, %v1809_v9  ;;  %vm2277_vm8 = vcmp.eq.s32.totalorder %v8008_v20, %v1823_v45  ;;  %v8022_v37 = vld [vmem:[#allocation24_spill] sm:$0xff] }
 0x32d   : > { %4632 = vmatprep.mubr.msk.f32.mxu1 %vm2276_vm11, %v5041_v46  ;;  %vm6731_vm0 = vmpackc.low %vm2277_vm8, %vm2276_vm11  ;;  %v1975_v2 = vcvt.f32.s32 %v8022_v37  ;;  %v2059_v11 = vcvt.f32.s32 %v8035_v30 }
 0x32e   : > { %v1851_v59 = vadd.s32 %v1850_v25, %v1848_v62  ;;  %v1837_v54 = vadd.s32 %v1836_v49, %v1834_v4  ;;  %4633 = vmatmul.mubr.msk.f32.gmra.mrb[32].mxu1 %vm2277_vm8, %v5041_v46  ;;  %vm4782_vm8 = vmpackc.low %vm2255_vm6, %vm2254_vm5  ;;  %v1948_v49 = vshll.u32 %v1947_v15, 16 }
 0x32f   : > { %v1875_v44 = vpop.xlane.xlu1 %1874  ;;  %4779 = vmatpush3.bf16.xpose.msk.msra.mxu1 %vm4778_vm14, %v5042_v26  ;;  %v1861_v17 = vpop.xlane.xlu0 %1860  ;;  %vm4784_vm5 = vmpackc.low %vm2273_vm10, %vm2272_vm9 }
 0x330   : > { %v1876_v51 = vcvt.f32.s32 %v1875_v44  ;;  %v1862_v34 = vcvt.f32.s32 %v1861_v17  ;;  %4781 = vmatprep.subr.msk.bf16.mxu1 %vm4780_vm3, %v5042_v26  ;;  %vm2278_vm4 = vcmp.eq.s32.totalorder %v8008_v20, %v1837_v54  ;;  %vm2279_vm12 = vcmp.eq.s32.totalorder %v8008_v20, %v1851_v59  ;;  %v8027_v17 = vld [vmem:[#allocation25_spill] sm:$0xff] }
 0x331   : > { %4635 = vmatprep.mubr.msk.f32.mxu1 %vm2278_vm4, %v5041_v46  ;;  %vm6755_vm1 = vmpackc.low %vm2279_vm12, %vm2278_vm4  ;;  %v1976_v44 = vshll.u32 %v1975_v2, 16 }
 0x332   : > { %v1879_v18 = vadd.s32 %v1878_v29, %v1876_v51  ;;  %v1865_v38 = vadd.s32 %v1864_v16, %v1862_v34  ;;  %4636 = vmatmul.mubr.msk.f32.gmra.mrb[34].mxu1 %vm2279_vm12, %v5041_v46  ;;  %vm8025_vm12 = vcmp.eq.s32.totalorder %v8008_v20, %v6555_v56  ;;  %v2017_v51 = vcvt.f32.s32 %v8027_v17  ;;  %v8028_v34 = vld [vmem:[#allocation26_spill] sm:$0xff] }
 0x333   : > { %v1903_v6 = vpop.xlane.xlu1 %1902  ;;  %v1889_v60 = vpop.xlane.xlu0 %1888 }
 0x334   : > { %v1904_v33 = vcvt.f32.s32 %v1903_v6  ;;  %v1890_v7 = vcvt.f32.s32 %v1889_v60  ;;  %vm2280_vm15 = vcmp.eq.s32.totalorder %v8008_v20, %v1865_v38  ;;  %vm2281_vm7 = vcmp.eq.s32.totalorder %v8008_v20, %v1879_v18 }
 0x335   : > { %4638 = vmatprep.mubr.msk.f32.mxu1 %vm2280_vm15, %v5041_v46  ;;  %vm6765_vm11 = vmpackc.low %vm2281_vm7, %vm2280_vm15  ;;  %vm8026_vm15 = vcmp.eq.s32.totalorder %v8008_v20, %v6553_v48  ;;  %v2003_v18 = vcvt.f32.s32 %v8028_v34  ;;  %v2018_v3 = vshll.u32 %v2017_v51, 16  ;;  %v2031_v6 = vcvt.f32.s32 %v6371_v50 }
 0x336   : > { %v1907_v35 = vadd.s32 %v1906_v55, %v1904_v33  ;;  %v1893_v27 = vadd.s32 %v1892_v1, %v1890_v7  ;;  %4639 = vmatmul.mubr.msk.f32.gmra.mrb[36].mxu1 %vm2281_vm7, %v5041_v46  ;;  %vm4786_vm7 = vmpackc.low %vm8026_vm15, %vm8025_vm12  ;;  %vm8034_vm12 = vcmp.eq.s32.totalorder %v8008_v20, %v6572_v22  ;;  %v6956_v1 = vstv %s4124_s16 }
 0x337   : > { %v1931_v8 = vpop.xlane.xlu1 %1930  ;;  %4783 = vmatpush3.bf16.xpose.msk.msra.mxu1 %vm4782_vm8, %v5042_v26  ;;  %v1917_v45 = vpop.xlane.xlu0 %1916  ;;  %vm4788_vm8 = vmpackc.low %vm2275_vm13, %vm2274_vm2  ;;  %v2004_v57 = vshll.u32 %v2003_v18, 16  ;;  %v2157_v18 = vcvt.f32.s32 %v8039_v0 }
 0x338   : > { %v1932_v19 = vcvt.f32.s32 %v1931_v8  ;;  %v1918_v5 = vcvt.f32.s32 %v1917_v45  ;;  %4785 = vmatprep.subr.msk.bf16.mxu1 %vm4784_vm5, %v5042_v26  ;;  %vm2282_vm6 = vcmp.eq.s32.totalorder %v8008_v20, %v1893_v27  ;;  %vm2283_vm14 = vcmp.eq.s32.totalorder %v8008_v20, %v1907_v35 }
 0x339   : > { %4641 = vmatprep.mubr.msk.f32.mxu1 %vm2282_vm6, %v5041_v46  ;;  %vm6789_vm3 = vmpackc.low %vm2283_vm14, %vm2282_vm6 }
 0x33a   : > { %v1935_v25 = vadd.s32 %v1934_v10, %v1932_v19  ;;  %v1921_v24 = vadd.s32 %v1920_v40, %v1918_v5  ;;  %4642 = vmatmul.mubr.msk.f32.gmra.mrb[38].mxu1 %vm2283_vm14, %v5041_v46  ;;  %v2046_v10 = vshll.u32 %v2045_v42, 16  ;;  %v2032_v40 = vshll.u32 %v2031_v6, 16 }
 0x33b   : > { %v1959_v62 = vpop.xlane.xlu1 %1958  ;;  %v1945_v4 = vpop.xlane.xlu0 %1944  ;;  %v2074_v5 = vshll.u32 %v2073_v12, 16  ;;  %v2158_v42 = vshll.u32 %v2157_v18, 16 }
 0x33c   : > { %v1960_v59 = vcvt.f32.s32 %v1959_v62  ;;  %v1946_v54 = vcvt.f32.s32 %v1945_v4  ;;  %vm2284_vm9 = vcmp.eq.s32.totalorder %v8008_v20, %v1921_v24  ;;  %vm2285_vm10 = vcmp.eq.s32.totalorder %v8008_v20, %v1935_v25 }
 0x33d   : > { %4644 = vmatprep.mubr.msk.f32.mxu1 %vm2284_vm9, %v5041_v46  ;;  %vm6799_vm4 = vmpackc.low %vm2285_vm10, %vm2284_vm9  ;;  %v2060_v25 = vshll.u32 %v2059_v11, 16  ;;  %v2101_v24 = vcvt.f32.s32 %v6389_v63  ;;  %v8044_v11 = vld [vmem:[#allocation32_spill] sm:$0xff] }
 0x33e   : > { %v1963_v16 = vadd.s32 %v1962_v61, %v1960_v59  ;;  %v1949_v52 = vadd.s32 %v1948_v49, %v1946_v54  ;;  %4645 = vmatmul.mubr.msk.f32.gmra.mrb[40].mxu1 %vm2285_vm10, %v5041_v46  ;;  %vm8033_vm10 = vcmp.eq.s32.totalorder %v8008_v20, %v6574_v36  ;;  %v8038_v61 = vld [vmem:[#allocation28_spill] sm:$0xff]  ;;  %v2129_v54 = vcvt.f32.s32 %v6399_v31 }
 0x33f   : > { %v1987_v38 = vpop.xlane.xlu1 %1986  ;;  %4787 = vmatpush3.bf16.xpose.msk.msra.mxu1 %vm4786_vm7, %v5042_v26  ;;  %v1973_v55 = vpop.xlane.xlu0 %1972  ;;  %vm4790_vm15 = vmpackc.low %vm8034_vm12, %vm8033_vm10  ;;  %v2087_v49 = vcvt.f32.s32 %v8038_v61  ;;  %v2102_v63 = vshll.u32 %v2101_v24, 16 }
 0x340   : > { %v1988_v48 = vcvt.f32.s32 %v1987_v38  ;;  %v1974_v56 = vcvt.f32.s32 %v1973_v55  ;;  %4789 = vmatprep.subr.msk.bf16.mxu1 %vm4788_vm8, %v5042_v26  ;;  %vm2286_vm5 = vcmp.eq.s32.totalorder %v8008_v20, %v1949_v52  ;;  %vm2287_vm6 = vcmp.eq.s32.totalorder %v8008_v20, %v1963_v16  ;;  %v8040_v38 = vld [vmem:[#allocation30_spill] sm:$0xff] }
 0x341   : > { %4647 = vmatprep.mubr.msk.f32.mxu1 %vm2286_vm5, %v5041_v46  ;;  %vm6823_vm14 = vmpackc.low %vm2287_vm6, %vm2286_vm5  ;;  %v2088_v59 = vshll.u32 %v2087_v49, 16  ;;  %v2115_v16 = vcvt.f32.s32 %v6401_v28  ;;  %v2130_v31 = vshll.u32 %v2129_v54, 16  ;;  %v2143_v55 = vcvt.f32.s32 %v8040_v38 }
 0x342   : > { %v1991_v41 = vadd.s32 %v1990_v21, %v1988_v48  ;;  %v1977_v32 = vadd.s32 %v1976_v44, %v1974_v56  ;;  %4648 = vmatmul.mubr.msk.f32.gmra.mrb[42].mxu1 %vm2287_vm6, %v5041_v46 }
 0x343   : > { %v2015_v60 = vpop.xlane.xlu1 %2014  ;;  %v2001_v33 = vpop.xlane.xlu0 %2000  ;;  %v2116_v28 = vshll.u32 %v2115_v16, 16  ;;  %v2144_v6 = vshll.u32 %v2143_v55, 16 }
 0x344   : > { %v2016_v7 = vcvt.f32.s32 %v2015_v60  ;;  %v2002_v35 = vcvt.f32.s32 %v2001_v33  ;;  %vm2288_vm2 = vcmp.eq.s32.totalorder %v8008_v20, %v1977_v32  ;;  %vm2289_vm13 = vcmp.eq.s32.totalorder %v8008_v20, %v1991_v41  ;;  %v8041_v33 = vld [vmem:[#allocation31_spill] sm:$0xff] }
 0x345   : > { %4650 = vmatprep.mubr.msk.f32.mxu1 %vm2288_vm2, %v5041_v46  ;;  %vm6833_vm9 = vmpackc.low %vm2289_vm13, %vm2288_vm2  ;;  %v2185_v60 = vcvt.f32.s32 %v6419_v47 }
 0x346   : > { %v2019_v50 = vadd.s32 %v2018_v3, %v2016_v7  ;;  %v2005_v39 = vadd.s32 %v2004_v57, %v2002_v35  ;;  %4651 = vmatmul.mubr.msk.f32.gmra.mrb[44].mxu1 %vm2289_vm13, %v5041_v46  ;;  %v2171_v7 = vcvt.f32.s32 %v8041_v33 }
 0x347   : > { %v2043_v15 = vpop.xlane.xlu1 %2042  ;;  %4791 = vmatpush3.bf16.xpose.msk.msra.mxu1 %vm4790_vm15, %v5042_v26  ;;  %v2029_v8 = vpop.xlane.xlu0 %2028  ;;  %v2186_v14 = vshll.u32 %v2185_v60, 16 }
 0x348   : > { %v2044_v45 = vcvt.f32.s32 %v2043_v15  ;;  %v2030_v36 = vcvt.f32.s32 %v2029_v8  ;;  %vm2290_vm7 = vcmp.eq.s32.totalorder %v8008_v20, %v2005_v39  ;;  %vm2291_vm8 = vcmp.eq.s32.totalorder %v8008_v20, %v2019_v50  ;;  %v8045_v8 = vld [vmem:[#allocation33_spill] sm:$0xff] }
 0x349   : > { %4653 = vmatprep.mubr.msk.f32.mxu1 %vm2290_vm7, %v5041_v46  ;;  %vm6850_vm5 = vmpackc.low %vm2291_vm8, %vm2290_vm7  ;;  %v2172_v30 = vshll.u32 %v2171_v7, 16  ;;  %v2213_v15 = vcvt.f32.s32 %v8044_v11 }
 0x34a   : > { %v2047_v19 = vadd.s32 %v2046_v10, %v2044_v45  ;;  %v2033_v53 = vadd.s32 %v2032_v40, %v2030_v36  ;;  %4654 = vmatmul.mubr.msk.f32.gmra.mrb[46].mxu1 %vm2291_vm8, %v5041_v46  ;;  %v2199_v45 = vcvt.f32.s32 %v8045_v8 }
 0x34b   : > { %v2071_v13 = vpop.xlane.xlu1 %2070  ;;  %v2057_v43 = vpop.xlane.xlu0 %2056  ;;  %v2214_v49 = vshll.u32 %v2213_v15, 16 }
 0x34c   : > { %v2072_v37 = vcvt.f32.s32 %v2071_v13  ;;  %v2058_v2 = vcvt.f32.s32 %v2057_v43  ;;  %vm2292_vm6 = vcmp.eq.s32.totalorder %v8008_v20, %v2033_v53  ;;  %vm2293_vm2 = vcmp.eq.s32.totalorder %v8008_v20, %v2047_v19  ;;  %v8048_v43 = vld [vmem:[#allocation34_spill] sm:$0xff] }
 0x34d   : > { %4656 = vmatprep.mubr.msk.f32.mxu1 %vm2292_vm6, %v5041_v46  ;;  %vm4792_vm13 = vmpackc.low %vm2293_vm2, %vm2292_vm6  ;;  %v2200_v13 = vshll.u32 %v2199_v45, 16  ;;  %v2885_v45 = vcvt.s32.f32 %v8008_v20 }
 0x34e   : > { %v2075_v62 = vadd.s32 %v2074_v5, %v2072_v37  ;;  %v2061_v4 = vadd.s32 %v2060_v25, %v2058_v2  ;;  %4657 = vmatmul.mubr.msk.f32.gmra.mrb[48].mxu1 %vm2293_vm2, %v5041_v46  ;;  %4793 = vmatprep.subr.msk.bf16.mxu0 %vm4792_vm13, %v5042_v26  ;;  %v2241_v37 = vcvt.f32.s32 %v8048_v43  ;;  %v2227_v2 = vcvt.f32.s32 %v6439_v23  ;;  %v4881_v23 = vld [vmem:[%s5163_s30 + $0x8] sm:$0xff] }
 0x34f   : > { %v2099_v52 = vpop.xlane.xlu1 %2098  ;;  %4795 = vmatpush3.bf16.xpose.msk.msra.mxu0 %vm6731_vm0, %v5042_v26  ;;  %v2085_v21 = vpop.xlane.xlu0 %2084  ;;  %4422 = vmatprep.mubr.f32.mxu0 %v2885_v45 }
 0x350   : > { %v2100_v44 = vcvt.f32.s32 %v2099_v52  ;;  %v2086_v17 = vcvt.f32.s32 %v2085_v21  ;;  %vm2294_vm10 = vcmp.eq.s32.totalorder %v8008_v20, %v2061_v4  ;;  %vm2295_vm12 = vcmp.eq.s32.totalorder %v8008_v20, %v2075_v62 }
 0x351   : > { %4659 = vmatprep.mubr.msk.f32.mxu1 %vm2294_vm10, %v5041_v46  ;;  %vm4796_vm15 = vmpackc.low %vm2295_vm12, %vm2294_vm10  ;;  %v2242_v16 = vshll.u32 %v2241_v37, 16  ;;  %v2228_v52 = vshll.u32 %v2227_v2, 16 }
 0x352   : > { %v2103_v51 = vadd.s32 %v2102_v63, %v2100_v44  ;;  %v2089_v34 = vadd.s32 %v2088_v59, %v2086_v17  ;;  %4660 = vmatmul.mubr.msk.f32.gmra.mrb[50].mxu1 %vm2295_vm12, %v5041_v46  ;;  %4797 = vmatprep.subr.msk.bf16.mxu0 %vm4796_vm15, %v5042_v26 }
 0x353   : > { %v2127_v48 = vpop.xlane.xlu1 %2126  ;;  %v2113_v56 = vpop.xlane.xlu0 %2112 }
 0x354   : > { %v2128_v41 = vcvt.f32.s32 %v2127_v48  ;;  %v2114_v32 = vcvt.f32.s32 %v2113_v56  ;;  %vm2296_vm0 = vcmp.eq.s32.totalorder %v8008_v20, %v2089_v34  ;;  %vm2297_vm7 = vcmp.eq.s32.totalorder %v8008_v20, %v2103_v51 }
 0x355   : > { %4662 = vmatprep.mubr.msk.f32.mxu1 %vm2296_vm0, %v5041_v46  ;;  %vm4800_vm8 = vmpackc.low %vm2297_vm7, %vm2296_vm0 }
 0x356   : > { %v2131_v3 = vadd.s32 %v2130_v31, %v2128_v41  ;;  %v2117_v57 = vadd.s32 %v2116_v28, %v2114_v32  ;;  %4663 = vmatmul.mubr.msk.f32.gmra.mrb[52].mxu1 %vm2297_vm7, %v5041_v46 }
 0x357   : > { %v2155_v35 = vpop.xlane.xlu1 %2154  ;;  %4799 = vmatpush3.bf16.xpose.msk.msra.mxu0 %vm6755_vm1, %v5042_v26  ;;  %v2141_v50 = vpop.xlane.xlu0 %2140 }
 0x358   : > { %v2156_v39 = vcvt.f32.s32 %v2155_v35  ;;  %v2142_v10 = vcvt.f32.s32 %v2141_v50  ;;  %4801 = vmatprep.subr.msk.bf16.mxu0 %vm4800_vm8, %v5042_v26  ;;  %vm2298_vm6 = vcmp.eq.s32.totalorder %v8008_v20, %v2117_v57  ;;  %vm2299_vm2 = vcmp.eq.s32.totalorder %v8008_v20, %v2131_v3 }
 0x359   : > { %4665 = vmatprep.mubr.msk.f32.mxu1 %vm2298_vm6, %v5041_v46  ;;  %vm6887_vm13 = vmpackc.low %vm2299_vm2, %vm2298_vm6  ;;  %v5043_v57 = vmov 0.0  }
 0x35a   : > { %v2159_v40 = vadd.s32 %v2158_v42, %v2156_v39  ;;  %v2145_v12 = vadd.s32 %v2144_v6, %v2142_v10  ;;  %4666 = vmatmul.mubr.msk.f32.gmra.mrb[54].mxu1 %vm2299_vm2, %v5041_v46 }
 0x35b   : > { %v2183_v36 = vpop.xlane.xlu1 %2182  ;;  %v2169_v19 = vpop.xlane.xlu0 %2168 }
 0x35c   : > { %v2184_v53 = vcvt.f32.s32 %v2183_v36  ;;  %v2170_v5 = vcvt.f32.s32 %v2169_v19  ;;  %vm2300_vm1 = vcmp.eq.s32.totalorder %v8008_v20, %v2145_v12  ;;  %vm2301_vm10 = vcmp.eq.s32.totalorder %v8008_v20, %v2159_v40 }
 0x35d   : > { %4668 = vmatprep.mubr.msk.f32.mxu1 %vm2300_vm1, %v5041_v46  ;;  %vm6897_vm12 = vmpackc.low %vm2301_vm10, %vm2300_vm1 }
 0x35e   : > { %v2187_v24 = vadd.s32 %v2186_v14, %v2184_v53  ;;  %v2173_v61 = vadd.s32 %v2172_v30, %v2170_v5  ;;  %4669 = vmatmul.mubr.msk.f32.gmra.mrb[56].mxu1 %vm2301_vm10, %v5041_v46 }
 0x35f   : > { %v2211_v62 = vpop.xlane.xlu1 %2210  ;;  %4803 = vmatpush3.bf16.xpose.msk.msra.mxu0 %vm6765_vm11, %v5042_v26  ;;  %v2197_v4 = vpop.xlane.xlu0 %2196 }
 0x360   : > { %v2212_v63 = vcvt.f32.s32 %v2211_v62  ;;  %v2198_v59 = vcvt.f32.s32 %v2197_v4  ;;  %4805 = vmatprep.subr.msk.bf16.mxu0 %vm6887_vm13, %v5042_v26  ;;  %vm2302_vm15 = vcmp.eq.s32.totalorder %v8008_v20, %v2173_v61  ;;  %vm2303_vm0 = vcmp.eq.s32.totalorder %v8008_v20, %v2187_v24 }
 0x361   : > { %4671 = vmatprep.mubr.msk.f32.mxu1 %vm2302_vm15, %v5041_v46  ;;  %vm6913_vm7 = vmpackc.low %vm2303_vm0, %vm2302_vm15 }
 0x362   : > { %v2215_v54 = vadd.s32 %v2214_v49, %v2212_v63  ;;  %v2201_v58 = vadd.s32 %v2200_v13, %v2198_v59  ;;  %4672 = vmatmul.mubr.msk.f32.gmra.mrb[58].mxu1 %vm2303_vm0, %v5041_v46 }
 0x363   : > { %v2239_v21 = vpop.xlane.xlu1 %2238  ;;  %v2225_v44 = vpop.xlane.xlu0 %2224 }
 0x364   : > { %v2240_v17 = vcvt.f32.s32 %v2239_v21  ;;  %v2226_v51 = vcvt.f32.s32 %v2225_v44  ;;  %vm2304_vm11 = vcmp.eq.s32.totalorder %v8008_v20, %v2201_v58  ;;  %vm2305_vm8 = vcmp.eq.s32.totalorder %v8008_v20, %v2215_v54  ;;  %v4882_v21 = vld [vmem:[%s5163_s30] sm:$0xff] }
 0x365   : > { %4674 = vmatprep.mubr.msk.f32.mxu1 %vm2304_vm11, %v5041_v46  ;;  %vm4816_vm6 = vmpackc.low %vm2305_vm8, %vm2304_vm11 }
 0x366   : > { %v2243_v34 = vadd.s32 %v2242_v16, %v2240_v17  ;;  %v2229_v31 = vadd.s32 %v2228_v52, %v2226_v51  ;;  %4675 = vmatmul.mubr.msk.f32.gmra.mrb[60].mxu1 %vm2305_vm8, %v5041_v46 }
 0x367   : > { %4807 = vmatpush3.bf16.xpose.msk.msra.mxu0 %vm6789_vm3, %v5042_v26 }
 0x368   : > { %4809 = vmatprep.subr.msk.bf16.mxu0 %vm6897_vm12, %v5042_v26  ;;  %vm2306_vm2 = vcmp.eq.s32.totalorder %v8008_v20, %v2229_v31  ;;  %vm2307_vm13 = vcmp.eq.s32.totalorder %v8008_v20, %v2243_v34 }
 0x369   : > { %4677 = vmatprep.mubr.msk.f32.mxu1 %vm2306_vm2, %v5041_v46  ;;  %vm4820_vm1 = vmpackc.low %vm2307_vm13, %vm2306_vm2 }
 0x36a   : > { %4678 = vmatmul.mubr.msk.f32.gmra.mrb[62].mxu1 %vm2307_vm13, %v5041_v46  ;;  %v8051_v46 = vlaneseq }
 0x36b   : > { %4388 = vmatprep.mubr.f32.mxu1 %v2885_v45 }
 0x36c   : > { %v6950_v9 = vshrl.u32 %v8051_v46, 7 }
 0x36e   : > { %v3103_v29 = vadd.s32 8, %v6950_v9  ;;  %v3167_v27 = vadd.s32 %v6956_v1, %v6950_v9  ;;  %v3105_v0 = vadd.s32 24, %v6950_v9  ;;  %v3104_v18 = vadd.s32 16, %v6950_v9  ;;  %4389 = vmatmul.mubr.f32.vlgmr.msra.gmra.mrb[64].mxu1 %v2885_v45 }
 0x36f   : > { %4811 = vmatpush3.bf16.xpose.msk.msra.mxu0 %vm6799_vm4, %v5042_v26  ;;  %v3107_v22 = vadd.s32 40, %v6950_v9  ;;  %v3106_v55 = vadd.s32 32, %v6950_v9  ;;  %v3109_v48 = vadd.s32 56, %v6950_v9  ;;  %v3108_v56 = vadd.s32 48, %v6950_v9 }
 0x370   : > { %4813 = vmatprep.subr.msk.bf16.mxu0 %vm6913_vm7, %v5042_v26  ;;  %v3168_v28 = vadd.s32 %v6956_v1, %v3103_v29  ;;  %vm3231_vm4 = vcmp.lt.s32.totalorder %v3167_v27, 768  ;;  %v3169_v38 = vadd.s32 %v6956_v1, %v3104_v18  ;;  %v3111_v41 = vadd.s32 72, %v6950_v9 }
 0x371   : > { %v3110_v32 = vadd.s32 64, %v6950_v9  ;;  %v3113_v3 = vadd.s32 88, %v6950_v9  ;;  %v6976_v6 = vsel %vm3231_vm4, 1.0, %v5043_v57  ;;  %v3172_v60 = vadd.s32 %v6956_v1, %v3107_v22 }
 0x372   : > { %vm3232_vm3 = vcmp.lt.s32.totalorder %v3168_v28, 768  ;;  %v3171_v33 = vadd.s32 %v6956_v1, %v3106_v55  ;;  %v3174_v7 = vadd.s32 %v6956_v1, %v3109_v48  ;;  %v3173_v35 = vadd.s32 %v6956_v1, %v3108_v56  ;;  %v4883_v55 = vld [vmem:[%s5163_s30 + $0x18] sm:$0xff] }
 0x373   : > { %v6973_v42 = vsel %vm3232_vm3, 1.0, %v5043_v57  ;;  %v3176_v50 = vadd.s32 %v6956_v1, %v3111_v41  ;;  %v3175_v39 = vadd.s32 %v6956_v1, %v3110_v32  ;;  %v3112_v10 = vadd.s32 80, %v6950_v9 }
 0x374   : > { %v3115_v47 = vadd.s32 104, %v6950_v9  ;;  %v3178_v40 = vadd.s32 %v6956_v1, %v3113_v3  ;;  %v3114_v12 = vadd.s32 96, %v6950_v9  ;;  %v3117_v14 = vadd.s32 120, %v6950_v9  ;;  %v4884_v3 = vld [vmem:[%s5163_s30 + $0x10] sm:$0xff] }
 0x375   : > { %v3116_v30 = vadd.s32 112, %v6950_v9  ;;  %v3119_v8 = vadd.s32 136, %v6950_v9  ;;  %vm3235_vm10 = vcmp.lt.s32.totalorder %v3171_v33, 768  ;;  %vm3238_vm12 = vcmp.lt.s32.totalorder %v3174_v7, 768 }
 0x376   : > { %vm3237_vm15 = vcmp.lt.s32.totalorder %v3173_v35, 768  ;;  %vm3240_vm0 = vcmp.lt.s32.totalorder %v3176_v50, 768  ;;  %vm3239_vm7 = vcmp.lt.s32.totalorder %v3175_v39, 768  ;;  %v3177_v36 = vadd.s32 %v6956_v1, %v3112_v10 }
 0x377   : > { %4815 = vmatpush3.bf16.xpose.msk.msra.mxu0 %vm6823_vm14, %v5042_v26  ;;  %v3180_v19 = vadd.s32 %v6956_v1, %v3115_v47  ;;  %vm3242_vm11 = vcmp.lt.s32.totalorder %v3178_v40, 768  ;;  %v3179_v53 = vadd.s32 %v6956_v1, %v3114_v12  ;;  %v3182_v5 = vadd.s32 %v6956_v1, %v3117_v14  ;;  %v4885_v12 = vld [vmem:[%s5163_s30 + $0x28] sm:$0xff] }
 0x378   : > { %4817 = vmatprep.subr.msk.bf16.mxu0 %vm4816_vm6, %v5042_v26  ;;  %v3181_v25 = vadd.s32 %v6956_v1, %v3116_v30  ;;  %v7008_v20 = vsel %vm3235_vm10, 1.0, %v5043_v57  ;;  %v3184_v61 = vadd.s32 %v6956_v1, %v3119_v8  ;;  %v3118_v49 = vadd.s32 128, %v6950_v9 }
 0x379   : > { %v7021_v13 = vsel %vm3238_vm12, 1.0, %v5043_v57  ;;  %v7025_v43 = vsel %vm3237_vm15, 1.0, %v5043_v57  ;;  %v7029_v37 = vsel %vm3240_vm0, 1.0, %v5043_v57  ;;  %v3121_v2 = vadd.s32 152, %v6950_v9 }
 0x37a   : > { %v7034_v62 = vsel %vm3239_vm7, 1.0, %v5043_v57  ;;  %v7038_v4 = vsel %vm3242_vm11, 1.0, %v5043_v57  ;;  %vm3241_vm8 = vcmp.lt.s32.totalorder %v3177_v36, 768  ;;  %vm3244_vm6 = vcmp.lt.s32.totalorder %v3180_v19, 768 }
 0x37b   : > { %vm3243_vm2 = vcmp.lt.s32.totalorder %v3179_v53, 768  ;;  %vm3246_vm13 = vcmp.lt.s32.totalorder %v3182_v5, 768  ;;  %v3120_v59 = vadd.s32 144, %v6950_v9  ;;  %vm8052_vm3 = vcmask 261120  }
 0x37c   : > { %vm3248_vm4 = vcmp.lt.s32.totalorder %v3184_v61, 768  ;;  %v3183_v16 = vadd.s32 %v6956_v1, %v3118_v49  ;;  %v3123_v52 = vadd.s32 168, %v6950_v9  ;;  %v7051_v17 = vsel %vm3241_vm8, 1.0, %v5043_v57  ;;  %vm8055_vm10 = vmmov %vm8052_vm3 }
 0x37d   : > { %v3186_v51 = vadd.s32 %v6956_v1, %v3121_v2  ;;  %v3122_v34 = vadd.s32 160, %v6950_v9  ;;  %v7058_v46 = vsel %vm3244_vm6, 1.0, %v5043_v57  ;;  %v7062_v29 = vsel %vm3243_vm2, 1.0, %v5043_v57  ;;  %vm8056_vm15 = vmmov %vm8052_vm3 }
 0x37e   : > { %v7066_v28 = vsel %vm3246_vm13, 1.0, %v5043_v57  ;;  %v3185_v22 = vadd.s32 %v6956_v1, %v3120_v59  ;;  %v3188_v41 = vadd.s32 %v6956_v1, %v3123_v52  ;;  %v3125_v7 = vadd.s32 184, %v6950_v9  ;;  %vm8057_vm0 = vmmov %vm8052_vm3 }
 0x37f   : > { %4819 = vmatpush3.bf16.xpose.msk.msra.mxu0 %vm6833_vm9, %v5042_v26  ;;  %vm3233_vm9 = vcmp.lt.s32.totalorder %v3169_v38, 768  ;;  %vm3250_vm12 = vcmp.lt.s32.totalorder %v3186_v51, 768  ;;  %v3124_v35 = vadd.s32 176, %v6950_v9  ;;  %vm8058_vm11 = vmmov %vm8057_vm0  ;;  %v3126_v59 = vadd.s32 192, %v6950_v9  ;;  %v4888_v51 = vld [vmem:[%s5163_s30 + $0x30] sm:$0xff] }
 0x380   : > { %4821 = vmatprep.subr.msk.bf16.mxu0 %vm4820_vm1, %v5042_v26  ;;  %v6994_v15 = vsel %vm3233_vm9, 1.0, %v5043_v57  ;;  %vm3245_vm1 = vcmp.lt.s32.totalorder %v3181_v25, 768  ;;  %vm8054_vm9 = vmmov %vm8052_vm3  ;;  %vm3249_vm7 = vcmp.lt.s32.totalorder %v3185_v22, 768  ;;  %vm3252_vm8 = vcmp.lt.s32.totalorder %v3188_v41, 768  ;;  %v4889_v41 = vld [vmem:[%s5163_s30 + $0x48] sm:$0xff] }
 0x381   : > { %v7071_v18 = vsel %vm3245_vm1, 1.0, %v5043_v57  ;;  %vm8059_vm6 = vmmov %vm8057_vm0  ;;  %v7107_v53 = vsel %vm3249_vm7, 1.0, %v5043_v57  ;;  %v3190_v5 = vadd.s32 %v6956_v1, %v3125_v7  ;;  %v3189_v25 = vadd.s32 %v6956_v1, %v3124_v35 }
 0x382   : > { %vm8060_vm13 = vmmov %vm8057_vm0 }
 0x383   : > { %vm8061_vm1 = vmmov %vm8057_vm0 }
 0x387   : > { %4823 = vmatpush3.bf16.xpose.msk.msra.mxu0 %vm6850_vm5, %v5042_v26  ;;  %v3170_v26 = vadd.s32 %v6956_v1, %v3105_v0  ;;  %vm3236_vm5 = vcmp.lt.s32.totalorder %v3172_v60, 768 }
 0x388   : > { %v7005_v24 = vsel %vm3236_vm5, 1.0, %v5043_v57  ;;  %vm3247_vm5 = vcmp.lt.s32.totalorder %v3183_v16, 768  ;;  %v7120_v16 = vsel %vm3252_vm8, 1.0, %v5043_v57  ;;  %vm8068_vm8 = vmmov %vm8057_vm0 }
 0x389   : > { %vm3234_vm14 = vcmp.lt.s32.totalorder %v3170_v26, 768  ;;  %v7075_v26 = vsel %vm3248_vm4, 1.0, %v5043_v57  ;;  %v7093_v47 = vsel %vm3247_vm5, 1.0, %v5043_v57  ;;  %vm8063_vm4 = vmmov %vm8057_vm0 }
 0x38a   : > { %v6991_v11 = vsel %vm3234_vm14, 1.0, %v5043_v57  ;;  %vm8053_vm14 = vmmov %vm8052_vm3 }
 0x38b   : > { %vm8064_vm5 = vmmov %vm8057_vm0 }
 0x38e   : > { %4423 = vmatmul.mubr.f32.vlgmr.msra.gmra.mrb[64].mxu0 %v2885_v45 }
 0x3c1   : > { %v4586_v63 = vpop.f32.mrb[0].mxu1 }
 0x3c2   : > { %2822 = vst.msk [vmem:[%s7017_s26 + $0x8] sm:$0xff] %vm8052_vm3, %v4586_v63  ;;  %v3037_v54 = vsub.f32 %v4586_v63, %v4881_v23  ;;  %v2502_v58 = vpop.f32.mrb[1].mxu1  ;;  %v3127_v63 = vadd.s32 200, %v6950_v9  ;;  %vm8062_vm3 = vmmov %vm8057_vm0 }
 0x3c3   : > { %2821 = vst.msk [vmem:[%s7017_s26] sm:$0xff] %vm8053_vm14, %v2502_v58  ;;  %v3036_v44 = vsub.f32 %v2502_v58, %v4882_v21  ;;  %vm3254_vm14 = vcmp.lt.s32.totalorder %v3190_v5, 768 }
 0x3c4   : > { %v3424_v31 = vmul.f32 %v6973_v42, %v3037_v54 }
 0x3c5   : > { %v3423_v27 = vmul.f32 %v6976_v6, %v3036_v44  ;;  %v4589_v0 = vpop.f32.mrb[2].mxu1  ;;  %v3187_v6 = vadd.s32 %v6956_v1, %v3122_v34 }
 0x3c6   : > { %v3488_v38 = vmul.f32 %v3424_v31, %v3424_v31  ;;  %2824 = vst.msk [vmem:[%s7017_s26 + $0x18] sm:$0xff] %vm8054_vm9, %v4589_v0  ;;  %v3039_v48 = vsub.f32 %v4589_v0, %v4883_v55  ;;  %v2512_v56 = vpop.f32.mrb[3].mxu1  ;;  %vm3253_vm9 = vcmp.lt.s32.totalorder %v3189_v25, 768  ;;  %v3192_v55 = vadd.s32 %v6956_v1, %v3127_v63 }
 0x3c7   : > { %v3487_v32 = vmul.f32 %v3423_v27, %v3423_v27  ;;  %2823 = vst.msk [vmem:[%s7017_s26 + $0x10] sm:$0xff] %vm8055_vm10, %v2512_v56  ;;  %v3038_v42 = vsub.f32 %v2512_v56, %v4884_v3  ;;  %vm3251_vm2 = vcmp.lt.s32.totalorder %v3187_v6, 768  ;;  %vm8065_vm10 = vmmov %vm8057_vm0  ;;  %v3131_v63 = vadd.s32 232, %v6950_v9 }
 0x3c8   : > { %v3552_v60 = vsel %vm8056_vm15, %v3488_v38, 0.0  ;;  %v3426_v33 = vmul.f32 %v6991_v11, %v3039_v48  ;;  %v7100_v11 = vsel %vm3250_vm12, 1.0, %v5043_v57  ;;  %v7124_v52 = vsel %vm3251_vm2, 1.0, %v5043_v57  ;;  %vm8066_vm12 = vmmov %vm8057_vm0 }
 0x3c9   : > { %v3551_v50 = vsel %vm8057_vm0, %v3487_v32, 0.0  ;;  %v3425_v39 = vmul.f32 %v6994_v15, %v3038_v42  ;;  %v4592_v10 = vpop.f32.mrb[4].mxu1  ;;  %v4886_v15 = vld [vmem:[%s5163_s30 + $0x20] sm:$0xff]  ;;  %v3191_v48 = vadd.s32 %v6956_v1, %v3126_v59  ;;  %v3128_v42 = vadd.s32 208, %v6950_v9  ;;  %vm8067_vm15 = vmmov %vm8057_vm0 }
 0x3ca   : > { %v3553_v40 = vadd.f32 %v3552_v60, %v3551_v50  ;;  %2826 = vst.msk [vmem:[%s7017_s26 + $0x28] sm:$0xff] %vm8058_vm11, %v4592_v10  ;;  %v3041_v14 = vsub.f32 %v4592_v10, %v4885_v12  ;;  %v2522_v30 = vpop.f32.mrb[5].mxu1  ;;  %v3490_v8 = vmul.f32 %v3426_v33, %v3426_v33  ;;  %v4890_v33 = vld [vmem:[%s5163_s30 + $0x40] sm:$0xff]  ;;  %v7151_v10 = vsel %vm3253_vm9, 1.0, %v5043_v57  ;;  %vm8070_vm2 = vmmov %vm8057_vm0 }
 0x3cb   : > { %v3489_v45 = vmul.f32 %v3425_v39, %v3425_v39  ;;  %2825 = vst.msk [vmem:[%s7017_s26 + $0x20] sm:$0xff] %vm8059_vm6, %v2522_v30  ;;  %v3040_v36 = vsub.f32 %v2522_v30, %v4886_v15  ;;  %v7147_v39 = vsel %vm3254_vm14, 1.0, %v5043_v57  ;;  %vm3256_vm7 = vcmp.lt.s32.totalorder %v3192_v55, 768  ;;  %vm8069_vm6 = vmmov %vm8057_vm0 }
 0x3cc   : > { %v3428_v19 = vmul.f32 %v7005_v24, %v3041_v14  ;;  %v4887_v24 = vld [vmem:[%s5163_s30 + $0x38] sm:$0xff]  ;;  %vm3255_vm11 = vcmp.lt.s32.totalorder %v3191_v48, 768  ;;  %v3130_v59 = vadd.s32 224, %v6950_v9  ;;  %vm8073_vm14 = vmmov %vm8057_vm0  ;;  %v3196_v55 = vadd.s32 %v6956_v1, %v3131_v63 }
 0x3cd   : > { %v3554_v61 = vsel %vm8060_vm13, %v3489_v45, 0.0  ;;  %v3427_v49 = vmul.f32 %v7008_v20, %v3040_v36  ;;  %v4595_v2 = vpop.f32.mrb[6].mxu1  ;;  %v3556_v20 = vsel %vm8062_vm3, %v3490_v8, 0.0  ;;  %v3193_v36 = vadd.s32 %v6956_v1, %v3128_v42  ;;  %vm8071_vm13 = vmmov %vm8057_vm0 }
 0x3ce   : > { %v3555_v23 = vadd.f32 %v3554_v61, %v3553_v40  ;;  %2828 = vst.msk [vmem:[%s7017_s26 + $0x38] sm:$0xff] %vm8061_vm1, %v4595_v2  ;;  %v3043_v54 = vsub.f32 %v4595_v2, %v4887_v24  ;;  %v2532_v58 = vpop.f32.mrb[7].mxu1  ;;  %v3492_v21 = vmul.f32 %v3428_v19, %v3428_v19  ;;  %vm8072_vm1 = vmmov %vm8057_vm0  ;;  %v3195_v48 = vadd.s32 %v6956_v1, %v3130_v59 }
 0x3cf   : > { %v3491_v44 = vmul.f32 %v3427_v49, %v3427_v49  ;;  %2827 = vst.msk [vmem:[%s7017_s26 + $0x30] sm:$0xff] %vm8063_vm4, %v2532_v58  ;;  %v3042_v34 = vsub.f32 %v2532_v58, %v4888_v51  ;;  %v7171_v58 = vsel %vm3256_vm7, 1.0, %v5043_v57  ;;  %vm3257_vm4 = vcmp.lt.s32.totalorder %v3193_v36, 768  ;;  %vm8074_vm9 = vmmov %vm8057_vm0 }
 0x3d0   : > { %v3557_v31 = vadd.f32 %v3556_v20, %v3555_v23  ;;  %v3430_v27 = vmul.f32 %v7021_v13, %v3043_v54  ;;  %v3129_v13 = vadd.s32 216, %v6950_v9  ;;  %v3560_v6 = vsel %vm8066_vm12, %v3492_v21, 0.0  ;;  %v4893_v21 = vld [vmem:[%s5163_s30 + $0x68] sm:$0xff]  ;;  %vm8077_vm12 = vmmov %vm8057_vm0 }
 0x3d1   : > { %v3558_v0 = vsel %vm8064_vm5, %v3491_v44, 0.0  ;;  %v3429_v22 = vmul.f32 %v7025_v43, %v3042_v34  ;;  %v4598_v38 = vpop.f32.mrb[8].mxu1  ;;  %v7175_v20 = vsel %vm3255_vm11, 1.0, %v5043_v57  ;;  %vm8075_vm5 = vmmov %vm8057_vm0  ;;  %vm3259_vm7 = vcmp.lt.s32.totalorder %v3195_v48, 768 }
 0x3d2   : > { %v3559_v56 = vadd.f32 %v3558_v0, %v3557_v31  ;;  %2830 = vst.msk [vmem:[%s7017_s26 + $0x48] sm:$0xff] %vm8065_vm10, %v4598_v38  ;;  %v3045_v32 = vsub.f32 %v4598_v38, %v4889_v41  ;;  %v2542_v3 = vpop.f32.mrb[9].mxu1  ;;  %v3494_v60 = vmul.f32 %v3430_v27, %v3430_v27  ;;  %v3194_v15 = vadd.s32 %v6956_v1, %v3129_v13  ;;  %v4894_v27 = vld [vmem:[%s5163_s30 + $0x60] sm:$0xff]  ;;  %vm8076_vm10 = vmmov %vm8057_vm0 }
 0x3d3   : > { %v3493_v43 = vmul.f32 %v3429_v22, %v3429_v22  ;;  %2829 = vst.msk [vmem:[%s7017_s26 + $0x40] sm:$0xff] %vm8067_vm15, %v2542_v3  ;;  %v3044_v7 = vsub.f32 %v2542_v3, %v4890_v33  ;;  %v3133_v3 = vadd.s32 248, %v6950_v9  ;;  %v3132_v13 = vadd.s32 240, %v6950_v9  ;;  %vm8078_vm15 = vmmov %vm8057_vm0 }
 0x3d4   : > { %v3561_v35 = vadd.f32 %v3560_v6, %v3559_v56  ;;  %v3432_v50 = vmul.f32 %v7029_v37, %v3045_v32  ;;  %v4891_v37 = vld [vmem:[%s5163_s30 + $0x58] sm:$0xff]  ;;  %v3564_v19 = vsel %vm8069_vm6, %v3494_v60, 0.0  ;;  %vm3258_vm3 = vcmp.lt.s32.totalorder %v3194_v15, 768  ;;  %vm8079_vm11 = vmmov %vm8072_vm1 }
 0x3d5   : > { %v3562_v40 = vsel %vm8057_vm0, %v3493_v43, 0.0  ;;  %v3431_v12 = vmul.f32 %v7034_v62, %v3044_v7  ;;  %v4601_v14 = vpop.f32.mrb[10].mxu1  ;;  %v4892_v62 = vld [vmem:[%s5163_s30 + $0x50] sm:$0xff]  ;;  %v4895_v6 = vld [vmem:[%s5163_s30 + $0x78] sm:$0xff]  ;;  %v7196_v43 = vsel %vm3258_vm3, 1.0, %v5043_v57  ;;  %v7200_v33 = vsel %vm3257_vm4, 1.0, %v5043_v57  ;;  %vm8081_vm6 = vmmov %vm8072_vm1 }
 0x3d6   : > { %v3563_v30 = vadd.f32 %v3562_v40, %v3561_v35  ;;  %2832 = vst.msk [vmem:[%s7017_s26 + $0x58] sm:$0xff] %vm8068_vm8, %v4601_v14  ;;  %v3047_v8 = vsub.f32 %v4601_v14, %v4891_v37  ;;  %v2552_v45 = vpop.f32.mrb[11].mxu1  ;;  %v3496_v5 = vmul.f32 %v3432_v50, %v3432_v50  ;;  %v4896_v50 = vld [vmem:[%s5163_s30 + $0x70] sm:$0xff]  ;;  %vm3260_vm0 = vcmp.lt.s32.totalorder %v3196_v55, 768  ;;  %vm8080_vm8 = vmmov %vm8072_vm1 }
 0x3d7   : > { %v3495_v25 = vmul.f32 %v3431_v12, %v3431_v12  ;;  %2831 = vst.msk [vmem:[%s7017_s26 + $0x50] sm:$0xff] %vm8070_vm2, %v2552_v45  ;;  %v3046_v61 = vsub.f32 %v2552_v45, %v4892_v62  ;;  %v3198_v45 = vadd.s32 %v6956_v1, %v3133_v3  ;;  %v3197_v15 = vadd.s32 %v6956_v1, %v3132_v13  ;;  %vm8082_vm2 = vmmov %vm8072_vm1 }
 0x3d8   : > { %v3565_v49 = vadd.f32 %v3564_v19, %v3563_v30  ;;  %v3434_v2 = vmul.f32 %v7038_v4, %v3047_v8  ;;  %v3568_v34 = vsel %vm8073_vm14, %v3496_v5, 0.0  ;;  %v4897_v19 = vld [vmem:[%s5163_s30 + $0x88] sm:$0xff]  ;;  %v3134_v62 = vadd.s32 256, %v6950_v9  ;;  %vm8084_vm4 = vmmov %vm8082_vm2 }
 0x3d9   : > { %v3566_v23 = vsel %vm8071_vm13, %v3495_v25, 0.0  ;;  %v3433_v24 = vmul.f32 %v7051_v17, %v3046_v61  ;;  %v4604_v54 = vpop.f32.mrb[12].mxu1  ;;  %vm8083_vm13 = vmmov %vm8072_vm1  ;;  %vm3261_vm3 = vcmp.lt.s32.totalorder %v3197_v15, 768 }
 0x3da   : > { %v3567_v4 = vadd.f32 %v3566_v23, %v3565_v49  ;;  %2834 = vst.msk [vmem:[%s7017_s26 + $0x68] sm:$0xff] %vm8072_vm1, %v4604_v54  ;;  %v3049_v44 = vsub.f32 %v4604_v54, %v4893_v21  ;;  %v2562_v51 = vpop.f32.mrb[13].mxu1  ;;  %v3498_v17 = vmul.f32 %v3434_v2, %v3434_v2  ;;  %v4898_v2 = vld [vmem:[%s5163_s30 + $0x80] sm:$0xff]  ;;  %v7227_v54 = vsel %vm3259_vm7, 1.0, %v5043_v57  ;;  %vm8085_vm14 = vmmov %vm8082_vm2 }
 0x3db   : > { %v3497_v31 = vmul.f32 %v3433_v24, %v3433_v24  ;;  %2833 = vst.msk [vmem:[%s7017_s26 + $0x60] sm:$0xff] %vm8074_vm9, %v2562_v51  ;;  %v3048_v0 = vsub.f32 %v2562_v51, %v4894_v27  ;;  %v7223_v24 = vsel %vm3260_vm0, 1.0, %v5043_v57  ;;  %vm3262_vm1 = vcmp.lt.s32.totalorder %v3198_v45, 768  ;;  %vm8086_vm9 = vmmov %vm8082_vm2 }
 0x3dc   : > { %v3569_v22 = vadd.f32 %v3568_v34, %v3567_v4  ;;  %v3436_v38 = vmul.f32 %v7058_v46, %v3049_v44  ;;  %v3199_v27 = vadd.s32 %v6956_v1, %v3134_v62  ;;  %vm8089_vm0 = vmmov %vm8082_vm2 }
 0x3dd   : > { %v3570_v56 = vsel %vm8075_vm5, %v3497_v31, 0.0  ;;  %v3435_v41 = vmul.f32 %v7062_v29, %v3048_v0  ;;  %v4607_v32 = vpop.f32.mrb[14].mxu1  ;;  %v3572_v29 = vsel %vm8077_vm12, %v3498_v17, 0.0  ;;  %vm8087_vm5 = vmmov %vm8082_vm2 }
 0x3de   : > { %v3571_v42 = vadd.f32 %v3570_v56, %v3569_v22  ;;  %2836 = vst.msk [vmem:[%s7017_s26 + $0x78] sm:$0xff] %vm8076_vm10, %v4607_v32  ;;  %v3051_v46 = vsub.f32 %v4607_v32, %v4895_v6  ;;  %v2572_v60 = vpop.f32.mrb[15].mxu1  ;;  %v3500_v7 = vmul.f32 %v3436_v38, %v3436_v38  ;;  %v3136_v32 = vadd.s32 272, %v6950_v9  ;;  %vm8088_vm10 = vmmov %vm8082_vm2 }
 0x3df   : > { %v3499_v35 = vmul.f32 %v3435_v41, %v3435_v41  ;;  %2835 = vst.msk [vmem:[%s7017_s26 + $0x70] sm:$0xff] %vm8078_vm15, %v2572_v60  ;;  %v3050_v40 = vsub.f32 %v2572_v60, %v4896_v50  ;;  %v3137_v41 = vadd.s32 280, %v6950_v9  ;;  %v7247_v6 = vsel %vm3262_vm1, 1.0, %v5043_v57  ;;  %v4901_v60 = vld [vmem:[%s5163_s30 + $0xa8] sm:$0xff]  ;;  %vm8090_vm7 = vmmov %vm8089_vm0 }
 0x3e0   : > { %v3573_v12 = vadd.f32 %v3572_v29, %v3571_v42  ;;  %v3438_v14 = vmul.f32 %v7066_v28, %v3051_v46  ;;  %v3135_v28 = vadd.s32 264, %v6950_v9  ;;  %v3576_v61 = vsel %vm8081_vm6, %v3500_v7, 0.0  ;;  %vm8093_vm6 = vmmov %vm8089_vm0 }
 0x3e1   : > { %v3574_v30 = vsel %vm8079_vm11, %v3499_v35, 0.0  ;;  %v3437_v37 = vmul.f32 %v7071_v18, %v3050_v40  ;;  %v4610_v8 = vpop.f32.mrb[16].mxu1  ;;  %v7251_v46 = vsel %vm3261_vm3, 1.0, %v5043_v57  ;;  %vm3263_vm15 = vcmp.lt.s32.totalorder %v3199_v27, 768  ;;  %v4902_v40 = vld [vmem:[%s5163_s30 + $0xa0] sm:$0xff]  ;;  %vm8091_vm11 = vmmov %vm8089_vm0 }
 0x3e2   : > { %v3575_v36 = vadd.f32 %v3574_v30, %v3573_v12  ;;  %2838 = vst.msk [vmem:[%s7017_s26 + $0x88] sm:$0xff] %vm8080_vm8, %v4610_v8  ;;  %v3053_v5 = vsub.f32 %v4610_v8, %v4897_v19  ;;  %v2582_v25 = vpop.f32.mrb[17].mxu1  ;;  %v3502_v49 = vmul.f32 %v3438_v14, %v3438_v14  ;;  %v3200_v31 = vadd.s32 %v6956_v1, %v3135_v28  ;;  %vm8092_vm8 = vmmov %vm8089_vm0  ;;  %v4903_v28 = vld [vmem:[%s5163_s30 + $0xb8] sm:$0xff] }
 0x3e3   : > { %v3501_v18 = vmul.f32 %v3437_v37, %v3437_v37  ;;  %2837 = vst.msk [vmem:[%s7017_s26 + $0x80] sm:$0xff] %vm8082_vm2, %v2582_v25  ;;  %v3052_v63 = vsub.f32 %v2582_v25, %v4898_v2  ;;  %v3202_v37 = vadd.s32 %v6956_v1, %v3137_v41  ;;  %v3201_v8 = vadd.s32 %v6956_v1, %v3136_v32  ;;  %vm8094_vm2 = vmmov %vm8089_vm0 }
 0x3e4   : > { %v3577_v59 = vadd.f32 %v3576_v61, %v3575_v36  ;;  %v3440_v23 = vmul.f32 %v7075_v26, %v3053_v5  ;;  %v4899_v26 = vld [vmem:[%s5163_s30 + $0x98] sm:$0xff]  ;;  %v3580_v0 = vsel %vm8085_vm14, %v3502_v49, 0.0  ;;  %vm3264_vm12 = vcmp.lt.s32.totalorder %v3200_v31, 768  ;;  %vm8095_vm3 = vmmov %vm8089_vm0  ;;  %v4905_v31 = vld [vmem:[%s5163_s30 + $0xc8] sm:$0xff] }
 0x3e5   : > { %v3578_v4 = vsel %vm8083_vm13, %v3501_v18, 0.0  ;;  %v3439_v21 = vmul.f32 %v7093_v47, %v3052_v63  ;;  %v4613_v44 = vpop.f32.mrb[18].mxu1  ;;  %v4900_v47 = vld [vmem:[%s5163_s30 + $0x90] sm:$0xff]  ;;  %v3139_v19 = vadd.s32 296, %v6950_v9  ;;  %v3138_v5 = vadd.s32 288, %v6950_v9  ;;  %vm8097_vm14 = vmmov %vm8089_vm0 }
 0x3e6   : > { %v3579_v51 = vadd.f32 %v3578_v4, %v3577_v59  ;;  %2840 = vst.msk [vmem:[%s7017_s26 + $0x98] sm:$0xff] %vm8084_vm4, %v4613_v44  ;;  %v3055_v34 = vsub.f32 %v4613_v44, %v4899_v26  ;;  %v2592_v17 = vpop.f32.mrb[19].mxu1  ;;  %v3504_v22 = vmul.f32 %v3440_v23, %v3440_v23  ;;  %v7272_v61 = vsel %vm3264_vm12, 1.0, %v5043_v57  ;;  %v4904_v63 = vld [vmem:[%s5163_s30 + $0xb0] sm:$0xff]  ;;  %vm8096_vm4 = vmmov %vm8089_vm0 }
 0x3e7   : > { %v3503_v38 = vmul.f32 %v3439_v21, %v3439_v21  ;;  %2839 = vst.msk [vmem:[%s7017_s26 + $0x90] sm:$0xff] %vm8086_vm9, %v2592_v17  ;;  %v3054_v55 = vsub.f32 %v2592_v17, %v4900_v47  ;;  %v7276_v49 = vsel %vm3263_vm15, 1.0, %v5043_v57  ;;  %vm3266_vm13 = vcmp.lt.s32.totalorder %v3202_v37, 768  ;;  %vm8098_vm9 = vmmov %vm8089_vm0 }
 0x3e8   : > { %v3581_v48 = vadd.f32 %v3580_v0, %v3579_v51  ;;  %v3442_v56 = vmul.f32 %v7100_v11, %v3055_v34  ;;  %v3584_v35 = vsel %vm8089_vm0, %v3504_v22, 0.0  ;;  %vm3265_vm1 = vcmp.lt.s32.totalorder %v3201_v8, 768  ;;  %vm8100_vm15 = vmmov %vm8089_vm0 }
 0x3e9   : > { %v3582_v3 = vsel %vm8087_vm5, %v3503_v38, 0.0  ;;  %v3441_v13 = vmul.f32 %v7107_v53, %v3054_v55  ;;  %v4616_v42 = vpop.f32.mrb[20].mxu1  ;;  %v3204_v26 = vadd.s32 %v6956_v1, %v3139_v19  ;;  %v3203_v34 = vadd.s32 %v6956_v1, %v3138_v5  ;;  %v4906_v55 = vld [vmem:[%s5163_s30 + $0xc0] sm:$0xff]  ;;  %vm8099_vm5 = vmmov %vm8089_vm0 }
 0x3ea   : > { %v3583_v11 = vadd.f32 %v3582_v3, %v3581_v48  ;;  %2842 = vst.msk [vmem:[%s7017_s26 + $0xa8] sm:$0xff] %vm8088_vm10, %v4616_v42  ;;  %v3057_v29 = vsub.f32 %v4616_v42, %v4901_v60  ;;  %v2602_v7 = vpop.f32.mrb[21].mxu1  ;;  %v3506_v53 = vmul.f32 %v3442_v56, %v3442_v56  ;;  %v3140_v22 = vadd.s32 304, %v6950_v9 }
 0x3eb   : > { %v3505_v50 = vmul.f32 %v3441_v13, %v3441_v13  ;;  %2841 = vst.msk [vmem:[%s7017_s26 + $0xa0] sm:$0xff] %vm8090_vm7, %v2602_v7  ;;  %v3056_v12 = vsub.f32 %v2602_v7, %v4902_v40  ;;  %v7299_v32 = vsel %vm3266_vm13, 1.0, %v5043_v57  ;;  %v7303_v3 = vsel %vm3265_vm1, 1.0, %v5043_v57  ;;  %vm8101_vm7 = vmmov %vm8089_vm0 }
 0x3ec   : > { %v3585_v14 = vadd.f32 %v3584_v35, %v3583_v11  ;;  %v3444_v30 = vmul.f32 %v7120_v16, %v3057_v29  ;;  %vm3268_vm10 = vcmp.lt.s32.totalorder %v3204_v26, 768  ;;  %vm3267_vm12 = vcmp.lt.s32.totalorder %v3203_v34, 768  ;;  %vm8104_vm13 = vmmov %vm8089_vm0 }
 0x3ed   : > { %v3586_v45 = vsel %vm8091_vm11, %v3505_v50, 0.0  ;;  %v3443_v15 = vmul.f32 %v7124_v52, %v3056_v12  ;;  %v4619_v36 = vpop.f32.mrb[22].mxu1  ;;  %v3588_v52 = vsel %vm8093_vm6, %v3506_v53, 0.0  ;;  %v3205_v53 = vadd.s32 %v6956_v1, %v3140_v22  ;;  %vm8102_vm11 = vmmov %vm8089_vm0 }
 0x3ee   : > { %v3587_v25 = vadd.f32 %v3586_v45, %v3585_v14  ;;  %2844 = vst.msk [vmem:[%s7017_s26 + $0xb8] sm:$0xff] %vm8092_vm8, %v4619_v36  ;;  %v3059_v16 = vsub.f32 %v4619_v36, %v4903_v28  ;;  %v2612_v62 = vpop.f32.mrb[23].mxu1  ;;  %v3508_v18 = vmul.f32 %v3444_v30, %v3444_v30  ;;  %v3143_v8 = vadd.s32 328, %v6950_v9  ;;  %vm8103_vm8 = vmmov %vm8089_vm0  ;;  %v4909_v28 = vld [vmem:[%s5163_s30 + $0xe8] sm:$0xff] }
 0x3ef   : > { %v3507_v2 = vmul.f32 %v3443_v15, %v3443_v15  ;;  %2843 = vst.msk [vmem:[%s7017_s26 + $0xb0] sm:$0xff] %vm8094_vm2, %v2612_v62  ;;  %v3058_v59 = vsub.f32 %v2612_v62, %v4904_v63  ;;  %v3142_v45 = vadd.s32 320, %v6950_v9  ;;  %v7323_v5 = vsel %vm3268_vm10, 1.0, %v5043_v57  ;;  %vm8105_vm1 = vmmov %vm8089_vm0 }
 0x3f0   : > { %v3589_v23 = vadd.f32 %v3588_v52, %v3587_v25  ;;  %v3446_v4 = vmul.f32 %v7147_v39, %v3059_v16  ;;  %v3141_v39 = vadd.s32 312, %v6950_v9  ;;  %v3592_v38 = vsel %vm8097_vm14, %v3508_v18, 0.0  ;;  %vm8108_vm14 = vmmov %vm8089_vm0 }
 0x3f1   : > { %v3590_v21 = vsel %vm8095_vm3, %v3507_v2, 0.0  ;;  %v3445_v44 = vmul.f32 %v7151_v10, %v3058_v59  ;;  %v4622_v51 = vpop.f32.mrb[24].mxu1  ;;  %v7327_v25 = vsel %vm3267_vm12, 1.0, %v5043_v57  ;;  %vm3269_vm2 = vcmp.lt.s32.totalorder %v3205_v53, 768  ;;  %v4910_v2 = vld [vmem:[%s5163_s30 + $0xe0] sm:$0xff]  ;;  %vm8106_vm3 = vmmov %vm8089_vm0 }
 0x3f2   : > { %v3591_v17 = vadd.f32 %v3590_v21, %v3589_v23  ;;  %2846 = vst.msk [vmem:[%s7017_s26 + $0xc8] sm:$0xff] %vm8096_vm4, %v4622_v51  ;;  %v3061_v27 = vsub.f32 %v4622_v51, %v4905_v31  ;;  %v2622_v0 = vpop.f32.mrb[25].mxu1  ;;  %v3510_v47 = vmul.f32 %v3446_v4, %v3446_v4  ;;  %v3206_v35 = vadd.s32 %v6956_v1, %v3141_v39  ;;  %vm8107_vm4 = vmmov %vm8089_vm0 }
 0x3f3   : > { %v3509_v10 = vmul.f32 %v3445_v44, %v3445_v44  ;;  %2845 = vst.msk [vmem:[%s7017_s26 + $0xc0] sm:$0xff] %vm8098_vm9, %v2622_v0  ;;  %v3060_v48 = vsub.f32 %v2622_v0, %v4906_v55  ;;  %v3208_v4 = vadd.s32 %v6956_v1, %v3143_v8  ;;  %v3207_v21 = vadd.s32 %v6956_v1, %v3142_v45  ;;  %vm8109_vm9 = vmmov %vm8089_vm0 }
 0x3f4   : > { %v3593_v56 = vadd.f32 %v3592_v38, %v3591_v17  ;;  %v3448_v41 = vmul.f32 %v7171_v58, %v3061_v27  ;;  %v4907_v58 = vld [vmem:[%s5163_s30 + $0xd8] sm:$0xff]  ;;  %v3596_v50 = vsel %vm8089_vm0, %v3510_v47, 0.0  ;;  %vm3270_vm6 = vcmp.lt.s32.totalorder %v3206_v35, 768  ;;  %vm8110_vm12 = vmmov %vm8089_vm0 }
 0x3f5   : > { %v3594_v13 = vsel %vm8099_vm5, %v3509_v10, 0.0  ;;  %v3447_v42 = vmul.f32 %v7175_v20, %v3060_v48  ;;  %v4625_v11 = vpop.f32.mrb[26].mxu1  ;;  %v4908_v20 = vld [vmem:[%s5163_s30 + $0xd0] sm:$0xff]  ;;  %v3145_v34 = vadd.s32 344, %v6950_v9  ;;  %v3144_v17 = vadd.s32 336, %v6950_v9  ;;  %v4911_v27 = vld [vmem:[%s5163_s30 + $0xf8] sm:$0xff] }
 0x3f6   : > { %v3595_v60 = vadd.f32 %v3594_v13, %v3593_v56  ;;  %2848 = vst.msk [vmem:[%s7017_s26 + $0xd8] sm:$0xff] %vm8100_vm15, %v4625_v11  ;;  %v3063_v29 = vsub.f32 %v4625_v11, %v4907_v58  ;;  %v2632_v7 = vpop.f32.mrb[27].mxu1  ;;  %v3512_v40 = vmul.f32 %v3448_v41, %v3448_v41  ;;  %v7348_v39 = vsel %vm3270_vm6, 1.0, %v5043_v57  ;;  %v4912_v10 = vld [vmem:[%s5163_s30 + $0xf0] sm:$0xff]  ;;  %vm8111_vm15 = vmmov %vm8089_vm0 }
 0x3f7   : > { %v3511_v12 = vmul.f32 %v3447_v42, %v3447_v42  ;;  %2847 = vst.msk [vmem:[%s7017_s26 + $0xd0] sm:$0xff] %vm8101_vm7, %v2632_v7  ;;  %v3062_v14 = vsub.f32 %v2632_v7, %v4908_v20  ;;  %v7352_v22 = vsel %vm3269_vm2, 1.0, %v5043_v57  ;;  %vm3272_vm5 = vcmp.lt.s32.totalorder %v3208_v4, 768  ;;  %vm8112_vm7 = vmmov %vm8089_vm0 }
 0x3f8   : > { %v3597_v30 = vadd.f32 %v3596_v50, %v3595_v60  ;;  %v3450_v37 = vmul.f32 %v7196_v43, %v3063_v29  ;;  %v3600_v52 = vsel %vm8104_vm13, %v3512_v40, 0.0  ;;  %vm3271_vm10 = vcmp.lt.s32.totalorder %v3207_v21, 768  ;;  %v4913_v29 = vld [vmem:[%s5163_s30 + $0x108] sm:$0xff]  ;;  %vm8114_vm2 = vmmov %vm8089_vm0 }
 0x3f9   : > { %v3598_v15 = vsel %vm8102_vm11, %v3511_v12, 0.0  ;;  %v3449_v36 = vmul.f32 %v7200_v33, %v3062_v14  ;;  %v4628_v19 = vpop.f32.mrb[28].mxu1  ;;  %v3210_v11 = vadd.s32 %v6956_v1, %v3145_v34  ;;  %v3209_v60 = vadd.s32 %v6956_v1, %v3144_v17  ;;  %v4914_v12 = vld [vmem:[%s5163_s30 + $0x100] sm:$0xff]  ;;  %vm8113_vm11 = vmmov %vm8089_vm0  ;;  %v4917_v17 = vld [vmem:[%s5163_s30 + $0x128] sm:$0xff] }
 0x3fa   : > { %v3599_v43 = vadd.f32 %v3598_v15, %v3597_v30  ;;  %2850 = vst.msk [vmem:[%s7017_s26 + $0xe8] sm:$0xff] %vm8103_vm8, %v4628_v19  ;;  %v3065_v16 = vsub.f32 %v4628_v19, %v4909_v28  ;;  %v2642_v62 = vpop.f32.mrb[29].mxu1  ;;  %v3514_v33 = vmul.f32 %v3450_v37, %v3450_v37  ;;  %v3146_v53 = vadd.s32 352, %v6950_v9  ;;  %vm8115_vm13 = vmmov %vm8089_vm0 }
 0x3fb   : > { %v3513_v18 = vmul.f32 %v3449_v36, %v3449_v36  ;;  %2849 = vst.msk [vmem:[%s7017_s26 + $0xe0] sm:$0xff] %vm8105_vm1, %v2642_v62  ;;  %v3064_v63 = vsub.f32 %v2642_v62, %v4910_v2  ;;  %v7375_v37 = vsel %vm3272_vm5, 1.0, %v5043_v57  ;;  %v7379_v8 = vsel %vm3271_vm10, 1.0, %v5043_v57  ;;  %vm8116_vm1 = vmmov %vm8089_vm0 }
 0x3fc   : > { %v3601_v59 = vadd.f32 %v3600_v52, %v3599_v43  ;;  %v3452_v23 = vmul.f32 %v7223_v24, %v3065_v16  ;;  %vm3274_vm8 = vcmp.lt.s32.totalorder %v3210_v11, 768  ;;  %vm3273_vm6 = vcmp.lt.s32.totalorder %v3209_v60, 768  ;;  %vm8119_vm5 = vmmov %vm8089_vm0 }
 0x3fd   : > { %v3602_v44 = vsel %vm8106_vm3, %v3513_v18, 0.0  ;;  %v3451_v51 = vmul.f32 %v7227_v54, %v3064_v63  ;;  %v4631_v26 = vpop.f32.mrb[30].mxu1  ;;  %v3604_v54 = vsel %vm8108_vm14, %v3514_v33, 0.0  ;;  %v3211_v62 = vadd.s32 %v6956_v1, %v3146_v53  ;;  %vm8117_vm3 = vmmov %vm8089_vm0 }
 0x3fe   : > { %v3603_v31 = vadd.f32 %v3602_v44, %v3601_v59  ;;  %2852 = vst.msk [vmem:[%s7017_s26 + $0xf8] sm:$0xff] %vm8107_vm4, %v4631_v26  ;;  %v3067_v24 = vsub.f32 %v4631_v26, %v4911_v27  ;;  %v2652_v0 = vpop.f32.mrb[31].mxu1  ;;  %v3516_v38 = vmul.f32 %v3452_v23, %v3452_v23  ;;  %v3149_v23 = vadd.s32 376, %v6950_v9  ;;  %vm8118_vm4 = vmmov %vm8089_vm0 }
 0x3ff   : > { %v3515_v47 = vmul.f32 %v3451_v51, %v3451_v51  ;;  %2851 = vst.msk [vmem:[%s7017_s26 + $0xf0] sm:$0xff] %vm8109_vm9, %v2652_v0  ;;  %v3066_v55 = vsub.f32 %v2652_v0, %v4912_v10  ;;  %v3148_v4 = vadd.s32 368, %v6950_v9  ;;  %v7399_v26 = vsel %vm3274_vm8, 1.0, %v5043_v57  ;;  %vm8120_vm10 = vmmov %vm8089_vm0 }
 0x400   : > { %v3605_v48 = vadd.f32 %v3604_v54, %v3603_v31  ;;  %v3454_v56 = vmul.f32 %v7247_v6, %v3067_v24  ;;  %v3147_v6 = vadd.s32 360, %v6950_v9  ;;  %v3608_v50 = vsel %vm8089_vm0, %v3516_v38, 0.0  ;;  %v4918_v54 = vld [vmem:[%s5163_s30 + $0x120] sm:$0xff] }
 0x401   : > { %v3606_v41 = vsel %vm8110_vm12, %v3515_v47, 0.0  ;;  %v3453_v13 = vmul.f32 %v7251_v46, %v3066_v55  ;;  %v4634_v42 = vpop.f32.mrb[32].mxu1  ;;  %v7403_v34 = vsel %vm3273_vm6, 1.0, %v5043_v57  ;;  %vm3275_vm9 = vcmp.lt.s32.totalorder %v3211_v62, 768  ;;  %vm8121_vm12 = vmmov %vm8089_vm0 }
 0x402   : > { %v3607_v58 = vadd.f32 %v3606_v41, %v3605_v48  ;;  %2854 = vst.msk [vmem:[%s7017_s26 + $0x108] sm:$0xff] %vm8111_vm15, %v4634_v42  ;;  %v3069_v7 = vsub.f32 %v4634_v42, %v4913_v29  ;;  %v2662_v35 = vpop.f32.mrb[33].mxu1  ;;  %v3518_v40 = vmul.f32 %v3454_v56, %v3454_v56  ;;  %v3212_v16 = vadd.s32 %v6956_v1, %v3147_v6  ;;  %vm8122_vm15 = vmmov %vm8089_vm0 }
 0x403   : > { %v3517_v46 = vmul.f32 %v3453_v13, %v3453_v13  ;;  %2853 = vst.msk [vmem:[%s7017_s26 + $0x100] sm:$0xff] %vm8112_vm7, %v2662_v35  ;;  %v3068_v20 = vsub.f32 %v2662_v35, %v4914_v12  ;;  %v3214_v55 = vadd.s32 %v6956_v1, %v3149_v23  ;;  %v3213_v48 = vadd.s32 %v6956_v1, %v3148_v4  ;;  %vm8123_vm7 = vmmov %vm8089_vm0 }
 0x404   : > { %v3609_v14 = vadd.f32 %v3608_v50, %v3607_v58  ;;  %v3456_v30 = vmul.f32 %v7272_v61, %v3069_v7  ;;  %v4915_v61 = vld [vmem:[%s5163_s30 + $0x118] sm:$0xff]  ;;  %v3612_v52 = vsel %vm8115_vm13, %v3518_v40, 0.0  ;;  %vm3276_vm14 = vcmp.lt.s32.totalorder %v3212_v16, 768  ;;  %v4920_v50 = vld [vmem:[%s5163_s30 + $0x130] sm:$0xff]  ;;  %vm8124_vm6 = vmmov %vm8089_vm0 }
 0x405   : > { %v3610_v45 = vsel %vm8113_vm11, %v3517_v46, 0.0  ;;  %v3455_v15 = vmul.f32 %v7276_v49, %v3068_v20  ;;  %v4637_v36 = vpop.f32.mrb[34].mxu1  ;;  %v4916_v49 = vld [vmem:[%s5163_s30 + $0x110] sm:$0xff]  ;;  %v3151_v42 = vadd.s32 392, %v6950_v9  ;;  %v3150_v11 = vadd.s32 384, %v6950_v9  ;;  %v4919_v58 = vld [vmem:[%s5163_s30 + $0x138] sm:$0xff]  ;;  %vm8126_vm13 = vmmov %vm8089_vm0 }
 0x406   : > { %v3611_v19 = vadd.f32 %v3610_v45, %v3609_v14  ;;  %2856 = vst.msk [vmem:[%s7017_s26 + $0x118] sm:$0xff] %vm8114_vm2, %v4637_v36  ;;  %v3071_v43 = vsub.f32 %v4637_v36, %v4915_v61  ;;  %v2672_v28 = vpop.f32.mrb[35].mxu1  ;;  %v3520_v33 = vmul.f32 %v3456_v30, %v3456_v30  ;;  %v7424_v7 = vsel %vm3276_vm14, 1.0, %v5043_v57  ;;  %vm8125_vm2 = vmmov %vm8089_vm0 }
 0x407   : > { %v3519_v18 = vmul.f32 %v3455_v15, %v3455_v15  ;;  %2855 = vst.msk [vmem:[%s7017_s26 + $0x110] sm:$0xff] %vm8116_vm1, %v2672_v28  ;;  %v3070_v2 = vsub.f32 %v2672_v28, %v4916_v49  ;;  %v7428_v35 = vsel %vm3275_vm9, 1.0, %v5043_v57  ;;  %vm3278_vm11 = vcmp.lt.s32.totalorder %v3214_v55, 768  ;;  %vm8127_vm1 = vmmov %vm8089_vm0 }
 0x408   : > { %v3613_v63 = vadd.f32 %v3612_v52, %v3611_v19  ;;  %v3458_v59 = vmul.f32 %v7299_v32, %v3071_v43  ;;  %v3616_v24 = vsel %vm8119_vm5, %v3520_v33, 0.0  ;;  %vm3277_vm8 = vcmp.lt.s32.totalorder %v3213_v48, 768  ;;  %v4921_v19 = vld [vmem:[%s5163_s30 + $0x148] sm:$0xff]  ;;  %v4922_v52 = vld [vmem:[%s5163_s30 + $0x140] sm:$0xff]  ;;  %vm8129_vm9 = vmmov %vm8089_vm0 }
 0x409   : > { %v3614_v21 = vsel %vm8117_vm3, %v3519_v18, 0.0  ;;  %v3457_v44 = vmul.f32 %v7303_v3, %v3070_v2  ;;  %v4640_v51 = vpop.f32.mrb[36].mxu1  ;;  %v3216_v45 = vadd.s32 %v6956_v1, %v3151_v42  ;;  %v3215_v15 = vadd.s32 %v6956_v1, %v3150_v11  ;;  %vm8128_vm3 = vmmov %vm8089_vm0 }
 0x40a   : > { %v3615_v32 = vadd.f32 %v3614_v21, %v3613_v63  ;;  %2858 = vst.msk [vmem:[%s7017_s26 + $0x128] sm:$0xff] %vm8118_vm4, %v4640_v51  ;;  %v3073_v31 = vsub.f32 %v4640_v51, %v4917_v17  ;;  %v2682_v27 = vpop.f32.mrb[37].mxu1  ;;  %v3522_v3 = vmul.f32 %v3458_v59, %v3458_v59  ;;  %v3152_v28 = vadd.s32 400, %v6950_v9  ;;  %vm8130_vm5 = vmmov %vm8089_vm0 }
 0x40b   : > { %v3521_v0 = vmul.f32 %v3457_v44, %v3457_v44  ;;  %2857 = vst.msk [vmem:[%s7017_s26 + $0x120] sm:$0xff] %vm8120_vm10, %v2682_v27  ;;  %v3072_v38 = vsub.f32 %v2682_v27, %v4918_v54  ;;  %v7451_v2 = vsel %vm3278_vm11, 1.0, %v5043_v57  ;;  %v7455_v63 = vsel %vm3277_vm8, 1.0, %v5043_v57  ;;  %vm8131_vm10 = vmmov %vm8089_vm0 }
 0x40c   : > { %v3617_v47 = vadd.f32 %v3616_v24, %v3615_v32  ;;  %v3460_v10 = vmul.f32 %v7323_v5, %v3073_v31  ;;  %vm3280_vm4 = vcmp.lt.s32.totalorder %v3216_v45, 768  ;;  %vm3279_vm14 = vcmp.lt.s32.totalorder %v3215_v15, 768  ;;  %vm8134_vm11 = vmmov %vm8127_vm1  ;;  %v4927_v45 = vld [vmem:[%s5163_s30 + $0x178] sm:$0xff] }
 0x40d   : > { %v3618_v56 = vsel %vm8121_vm12, %v3521_v0, 0.0  ;;  %v3459_v41 = vmul.f32 %v7327_v25, %v3072_v38  ;;  %v4643_v13 = vpop.f32.mrb[38].mxu1  ;;  %v3620_v25 = vsel %vm8089_vm0, %v3522_v3, 0.0  ;;  %v3217_v17 = vadd.s32 %v6956_v1, %v3152_v28  ;;  %vm8132_vm12 = vmmov %vm8089_vm0 }
 0x40e   : > { %v3619_v60 = vadd.f32 %v3618_v56, %v3617_v47  ;;  %2860 = vst.msk [vmem:[%s7017_s26 + $0x138] sm:$0xff] %vm8122_vm15, %v4643_v13  ;;  %v3075_v5 = vsub.f32 %v4643_v13, %v4919_v58  ;;  %v2692_v29 = vpop.f32.mrb[39].mxu1  ;;  %v3524_v6 = vmul.f32 %v3460_v10, %v3460_v10  ;;  %v3155_v38 = vadd.s32 424, %v6950_v9  ;;  %vm8133_vm15 = vmmov %vm8089_vm0 }
 0x40f   : > { %v3523_v53 = vmul.f32 %v3459_v41, %v3459_v41  ;;  %2859 = vst.msk [vmem:[%s7017_s26 + $0x130] sm:$0xff] %vm8123_vm7, %v2692_v29  ;;  %v3074_v40 = vsub.f32 %v2692_v29, %v4920_v50  ;;  %v3154_v47 = vadd.s32 416, %v6950_v9  ;;  %v4174_v56 = vsel %vm3280_vm4, 1.0, %v5043_v57  ;;  %vm8135_vm8 = vmmov %vm8127_vm1 }
 0x410   : > { %v3621_v46 = vadd.f32 %v3620_v25, %v3619_v60  ;;  %v3462_v12 = vmul.f32 %v7348_v39, %v3075_v5  ;;  %v3153_v39 = vadd.s32 408, %v6950_v9  ;;  %v3624_v16 = vsel %vm8126_vm13, %v3524_v6, 0.0  ;;  %v4926_v5 = vld [vmem:[%s5163_s30 + $0x160] sm:$0xff]  ;;  %vm8138_vm13 = vmmov %vm8127_vm1 }
 0x411   : > { %v3622_v20 = vsel %vm8124_vm6, %v3523_v53, 0.0  ;;  %v3461_v14 = vmul.f32 %v7352_v22, %v3074_v40  ;;  %v4646_v30 = vpop.f32.mrb[40].mxu1  ;;  %v7477_v41 = vsel %vm3279_vm14, 1.0, %v5043_v57  ;;  %vm3281_vm7 = vcmp.lt.s32.totalorder %v3217_v17, 768  ;;  %vm8136_vm6 = vmmov %vm8127_vm1 }
 0x412   : > { %v3623_v36 = vadd.f32 %v3622_v20, %v3621_v46  ;;  %2862 = vst.msk [vmem:[%s7017_s26 + $0x148] sm:$0xff] %vm8125_vm2, %v4646_v30  ;;  %v3077_v61 = vsub.f32 %v4646_v30, %v4921_v19  ;;  %v2702_v43 = vpop.f32.mrb[41].mxu1  ;;  %v3526_v62 = vmul.f32 %v3462_v12, %v3462_v12  ;;  %v3218_v32 = vadd.s32 %v6956_v1, %v3153_v39  ;;  %vm8137_vm2 = vmmov %vm8127_vm1  ;;  %v4928_v39 = vld [vmem:[%s5163_s30 + $0x170] sm:$0xff] }
 0x413   : > { %v3525_v22 = vmul.f32 %v3461_v14, %v3461_v14  ;;  %2861 = vst.msk [vmem:[%s7017_s26 + $0x140] sm:$0xff] %vm8127_vm1, %v2702_v43  ;;  %v3076_v33 = vsub.f32 %v2702_v43, %v4922_v52  ;;  %v3220_v53 = vadd.s32 %v6956_v1, %v3155_v38  ;;  %v3219_v50 = vadd.s32 %v6956_v1, %v3154_v47  ;;  %vm8139_vm14 = vmmov %vm8127_vm1  ;;  %v4931_v47 = vld [vmem:[%s5163_s30 + $0x198] sm:$0xff] }
 0x414   : > { %v3625_v18 = vadd.f32 %v3624_v16, %v3623_v36  ;;  %v3464_v49 = vmul.f32 %v7375_v37, %v3077_v61  ;;  %v4923_v37 = vld [vmem:[%s5163_s30 + $0x158] sm:$0xff]  ;;  %v3628_v31 = vsel %vm8130_vm5, %v3526_v62, 0.0  ;;  %vm3282_vm0 = vcmp.lt.s32.totalorder %v3218_v32, 768  ;;  %vm8141_vm5 = vmmov %vm8127_vm1  ;;  %v4930_v32 = vld [vmem:[%s5163_s30 + $0x180] sm:$0xff] }
 0x415   : > { %v3626_v59 = vsel %vm8128_vm3, %v3525_v22, 0.0  ;;  %v3463_v23 = vmul.f32 %v7379_v8, %v3076_v33  ;;  %v4649_v4 = vpop.f32.mrb[42].mxu1  ;;  %v4924_v8 = vld [vmem:[%s5163_s30 + $0x150] sm:$0xff]  ;;  %v3157_v20 = vadd.s32 440, %v6950_v9  ;;  %v3156_v14 = vadd.s32 432, %v6950_v9 }
 0x416   : > { %v3627_v21 = vadd.f32 %v3626_v59, %v3625_v18  ;;  %2864 = vst.msk [vmem:[%s7017_s26 + $0x158] sm:$0xff] %vm8129_vm9, %v4649_v4  ;;  %v3079_v44 = vsub.f32 %v4649_v4, %v4923_v37  ;;  %v2712_v51 = vpop.f32.mrb[43].mxu1  ;;  %v3528_v27 = vmul.f32 %v3464_v49, %v3464_v49  ;;  %v4176_v36 = vsel %vm3282_vm0, 1.0, %v5043_v57  ;;  %vm8140_vm9 = vmmov %vm8127_vm1 }
 0x417   : > { %v3527_v24 = vmul.f32 %v3463_v23, %v3463_v23  ;;  %2863 = vst.msk [vmem:[%s7017_s26 + $0x150] sm:$0xff] %vm8131_vm10, %v2712_v51  ;;  %v3078_v3 = vsub.f32 %v2712_v51, %v4924_v8  ;;  %v4175_v19 = vsel %vm3281_vm7, 1.0, %v5043_v57  ;;  %vm3284_vm3 = vcmp.lt.s32.totalorder %v3220_v53, 768  ;;  %v4929_v23 = vld [vmem:[%s5163_s30 + $0x188] sm:$0xff]  ;;  %vm8142_vm10 = vmmov %vm8127_vm1 }
 0x418   : > { %v3629_v0 = vadd.f32 %v3628_v31, %v3627_v21  ;;  %v3466_v54 = vmul.f32 %v7399_v26, %v3079_v44  ;;  %v4925_v26 = vld [vmem:[%s5163_s30 + $0x168] sm:$0xff]  ;;  %v3632_v60 = vsel %vm8134_vm11, %v3528_v27, 0.0  ;;  %vm3283_vm4 = vcmp.lt.s32.totalorder %v3219_v50, 768  ;;  %vm8144_vm7 = vmmov %vm8127_vm1 }
 0x419   : > { %v3630_v10 = vsel %vm8132_vm12, %v3527_v24, 0.0  ;;  %v3465_v55 = vmul.f32 %v7403_v34, %v3078_v3  ;;  %v4652_v48 = vpop.f32.mrb[44].mxu1  ;;  %v3222_v18 = vadd.s32 %v6956_v1, %v3157_v20  ;;  %v3221_v49 = vadd.s32 %v6956_v1, %v3156_v14  ;;  %vm8143_vm12 = vmmov %vm8127_vm1 }
 0x41a   : > { %v3631_v13 = vadd.f32 %v3630_v10, %v3629_v0  ;;  %2866 = vst.msk [vmem:[%s7017_s26 + $0x168] sm:$0xff] %vm8133_vm15, %v4652_v48  ;;  %v3081_v42 = vsub.f32 %v4652_v48, %v4925_v26  ;;  %v2722_v11 = vpop.f32.mrb[45].mxu1  ;;  %v3530_v34 = vmul.f32 %v3466_v54, %v3466_v54  ;;  %v3158_v37 = vadd.s32 448, %v6950_v9  ;;  %vm8145_vm11 = vmmov %vm8127_vm1 }
 0x41b   : > { %v3529_v58 = vmul.f32 %v3465_v55, %v3465_v55  ;;  %2865 = vst.msk [vmem:[%s7017_s26 + $0x160] sm:$0xff] %vm8135_vm8, %v2722_v11  ;;  %v3080_v29 = vsub.f32 %v2722_v11, %v4926_v5  ;;  %v4178_v24 = vsel %vm3284_vm3, 1.0, %v5043_v57  ;;  %v4177_v8 = vsel %vm3283_vm4, 1.0, %v5043_v57  ;;  %vm8146_vm8 = vmmov %vm8127_vm1 }
 0x41c   : > { %v3633_v25 = vadd.f32 %v3632_v60, %v3631_v13  ;;  %v3468_v6 = vmul.f32 %v7424_v7, %v3081_v42  ;;  %v3636_v61 = vsel %vm8138_vm13, %v3530_v34, 0.0  ;;  %vm3286_vm15 = vcmp.lt.s32.totalorder %v3222_v18, 768 }
 0x41d   : > { %v3634_v40 = vsel %vm8136_vm6, %v3529_v58, 0.0  ;;  %v3467_v46 = vmul.f32 %v7428_v35, %v3080_v29  ;;  %v4655_v12 = vpop.f32.mrb[46].mxu1  ;;  %vm3285_vm0 = vcmp.lt.s32.totalorder %v3221_v49, 768  ;;  %v3161_v58 = vadd.s32 472, %v6950_v9  ;;  %vm8147_vm6 = vmmov %vm8127_vm1 }
 0x41e   : > { %v3635_v30 = vadd.f32 %v3634_v40, %v3633_v25  ;;  %2868 = vst.msk [vmem:[%s7017_s26 + $0x178] sm:$0xff] %vm8137_vm2, %v4655_v12  ;;  %v3083_v7 = vsub.f32 %v4655_v12, %v4927_v45  ;;  %v2732_v15 = vpop.f32.mrb[47].mxu1  ;;  %v3532_v35 = vmul.f32 %v3468_v6, %v3468_v6  ;;  %v3160_v5 = vadd.s32 464, %v6950_v9  ;;  %vm8148_vm2 = vmmov %vm8127_vm1 }
 0x41f   : > { %v3531_v43 = vmul.f32 %v3467_v46, %v3467_v46  ;;  %2867 = vst.msk [vmem:[%s7017_s26 + $0x170] sm:$0xff] %vm8127_vm1, %v2732_v15  ;;  %v3082_v28 = vsub.f32 %v2732_v15, %v4928_v39  ;;  %v4180_v53 = vsel %vm3286_vm15, 1.0, %v5043_v57  ;;  %v4179_v50 = vsel %vm3285_vm0, 1.0, %v5043_v57  ;;  %v4933_v46 = vld [vmem:[%s5163_s30 + $0x1a8] sm:$0xff]  ;;  %vm8149_vm3 = vmmov %vm8148_vm2 }
 0x420   : > { %v3637_v16 = vadd.f32 %v3636_v61, %v3635_v30  ;;  %v3470_v62 = vmul.f32 %v7451_v2, %v3083_v7  ;;  %v3159_v2 = vadd.s32 456, %v6950_v9  ;;  %v3640_v44 = vsel %vm8141_vm5, %v3532_v35, 0.0  ;;  %vm8150_vm4 = vmmov %vm8148_vm2  ;;  %v4934_v7 = vld [vmem:[%s5163_s30 + $0x1a0] sm:$0xff] }
 0x421   : > { %v3638_v22 = vsel %vm8139_vm14, %v3531_v43, 0.0  ;;  %v3469_v52 = vmul.f32 %v7455_v63, %v3082_v28  ;;  %v4658_v33 = vpop.f32.mrb[48].mxu1  ;;  %v3226_v61 = vadd.s32 %v6956_v1, %v3161_v58  ;;  %v3225_v35 = vadd.s32 %v6956_v1, %v3160_v5  ;;  %vm8151_vm14 = vmmov %vm8148_vm2  ;;  %v4939_v58 = vld [vmem:[%s5163_s30 + $0x1d8] sm:$0xff] }
 0x422   : > { %v3639_v59 = vadd.f32 %v3638_v22, %v3637_v16  ;;  %2870 = vst.msk [vmem:[%s7017_s26 + $0x188] sm:$0xff] %vm8140_vm9, %v4658_v33  ;;  %v3085_v4 = vsub.f32 %v4658_v33, %v4929_v23  ;;  %v2742_v21 = vpop.f32.mrb[49].mxu1  ;;  %v3534_v51 = vmul.f32 %v3470_v62, %v3470_v62  ;;  %v3224_v48 = vadd.s32 %v6956_v1, %v3159_v2  ;;  %vm8152_vm9 = vmmov %vm8148_vm2  ;;  %v4936_v2 = vld [vmem:[%s5163_s30 + $0x1b0] sm:$0xff] }
 0x423   : > { %v3533_v63 = vmul.f32 %v3469_v52, %v3469_v52  ;;  %2869 = vst.msk [vmem:[%s7017_s26 + $0x180] sm:$0xff] %vm8142_vm10, %v2742_v21  ;;  %v3084_v17 = vsub.f32 %v2742_v21, %v4930_v32  ;;  %v3163_v16 = vadd.s32 488, %v6950_v9  ;;  %v3162_v62 = vadd.s32 480, %v6950_v9  ;;  %v4935_v52 = vld [vmem:[%s5163_s30 + $0x1b8] sm:$0xff]  ;;  %vm8153_vm5 = vmmov %vm8148_vm2 }
 0x424   : > { %v3641_v31 = vadd.f32 %v3640_v44, %v3639_v59  ;;  %v3472_v27 = vmul.f32 %v4174_v56, %v3085_v4  ;;  %v3223_v56 = vadd.s32 %v6956_v1, %v3158_v37  ;;  %v3644_v13 = vsel %vm8145_vm11, %v3534_v51, 0.0  ;;  %vm8154_vm10 = vmmov %vm8148_vm2 }
 0x425   : > { %v3642_v3 = vsel %vm8143_vm12, %v3533_v63, 0.0  ;;  %v3471_v0 = vmul.f32 %v7477_v41, %v3084_v17  ;;  %v4661_v54 = vpop.f32.mrb[50].mxu1  ;;  %v4932_v41 = vld [vmem:[%s5163_s30 + $0x190] sm:$0xff]  ;;  %vm3288_vm13 = vcmp.lt.s32.totalorder %v3224_v48, 768  ;;  %vm3290_vm12 = vcmp.lt.s32.totalorder %v3226_v61, 768  ;;  %vm8155_vm0 = vmmov %vm8148_vm2  ;;  %v4938_v48 = vld [vmem:[%s5163_s30 + $0x1c0] sm:$0xff] }
 0x426   : > { %v3643_v38 = vadd.f32 %v3642_v3, %v3641_v31  ;;  %2872 = vst.msk [vmem:[%s7017_s26 + $0x198] sm:$0xff] %vm8144_vm7, %v4661_v54  ;;  %v3087_v10 = vsub.f32 %v4661_v54, %v4931_v47  ;;  %v2752_v55 = vpop.f32.mrb[51].mxu1  ;;  %v3536_v26 = vmul.f32 %v3472_v27, %v3472_v27  ;;  %vm3287_vm1 = vcmp.lt.s32.totalorder %v3223_v56, 768  ;;  %vm8156_vm7 = vmmov %vm8155_vm0 }
 0x427   : > { %v3535_v42 = vmul.f32 %v3471_v0, %v3471_v0  ;;  %2871 = vst.msk [vmem:[%s7017_s26 + $0x190] sm:$0xff] %vm8146_vm8, %v2752_v55  ;;  %v3086_v11 = vsub.f32 %v2752_v55, %v4932_v41  ;;  %v4182_v49 = vsel %vm3288_vm13, 1.0, %v5043_v57  ;;  %v4181_v59 = vsel %vm3287_vm1, 1.0, %v5043_v57  ;;  %vm8157_vm11 = vmmov %vm8155_vm0 }
 0x428   : > { %v3645_v60 = vadd.f32 %v3644_v13, %v3643_v38  ;;  %v3474_v34 = vmul.f32 %v4176_v36, %v3087_v10  ;;  %v3648_v14 = vsel %vm8149_vm3, %v3536_v26, 0.0  ;;  %vm3289_vm15 = vcmp.lt.s32.totalorder %v3225_v35, 768  ;;  %vm8158_vm8 = vmmov %vm8155_vm0 }
 0x429   : > { %v3646_v29 = vsel %vm8147_vm6, %v3535_v42, 0.0  ;;  %v3473_v25 = vmul.f32 %v4175_v19, %v3086_v11  ;;  %v4664_v6 = vpop.f32.mrb[52].mxu1  ;;  %v3228_v31 = vadd.s32 %v6956_v1, %v3163_v16  ;;  %v3227_v27 = vadd.s32 %v6956_v1, %v3162_v62  ;;  %vm8159_vm6 = vmmov %vm8155_vm0  ;;  %v4942_v16 = vld [vmem:[%s5163_s30 + $0x1e0] sm:$0xff] }
 0x42a   : > { %v3647_v40 = vadd.f32 %v3646_v29, %v3645_v60  ;;  %2874 = vst.msk [vmem:[%s7017_s26 + $0x1a8] sm:$0xff] %vm8148_vm2, %v4664_v6  ;;  %v3089_v12 = vsub.f32 %v4664_v6, %v4933_v46  ;;  %v2762_v20 = vpop.f32.mrb[53].mxu1  ;;  %v3538_v30 = vmul.f32 %v3474_v34, %v3474_v34  ;;  %v3165_v54 = vadd.s32 504, %v6950_v9  ;;  %vm8160_vm1 = vmmov %vm8155_vm0  ;;  %v4940_v46 = vld [vmem:[%s5163_s30 + $0x1d0] sm:$0xff] }
 0x42b   : > { %v3537_v45 = vmul.f32 %v3473_v25, %v3473_v25  ;;  %2873 = vst.msk [vmem:[%s7017_s26 + $0x1a0] sm:$0xff] %vm8150_vm4, %v2762_v20  ;;  %v3088_v15 = vsub.f32 %v2762_v20, %v4934_v7  ;;  %v3164_v38 = vadd.s32 496, %v6950_v9  ;;  %v4184_v42 = vsel %vm3290_vm12, 1.0, %v5043_v57  ;;  %vm8161_vm3 = vmmov %vm8155_vm0 }
 0x42c   : > { %v3649_v36 = vadd.f32 %v3648_v14, %v3647_v40  ;;  %v3476_v19 = vmul.f32 %v4178_v24, %v3089_v12  ;;  %v3652_v23 = vsel %vm8153_vm5, %v3538_v30, 0.0  ;;  %v4183_v41 = vsel %vm3289_vm15, 1.0, %v5043_v57  ;;  %vm8162_vm4 = vmmov %vm8155_vm0 }
 0x42d   : > { %v3650_v43 = vsel %vm8151_vm14, %v3537_v45, 0.0  ;;  %v3475_v39 = vmul.f32 %v4177_v8, %v3088_v15  ;;  %v4667_v28 = vpop.f32.mrb[54].mxu1  ;;  %v4937_v8 = vld [vmem:[%s5163_s30 + $0x1c8] sm:$0xff]  ;;  %vm3292_vm2 = vcmp.lt.s32.totalorder %v3228_v31, 768  ;;  %vm3291_vm13 = vcmp.lt.s32.totalorder %v3227_v27, 768  ;;  %vm8163_vm14 = vmmov %vm8155_vm0 }
 0x42e   : > { %v3651_v22 = vadd.f32 %v3650_v43, %v3649_v36  ;;  %2876 = vst.msk [vmem:[%s7017_s26 + $0x1b8] sm:$0xff] %vm8152_vm9, %v4667_v28  ;;  %v3091_v33 = vsub.f32 %v4667_v28, %v4935_v52  ;;  %v2772_v18 = vpop.f32.mrb[55].mxu1  ;;  %v3540_v4 = vmul.f32 %v3476_v19, %v3476_v19  ;;  %v3230_v25 = vadd.s32 %v6956_v1, %v3165_v54  ;;  %vm8164_vm9 = vmmov %vm8155_vm0  ;;  %v4941_v19 = vld [vmem:[%s5163_s30 + $0x1e8] sm:$0xff] }
 0x42f   : > { %v3539_v21 = vmul.f32 %v3475_v39, %v3475_v39  ;;  %2875 = vst.msk [vmem:[%s7017_s26 + $0x1b0] sm:$0xff] %vm8154_vm10, %v2772_v18  ;;  %v3090_v37 = vsub.f32 %v2772_v18, %v4936_v2  ;;  %v3229_v6 = vadd.s32 %v6956_v1, %v3164_v38  ;;  %v4186_v1 = vsel %vm3292_vm2, 1.0, %v5043_v57  ;;  %vm8165_vm12 = vmmov %vm8155_vm0 }
 0x430   : > { %v3653_v44 = vadd.f32 %v3652_v23, %v3651_v22  ;;  %v3478_v51 = vmul.f32 %v4180_v53, %v3091_v33  ;;  %v3656_v47 = vsel %vm8157_vm11, %v3540_v4, 0.0  ;;  %v4185_v15 = vsel %vm3291_vm13, 1.0, %v5043_v57  ;;  %vm8166_vm15 = vmmov %vm8155_vm0  ;;  %v4943_v4 = vld [vmem:[%s5163_s30 + $0x1f8] sm:$0xff] }
 0x431   : > { %v3654_v63 = vsel %vm8155_vm0, %v3539_v21, 0.0  ;;  %v3477_v32 = vmul.f32 %v4179_v50, %v3090_v37  ;;  %v4670_v17 = vpop.f32.mrb[56].mxu1  ;;  %vm3294_vm5 = vcmp.lt.s32.totalorder %v3230_v25, 768  ;;  %vm3293_vm10 = vcmp.lt.s32.totalorder %v3229_v6, 768  ;;  %vm8168_vm11 = vmmov %vm8155_vm0 }
 0x432   : > { %v3655_v24 = vadd.f32 %v3654_v63, %v3653_v44  ;;  %2878 = vst.msk [vmem:[%s7017_s26 + $0x1c8] sm:$0xff] %vm8156_vm7, %v4670_v17  ;;  %v3093_v3 = vsub.f32 %v4670_v17, %v4937_v8  ;;  %v2782_v0 = vpop.f32.mrb[57].mxu1  ;;  %v3542_v10 = vmul.f32 %v3478_v51, %v3478_v51  ;;  %vm8167_vm7 = vmmov %vm8155_vm0  ;;  %v4187_v37 = vsel %vm3293_vm10, 1.0, %v5043_v57 }
 0x433   : > { %v3541_v55 = vmul.f32 %v3477_v32, %v3477_v32  ;;  %2877 = vst.msk [vmem:[%s7017_s26 + $0x1c0] sm:$0xff] %vm8158_vm8, %v2782_v0  ;;  %v3092_v56 = vsub.f32 %v2782_v0, %v4938_v48  ;;  %vm8169_vm8 = vmmov %vm8155_vm0  ;;  %v4944_v32 = vld [vmem:[%s5163_s30 + $0x1f0] sm:$0xff]  ;;  %s222_s30 = scalar_lea.vmem [#allocation2], %s3846_s23 }
 0x434   : > { %v3657_v13 = vadd.f32 %v3656_v47, %v3655_v24  ;;  %v3480_v26 = vmul.f32 %v4182_v49, %v3093_v3  ;;  %v3660_v53 = vsel %vm8161_vm3, %v3542_v10, 0.0  ;;  %vm8171_vm2 = vmmov %vm8155_vm0  ;;  %s3713_s9 = sshll.u32 %s222_s30, 4  ;;  %s3714_s9 = int_to_ptr.vmem [resolvable:$true] %s3713_s9 }
 0x435   : > { %v3658_v9 = vsel %vm8159_vm6, %v3541_v55, 0.0  ;;  %v3479_v11 = vmul.f32 %v4181_v59, %v3092_v56  ;;  %v4673_v60 = vpop.f32.mrb[58].mxu1  ;;  %v4188_v59 = vsel %vm3294_vm5, 1.0, %v5043_v57  ;;  %vm8170_vm6 = vmmov %vm8155_vm0  ;;  %s4945_s12 = scalar_lea.vmem %s3714_s9, 512  ;;  %p4952_p0 = scmp.lt.s32.totalorder %s3714_s9, %s4950_s14 }
 0x436   : > { %v3659_v34 = vadd.f32 %v3658_v9, %v3657_v13  ;;  %2880 = vst.msk [vmem:[%s7017_s26 + $0x1d8] sm:$0xff] %vm8160_vm1, %v4673_v60  ;;  %v3095_v5 = vsub.f32 %v4673_v60, %v4939_v58  ;;  %v2792_v29 = vpop.f32.mrb[59].mxu1  ;;  %v3544_v50 = vmul.f32 %v3480_v26, %v3480_v26  ;;  %vm8172_vm13 = vmmov %vm8155_vm0  ;;  %p4946_p11 = scmp.ne.s32.totalorder %s3714_s9, %s4945_s12  ;;  %p4953_p1 = scmp.lt.s32.totalorder %s4951_s15, %s4945_s12 }
 0x437   : > { %v3543_v40 = vmul.f32 %v3479_v11, %v3479_v11  ;;  %2879 = vst.msk [vmem:[%s7017_s26 + $0x1d0] sm:$0xff] %vm8162_vm4, %v2792_v29  ;;  %v3094_v12 = vsub.f32 %v2792_v29, %v4940_v46  ;;  %vm8173_vm1 = vmmov %vm8155_vm0 }
 0x438   : > { %v3661_v20 = vadd.f32 %v3660_v53, %v3659_v34  ;;  %v3482_v14 = vmul.f32 %v4184_v42, %v3095_v5  ;;  %v3664_v43 = vsel %vm8165_vm12, %v3544_v50, 0.0  ;;  %p4947_p12 = pnand %p4946_p11, %p5114_p5  ;;  %p4954_p2 = por %p4953_p1, %p4952_p0 }
 0x439   : > { %v3662_v30 = vsel %vm8163_vm14, %v3543_v40, 0.0  ;;  %v3481_v45 = vmul.f32 %v4183_v41, %v3094_v12  ;;  %v4676_v7 = vpop.f32.mrb[60].mxu1 }
 0x43a   : > { %v3663_v36 = vadd.f32 %v3662_v30, %v3661_v20  ;;  %2882 = vst.msk [vmem:[%s7017_s26 + $0x1e8] sm:$0xff] %vm8164_vm9, %v4676_v7  ;;  %v3097_v61 = vsub.f32 %v4676_v7, %v4941_v19  ;;  %v2802_v35 = vpop.f32.mrb[61].mxu1  ;;  %v3546_v39 = vmul.f32 %v3482_v14, %v3482_v14  ;;  %p4948_p13 = pneg %p4947_p12 }
 0x43b   : > { %v3545_v28 = vmul.f32 %v3481_v45, %v3481_v45  ;;  %2881 = vst.msk [vmem:[%s7017_s26 + $0x1e0] sm:$0xff] %vm8166_vm15, %v2802_v35  ;;  %v3096_v62 = vsub.f32 %v2802_v35, %v4942_v16 }
 0x43c   : > { %v3665_v22 = vadd.f32 %v3664_v43, %v3663_v36  ;;  %v3484_v52 = vmul.f32 %v4186_v1, %v3097_v61  ;;  %v3668_v44 = vsel %vm8168_vm11, %v3546_v39, 0.0  ;;  %p4955_p3 = pnand %p4954_p2, %p4948_p13 }
 0x43d   : > { %v3666_v33 = vsel %vm8155_vm0, %v3545_v28, 0.0  ;;  %v3483_v18 = vmul.f32 %v4185_v15, %v3096_v62  ;;  %v4679_v49 = vpop.f32.mrb[62].mxu1 }
 0x43e   : > { %v3667_v23 = vadd.f32 %v3666_v33, %v3665_v22  ;;  %2884 = vst.msk [vmem:[%s7017_s26 + $0x1f8] sm:$0xff] %vm8167_vm7, %v4679_v49  ;;  %v3099_v21 = vsub.f32 %v4679_v49, %v4943_v4  ;;  %v2812_v2 = vpop.f32.mrb[63].mxu1  ;;  %v3548_v51 = vmul.f32 %v3484_v52, %v3484_v52 }
 0x43f   : > { %v3547_v63 = vmul.f32 %v3483_v18, %v3483_v18  ;;  %2883 = vst.msk [vmem:[%s7017_s26 + $0x1f0] sm:$0xff] %vm8169_vm8, %v2812_v2  ;;  %v3098_v17 = vsub.f32 %v2812_v2, %v4944_v32 }
 0x440   : > { %v3669_v31 = vadd.f32 %v3668_v44, %v3667_v23  ;;  %v3486_v27 = vmul.f32 %v4188_v59, %v3099_v21  ;;  %v3672_v0 = vsel %vm8171_vm2, %v3548_v51, 0.0 }
 0x441   : > { %v3670_v24 = vsel %vm8170_vm6, %v3547_v63, 0.0  ;;  %v3485_v8 = vmul.f32 %v4187_v37, %v3098_v17  ;;  %v2952_v56 = vpop.f32.mrb[64].mxu1 }
 0x442   : > { %v3671_v3 = vadd.f32 %v3670_v24, %v3669_v31  ;;  %v3550_v54 = vmul.f32 %v3486_v27, %v3486_v27  ;;  %v4824_v26 = vtrunc.f32 %v2952_v56  ;;  %v2954_v41 = vpop.f32.mrb[65].mxu1 }
 0x443   : > { %v3549_v38 = vmul.f32 %v3485_v8, %v3485_v8  ;;  %v4826_v11 = vtrunc.f32 %v2954_v41 }
 0x444   : > { %v3673_v57 = vadd.f32 %v3672_v0, %v3671_v3  ;;  %v3676_v55 = vsel %vm8173_vm1, %v3550_v54, 0.0  ;;  %v4825_v34 = vcvt.f32.s32 %v4824_v26 }
 0x445   : > { %v3674_v47 = vsel %vm8172_vm13, %v3549_v38, 0.0  ;;  %v4827_v5 = vcvt.f32.s32 %v4826_v11 }
 0x446   : > { %v3675_v10 = vadd.f32 %v3674_v47, %v3673_v57  ;;  %3032 = vst [vmem:[%s222_s30] sm:$0xff] %v4825_v34 }
 0x447   : > { %3033 = vst [vmem:[%s222_s30 + $0x8] sm:$0xff] %v4827_v5 }
 0x448   : > { %v3677_v48 = vadd.f32 %v3676_v55, %v3675_v10 }
 0x44a   : > { %3678 = vadd.xlane.f32.xlu0 %v3677_v48 }
 0x461   : > { %v3023_v13 = vpop.f32.mrb[64].mxu0 }
 0x462   : > { %v4828_v42 = vtrunc.f32 %v3023_v13  ;;  %v3025_v9 = vpop.f32.mrb[65].mxu0 }
 0x463   : > { %v4830_v60 = vtrunc.f32 %v3025_v9 }
 0x464   : > { %v4829_v58 = vcvt.f32.s32 %v4828_v42 }
 0x465   : > { %v4831_v29 = vcvt.f32.s32 %v4830_v60 }
 0x466   : > { %3034 = vst [vmem:[%s222_s30 + $0x10] sm:$0xff] %v4829_v58 }
 0x467   : > { %3035 = vst [vmem:[%s222_s30 + $0x18] sm:$0xff] %v4831_v29 }
 0x468   : > { %4958 = shalt.err (!%p4955_p3)
}
 0x469   : > { %s4959_s16 = scalar_lea.hbm %s7625_s8, 512  ;;  %s4963_s26 = scalar_lea.hbm %s7696_s3, 1024 }
 0x46a   : > { %p4960_p4 = scmp.ne.s32.totalorder %s7625_s8, %s4959_s16  ;;  %p4964_p9 = scmp.lt.u32.totalorder %s7625_s8, %s7696_s3 }
 0x46b   : > { %p4965_p10 = scmp.lt.u32.totalorder %s4963_s26, %s4959_s16  ;;  %p4967_p12 = scmp.lt.u32.totalorder %s4959_s16, %s7625_s8 }
 0x46c   : > { %p4961_p7 = pnand %p4960_p4, %p5114_p5 }
 0x46d   : > { %p4966_p11 = por %p4965_p10, %p4964_p9 }
 0x46e   : > { %p4962_p8 = pneg %p4961_p7 }
 0x46f   : > { %p4968_p13 = por %p4967_p12, %p4966_p11 }
 0x471   : > { %p4969_p0 = pnand %p4968_p13, %p4962_p8 }
 0x473   : > { %4972 = shalt.err (!%p4969_p0)
}
 0x474   : > { %4834 = dma.vmem_to_hbm [thread:$0]  (%p5114_p5), %s3714_s9, 512, %s7625_s8, %s3690_s10  }
 0x475   : > { %s235_s6 = scalar_lea.vmem [#allocation4], %s7617_s11  ;;  %s4192_s12 = sshll.u32 %s5097_s22, 4 }
 0x476   : > { %s3730_s7 = sshll.u32 %s235_s6, 4  ;;  %s7652_s10 = scalar_lea.hbm %s7698_s5, %s4192_s12  ;;  %s7647_s7 = int_to_ptr.vmem [resolvable:$true] %s3730_s7 }
 0x477   : > { %s3700_s14 = scalar_lea.sflag [#allocation5], %s7617_s11  ;;  %s4973_s15 = scalar_lea.vmem %s7647_s7, 16 }
 0x478   : > { %p4974_p1 = scmp.ne.s32.totalorder %s7647_s7, %s4973_s15  ;;  %s5045_s22 = smov [#allocation4]  }
 0x479   : > { %s4977_s16 = sshll.u32 %s5045_s22, 4  ;;  %s4978_s16 = int_to_ptr.vmem [resolvable:$false] %s4977_s16 }
 0x47a   : > { %p4975_p2 = pnand %p4974_p1, %p5114_p5  ;;  %s4979_s17 = scalar_lea.vmem %s4978_s16, 32 }
 0x47b   : > { %p4980_p4 = scmp.lt.s32.totalorder %s7647_s7, %s4978_s16  ;;  %p4981_p7 = scmp.lt.s32.totalorder %s4979_s17, %s4973_s15 }
 0x47c   : > { %p4976_p3 = pneg %p4975_p2 }
 0x47d   : > { %p4982_p8 = por %p4981_p7, %p4980_p4 }
 0x47f   : > { %p4983_p9 = pnand %p4982_p8, %p4976_p3 }
 0x4d7   : > { %v3679_v25 = vpop.xlane.xlu0 %3678 }
 0x4d8   : > { %v3680_v6 = vrot.slane %v3679_v25, 4 }
 0x4da   : > { %v3681_v53 = vadd.f32 %v3680_v6, %v3679_v25 }
 0x4dc   : > { %v3682_v50 = vrot.slane %v3681_v53, 2 }
 0x4de   : > { %v3683_v40 = vadd.f32 %v3682_v50, %v3681_v53 }
 0x4e0   : > { %v3684_v46 = vrot.slane %v3683_v40, 1 }
 0x4e2   : > { %v3685_v12 = vadd.f32 %v3684_v46, %v3683_v40 }
 0x4e4   : > { %4832 = vpush %v3685_v12 }
 0x515   : > { %s4833_s13 = spop %4832 }
 0x516   : > { %v3687_v20 = vstv %s4833_s13 }
 0x517   : > { %3688 = vst [vmem:[%s235_s6] sm:$0x1] %v3687_v20 }
 0x518   : > { %4986 = shalt.err (!%p4983_p9)
}
 0x519   : > { %s4987_s11 = scalar_lea.hbm %s7652_s10, 16  ;;  %s4991_s23 = scalar_lea.hbm %s7698_s5, 32 }
 0x51a   : > { %p4988_p10 = scmp.ne.s32.totalorder %s7652_s10, %s4987_s11  ;;  %p4992_p13 = scmp.lt.u32.totalorder %s7652_s10, %s7698_s5 }
 0x51b   : > { %p4993_p0 = scmp.lt.u32.totalorder %s4991_s23, %s4987_s11  ;;  %p4995_p2 = scmp.lt.u32.totalorder %s4987_s11, %s7652_s10 }
 0x51c   : > { %p4989_p11 = pnand %p4988_p10, %p5114_p5 }
 0x51d   : > { %p4994_p1 = por %p4993_p0, %p4992_p13 }
 0x51e   : > { %p4990_p12 = pneg %p4989_p11 }
 0x51f   : > { %p4996_p3 = por %p4995_p2, %p4994_p1 }
 0x521   : > { %p4997_p4 = pnand %p4996_p3, %p4990_p12 }
 0x523   : > { %5000 = shalt.err (!%p4997_p4)
}
 0x524   : > { %4835 = dma.vmem_to_hbm [thread:$0]  (%p5114_p5), %s7647_s7, 16, %s7652_s10, %s3700_s14  }
 0x525 PF: > { %p4845_p7 = scmp.ge.s32.totalorder %s5039_s21, 2  ;;  %s3742_s12 = sand.u32 1, %s5027_s18  }
 0x526   : > { %s3743_s13 = scalar_lea.sflag [#allocation3], %s3742_s12 }
 0x527   : > { %p4839_p8 = pnand %p4845_p7, %p5118_p6 }
 0x529   : > { %5018 = dma.done.wait (!%p4839_p8), %s3743_s13, 512  }
 0x52a   : > { %5020 = vsyncadd (!%p4839_p8), %s3743_s13, 4294966784  ;;  %s3760_s8 = scalar_lea.sflag [#allocation5], %s3742_s12 }
 0x52b   : > { %5022 = dma.done.wait (!%p4839_p8), %s3760_s8, 16  }
 0x52c   : > { %5024 = vsyncadd (!%p4839_p8), %s3760_s8, 4294967280  ;;  %p19_p5 = scmp.ge.s32.totalorder %s5101_s24, 4   ;;  %s8174_s18 = smov %s5031_s19 }
 0x52d   : > { %s8175_s19 = smov %s5035_s20  ;;  %s8176_s20 = smov %s5112_s27 }
 0x52e   : > { %s8177_s21 = smov %s5101_s24  ;;  %21 = sbr.rel (!%p19_p5) target bundleno = 5 (0x5), region = 96 }
 0x535   :  { %3764 = vsyncpa [#allocation3], 1 }
 0x536   :  { %3766 = vsyncpa [#allocation3 + $0x1], 1 }
 0x537   :  { %3767 = vsyncpa [#allocation5], 1 }
 0x538   :  { %3769 = vsyncpa [#allocation5 + $0x1], 1 }

</bundles_post_ra>
